<compile_context>
chip_gen: v6e
topology: v6e:2x2x1
jax: 0.10.0
libtpu: 0.0.40
codegen_flags: <defaults>
</compile_context>

<pallas_src>
import functools

import jax
import jax.numpy as jnp
from jax.experimental import pallas as pl
from jax.experimental.pallas import tpu as pltpu

STATE_DIM = 32
NUM_FEATURES = 1
IN_DIM = STATE_DIM + NUM_FEATURES      # 33
HIDDEN_MSG = 128
HIDDEN_OUT = 128
OUT_DIM = 2
NUM_ROUNDS = 5
LN_EPS = 1e-5
LEAKY_SLOPE = 0.01


# ----------------------------------------------------------------------------
# In-kernel helpers
# ----------------------------------------------------------------------------
def _layer_norm(x, gamma, beta):
    # Independent mean / mean-of-squares -> the two lane reductions don't
    # serialize behind the centering subtraction.
    m = jnp.mean(x, axis=-1, keepdims=True)
    m2 = jnp.mean(x * x, axis=-1, keepdims=True)
    var = m2 - m * m
    return (x - m) * jax.lax.rsqrt(var + LN_EPS) * gamma + beta


def _leaky_relu(x):
    return jnp.where(x >= 0, x, LEAKY_SLOPE * x)


def _softplus(x):
    # torch.nn.Softplus(beta=1); stable form (threshold=20 linearisation not
    # needed — mathematically equivalent up to f32 rounding).
    return jnp.maximum(x, 0.0) + jnp.log(1.0 + jnp.exp(-jnp.abs(x)))


# ----------------------------------------------------------------------------
# Fused GNN kernel: all rounds + gather/scatter + pooling + output head
# ----------------------------------------------------------------------------
def gnn_kernel(from_ref, tg_ref, ecoul_ref,
               w1s_ref, p1_ref, w2_ref, p2_ref,
               wo1_ref, p3_ref, wo2b_ref,
               out_ref, *, n_nodes):
    e_pad = from_ref.shape[0]
    n_graphs = out_ref.shape[0]

    # Packed index rows: row0 = node_to (padded with -1), row1 = node_graph_index
    # (padded with -1).  Padded entries never match the iota -> zero one-hot
    # column/row -> they contribute nothing (matches index_add_ semantics).
    tg = tg_ref[...]
    to_row = tg[0:1, :e_pad]                                         # (1, E)
    graph_row = tg[1:2, :n_nodes]                                    # (1, N)

    gather_mat = (from_ref[...] ==
                  jax.lax.broadcasted_iota(jnp.int32, (e_pad, n_nodes), 1)
                  ).astype(jnp.float32)                              # (E, N)
    scatter_mat = (to_row ==
                   jax.lax.broadcasted_iota(jnp.int32, (n_nodes, e_pad), 0)
                   ).astype(jnp.float32)                             # (N, E)
    graph_mat = (graph_row ==
                 jax.lax.broadcasted_iota(jnp.int32, (n_graphs, n_nodes), 0)
                 ).astype(jnp.float32)                               # (G, N)

    # Unpack stacked small parameters with static (zero-cost) slices.
    w1e = p1_ref[0:1, :]
    b1 = p1_ref[1:2, :]
    g1 = p1_ref[2:3, :]
    be1 = p1_ref[3:4, :]
    b2 = p2_ref[0:1, :]
    g2 = p2_ref[1:2, :]
    be2 = p2_ref[2:3, :]
    bo1 = p3_ref[0:1, :]
    go1 = p3_ref[1:2, :]
    beo1 = p3_ref[2:3, :]
    w1s = w1s_ref[...]                                               # (32, 128)
    w2 = w2_ref[...]                                                 # (128, 32)

    # cat(state, e_coulomb) @ W1 == state @ W1[:32] + e_coulomb * W1[32].
    # Edge-feature term and bias are round-invariant -> hoisted.
    edge_term = ecoul_ref[...] * w1e + b1                            # (E, 128)

    state = jnp.zeros((n_nodes, STATE_DIM), jnp.float32)
    for r in range(NUM_ROUNDS):
        if r == 0:
            # Round 0: state == 0 so the gathered-state contribution vanishes.
            h = edge_term
        else:
            # Project the N node rows first, then gather the E edge rows:
            # gather_mat @ (state @ W1s)  ==  (gather_mat @ state) @ W1s
            proj = jnp.dot(state, w1s,
                           preferred_element_type=jnp.float32)       # (N, 128)
            h = jnp.dot(gather_mat, proj,
                        preferred_element_type=jnp.float32) + edge_term
        h = _leaky_relu(_layer_norm(h, g1, be1))
        msg = jnp.dot(h, w2, preferred_element_type=jnp.float32) + b2
        msg = _leaky_relu(_layer_norm(msg, g2, be2))
        # state.index_add_(0, node_to, message)
        state = state + jnp.dot(scatter_mat, msg,
                                preferred_element_type=jnp.float32)

    # graph_state.index_add_(0, node_graph_index, state)
    graph_state = jnp.dot(graph_mat, state,
                          preferred_element_type=jnp.float32)        # (G, 32)

    # output_net + tensor_split + softplus(var) + concat, fused here.
    h = jnp.dot(graph_state, wo1_ref[...],
                preferred_element_type=jnp.float32) + bo1
    h = _leaky_relu(_layer_norm(h, go1, beo1))
    ev = (jnp.dot(h, wo2b_ref[0:HIDDEN_OUT, :],
                  preferred_element_type=jnp.float32)
          + wo2b_ref[HIDDEN_OUT:HIDDEN_OUT + 1, :])                  # (G, 2)

    col = jax.lax.broadcasted_iota(jnp.int32, ev.shape, 1)
    out_ref[...] = jnp.where(col == 0, ev, _softplus(ev))


# ----------------------------------------------------------------------------
# Wrapper
# ----------------------------------------------------------------------------
@functools.partial(jax.jit, static_argnames=("num_nodes", "num_graphs"))
def gnn_forward(params, edge_list, edge_coulomb, node_graph_index,
                *, num_nodes, num_graphs):
    assert node_graph_index.shape[0] == num_nodes
    node_to = edge_list[:, 0].astype(jnp.int32)
    node_from = edge_list[:, 1].astype(jnp.int32)
    num_edges = edge_list.shape[0]
    e_pad = ((num_edges + 7) // 8) * 8
    pad = e_pad - num_edges
    row_len = max(e_pad, num_nodes)

    # from/ecoul stay as (E,1) columns (edge index on sublanes for the gather
    # one-hot); to/graph indices are packed lane-dense into one (2, row_len)
    # int32 array.  All pads carry -1 (masked out by the one-hot compares).
    from_col = jnp.pad(node_from, (0, pad), constant_values=-1)[:, None]
    to_row = jnp.pad(node_to, (0, row_len - num_edges), constant_values=-1)
    graph_row = jnp.pad(node_graph_index.astype(jnp.int32),
                        (0, row_len - num_nodes), constant_values=-1)
    tg = jnp.stack([to_row, graph_row], axis=0)                      # (2, row_len)
    ecoul = jnp.pad(edge_coulomb.astype(jnp.float32), ((0, pad), (0, 0)))

    (w1s, w1e, b1, g1, be1,
     w2, b2, g2, be2,
     wo1, bo1, go1, beo1,
     wo2, bo2) = params

    # Pack small row-vector parameters to cut the per-operand DMA prologue.
    p1 = jnp.concatenate([w1e, b1, g1, be1], axis=0)                 # (4, 128)
    p2 = jnp.concatenate([b2, g2, be2], axis=0)                      # (3, 32)
    p3 = jnp.concatenate([bo1, go1, beo1], axis=0)                   # (3, 128)
    wo2b = jnp.concatenate([wo2, bo2], axis=0)                       # (129, 2)

    operands = (from_col, tg, ecoul, w1s, p1, w2, p2, wo1, p3, wo2b)
    vmem_spec = pl.BlockSpec(memory_space=pltpu.MemorySpace.VMEM)

    # Single ungridded invocation: no pipeline machinery, no double buffering.
    return pl.pallas_call(
        functools.partial(gnn_kernel, n_nodes=num_nodes),
        out_shape=jax.ShapeDtypeStruct((num_graphs, OUT_DIM), jnp.float32),
        in_specs=[vmem_spec] * len(operands),
        out_specs=vmem_spec,
    )(*operands)


# ----------------------------------------------------------------------------
# Parameter init (deterministic, matches torch init scheme in float32)
# ----------------------------------------------------------------------------
def init_params(key):
    def kaiming_fan_out(k, fan_in, fan_out):
        # torch.nn.init.kaiming_normal_(mode='fan_out', nonlinearity='leaky_relu')
        std = (2.0 / fan_out) ** 0.5
        return std * jax.random.normal(k, (fan_in, fan_out), jnp.float32)

    def bias(k, fan_in, n):
        bound = 1.0 / (fan_in ** 0.5)
        return jax.random.uniform(k, (1, n), jnp.float32, -bound, bound)

    ks = jax.random.split(key, 8)

    w1 = kaiming_fan_out(ks[0], IN_DIM, HIDDEN_MSG)          # (33, 128)
    w1s, w1e = w1[:STATE_DIM], w1[STATE_DIM:]                # (32,128), (1,128)
    b1 = bias(ks[1], IN_DIM, HIDDEN_MSG)
    g1 = jnp.ones((1, HIDDEN_MSG), jnp.float32)
    be1 = jnp.zeros((1, HIDDEN_MSG), jnp.float32)

    w2 = kaiming_fan_out(ks[2], HIDDEN_MSG, STATE_DIM)
    b2 = bias(ks[3], HIDDEN_MSG, STATE_DIM)
    g2 = jnp.ones((1, STATE_DIM), jnp.float32)
    be2 = jnp.zeros((1, STATE_DIM), jnp.float32)

    wo1 = kaiming_fan_out(ks[4], STATE_DIM, HIDDEN_OUT)
    bo1 = bias(ks[5], STATE_DIM, HIDDEN_OUT)
    go1 = jnp.ones((1, HIDDEN_OUT), jnp.float32)
    beo1 = jnp.zeros((1, HIDDEN_OUT), jnp.float32)

    wo2 = kaiming_fan_out(ks[6], HIDDEN_OUT, OUT_DIM)
    bo2 = bias(ks[7], HIDDEN_OUT, OUT_DIM)

    return (w1s, w1e, b1, g1, be1,
            w2, b2, g2, be2,
            wo1, bo1, go1, beo1,
            wo2, bo2)


# ----------------------------------------------------------------------------
if __name__ == "__main__":
    key = jax.random.PRNGKey(0)
    k_par, k_e0, k_e1, k_c = jax.random.split(key, 4)

    num_nodes = 16
    num_graphs = 2
    num_edges = 42  # deliberately not a multiple of 8 to exercise padding/masking

    params = init_params(k_par)

    node_graph_index = jnp.concatenate(
        [jnp.zeros((8,), jnp.int32), jnp.ones((8,), jnp.int32)])

    # edge_list columns are (to-node, from-node); 21 edges per graph.
    e0 = jax.random.randint(k_e0, (21, 2), 0, 8, jnp.int32)
    e1 = jax.random.randint(k_e1, (21, 2), 8, 16, jnp.int32)
    edge_list = jnp.concatenate([e0, e1], axis=0)                 # (E, 2)
    edge_coulomb = jax.random.normal(k_c, (num_edges, 1), jnp.float32)

    out = gnn_forward(params, edge_list, edge_coulomb, node_graph_index,
                      num_nodes=num_nodes, num_graphs=num_graphs)
    out = jax.block_until_ready(out)
    assert out.shape == (num_graphs, OUT_DIM)
    print("KERNEL_OK")
</pallas_src>

<mosaic_0001>
module attributes {stable_mosaic.version = 11 : i64} {
  func.func @gnn_kernel(%arg0: memref<48x1xi32, #tpu.memory_space<vmem>>, %arg1: memref<2x48xi32, #tpu.memory_space<vmem>>, %arg2: memref<48x1xf32, #tpu.memory_space<vmem>>, %arg3: memref<32x128xf32, #tpu.memory_space<vmem>>, %arg4: memref<4x128xf32, #tpu.memory_space<vmem>>, %arg5: memref<128x32xf32, #tpu.memory_space<vmem>>, %arg6: memref<3x32xf32, #tpu.memory_space<vmem>>, %arg7: memref<32x128xf32, #tpu.memory_space<vmem>>, %arg8: memref<3x128xf32, #tpu.memory_space<vmem>>, %arg9: memref<129x2xf32, #tpu.memory_space<vmem>>, %arg10: memref<2x2xf32, #tpu.memory_space<vmem>>) attributes {dimension_semantics = [], scalar_prefetch = 0 : i64, scratch_operands = 0 : i64, tpu.core_type = #tpu.core_type<tc>} {
    %c0 = arith.constant 0 : index
    %c0_0 = arith.constant 0 : index
    %0 = vector.load %arg1[%c0, %c0_0] : memref<2x48xi32, #tpu.memory_space<vmem>>, vector<2x48xi32>
    %1 = vector.extract_strided_slice %0 {offsets = [0, 0], sizes = [1, 48], strides = [1, 1]} : vector<2x48xi32> to vector<1x48xi32>
    %2 = vector.extract_strided_slice %0 {offsets = [1, 0], sizes = [1, 16], strides = [1, 1]} : vector<2x48xi32> to vector<1x16xi32>
    %c0_1 = arith.constant 0 : index
    %c0_2 = arith.constant 0 : index
    %3 = vector.load %arg0[%c0_1, %c0_2] : memref<48x1xi32, #tpu.memory_space<vmem>>, vector<48x1xi32>
    %4 = tpu.iota {dimensions = array<i32: 1>} : vector<48x16xi32>
    %5 = vector.broadcast %3 : vector<48x1xi32> to vector<48x16xi32>
    %6 = arith.cmpi eq, %5, %4 : vector<48x16xi32>
    %7 = arith.extui %6 : vector<48x16xi1> to vector<48x16xi32>
    %8 = arith.sitofp %7 : vector<48x16xi32> to vector<48x16xf32>
    %9 = tpu.iota {dimensions = array<i32: 0>} : vector<16x48xi32>
    %10 = vector.broadcast %1 : vector<1x48xi32> to vector<16x48xi32>
    %11 = arith.cmpi eq, %10, %9 : vector<16x48xi32>
    %12 = arith.extui %11 : vector<16x48xi1> to vector<16x48xi32>
    %13 = arith.sitofp %12 : vector<16x48xi32> to vector<16x48xf32>
    %14 = tpu.iota {dimensions = array<i32: 0>} : vector<2x16xi32>
    %15 = vector.broadcast %2 : vector<1x16xi32> to vector<2x16xi32>
    %16 = arith.cmpi eq, %15, %14 : vector<2x16xi32>
    %17 = arith.extui %16 : vector<2x16xi1> to vector<2x16xi32>
    %18 = arith.sitofp %17 : vector<2x16xi32> to vector<2x16xf32>
    %c0_3 = arith.constant 0 : index
    %c0_4 = arith.constant 0 : index
    %19 = vector.load %arg4[%c0_3, %c0_4] : memref<4x128xf32, #tpu.memory_space<vmem>>, vector<1x128xf32>
    %c1 = arith.constant 1 : index
    %c0_5 = arith.constant 0 : index
    %20 = vector.load %arg4[%c1, %c0_5] : memref<4x128xf32, #tpu.memory_space<vmem>>, vector<1x128xf32>
    %c2 = arith.constant 2 : index
    %c0_6 = arith.constant 0 : index
    %21 = vector.load %arg4[%c2, %c0_6] : memref<4x128xf32, #tpu.memory_space<vmem>>, vector<1x128xf32>
    %c3 = arith.constant 3 : index
    %c0_7 = arith.constant 0 : index
    %22 = vector.load %arg4[%c3, %c0_7] : memref<4x128xf32, #tpu.memory_space<vmem>>, vector<1x128xf32>
    %c0_8 = arith.constant 0 : index
    %c0_9 = arith.constant 0 : index
    %23 = vector.load %arg6[%c0_8, %c0_9] : memref<3x32xf32, #tpu.memory_space<vmem>>, vector<1x32xf32>
    %c1_10 = arith.constant 1 : index
    %c0_11 = arith.constant 0 : index
    %24 = vector.load %arg6[%c1_10, %c0_11] : memref<3x32xf32, #tpu.memory_space<vmem>>, vector<1x32xf32>
    %c2_12 = arith.constant 2 : index
    %c0_13 = arith.constant 0 : index
    %25 = vector.load %arg6[%c2_12, %c0_13] : memref<3x32xf32, #tpu.memory_space<vmem>>, vector<1x32xf32>
    %c0_14 = arith.constant 0 : index
    %c0_15 = arith.constant 0 : index
    %26 = vector.load %arg8[%c0_14, %c0_15] : memref<3x128xf32, #tpu.memory_space<vmem>>, vector<1x128xf32>
    %c1_16 = arith.constant 1 : index
    %c0_17 = arith.constant 0 : index
    %27 = vector.load %arg8[%c1_16, %c0_17] : memref<3x128xf32, #tpu.memory_space<vmem>>, vector<1x128xf32>
    %c2_18 = arith.constant 2 : index
    %c0_19 = arith.constant 0 : index
    %28 = vector.load %arg8[%c2_18, %c0_19] : memref<3x128xf32, #tpu.memory_space<vmem>>, vector<1x128xf32>
    %c0_20 = arith.constant 0 : index
    %c0_21 = arith.constant 0 : index
    %29 = vector.load %arg3[%c0_20, %c0_21] : memref<32x128xf32, #tpu.memory_space<vmem>>, vector<32x128xf32>
    %c0_22 = arith.constant 0 : index
    %c0_23 = arith.constant 0 : index
    %30 = vector.load %arg5[%c0_22, %c0_23] : memref<128x32xf32, #tpu.memory_space<vmem>>, vector<128x32xf32>
    %c0_24 = arith.constant 0 : index
    %c0_25 = arith.constant 0 : index
    %31 = vector.load %arg2[%c0_24, %c0_25] : memref<48x1xf32, #tpu.memory_space<vmem>>, vector<48x1xf32>
    %32 = vector.broadcast %31 : vector<48x1xf32> to vector<48x128xf32>
    %33 = vector.broadcast %19 : vector<1x128xf32> to vector<48x128xf32>
    %34 = arith.mulf %32, %33 : vector<48x128xf32>
    %35 = vector.broadcast %20 : vector<1x128xf32> to vector<48x128xf32>
    %36 = arith.addf %34, %35 : vector<48x128xf32>
    %cst = arith.constant 0.000000e+00 : f32
    %37 = vector.broadcast %cst : f32 to vector<16x32xf32>
    %cst_26 = arith.constant dense<0.000000e+00> : vector<48xf32>
    %38 = vector.multi_reduction <add>, %36, %cst_26 [1] : vector<48x128xf32> to vector<48xf32>
    %39 = vector.shape_cast %38 : vector<48xf32> to vector<48x1xf32>
    %cst_27 = arith.constant 1.280000e+02 : f32
    %40 = vector.broadcast %cst_27 : f32 to vector<48x1xf32>
    %41 = arith.divf %39, %40 : vector<48x1xf32>
    %42 = arith.mulf %36, %36 : vector<48x128xf32>
    %cst_28 = arith.constant dense<0.000000e+00> : vector<48xf32>
    %43 = vector.multi_reduction <add>, %42, %cst_28 [1] : vector<48x128xf32> to vector<48xf32>
    %44 = vector.shape_cast %43 : vector<48xf32> to vector<48x1xf32>
    %cst_29 = arith.constant 1.280000e+02 : f32
    %45 = vector.broadcast %cst_29 : f32 to vector<48x1xf32>
    %46 = arith.divf %44, %45 : vector<48x1xf32>
    %47 = arith.mulf %41, %41 : vector<48x1xf32>
    %48 = arith.subf %46, %47 : vector<48x1xf32>
    %49 = vector.broadcast %41 : vector<48x1xf32> to vector<48x128xf32>
    %50 = arith.subf %36, %49 : vector<48x128xf32>
    %cst_30 = arith.constant 9.99999974E-6 : f32
    %51 = vector.broadcast %cst_30 : f32 to vector<48x1xf32>
    %52 = arith.addf %48, %51 : vector<48x1xf32>
    %53 = math.rsqrt %52 : vector<48x1xf32>
    %54 = vector.broadcast %53 : vector<48x1xf32> to vector<48x128xf32>
    %55 = arith.mulf %50, %54 : vector<48x128xf32>
    %56 = vector.broadcast %21 : vector<1x128xf32> to vector<48x128xf32>
    %57 = arith.mulf %55, %56 : vector<48x128xf32>
    %58 = vector.broadcast %22 : vector<1x128xf32> to vector<48x128xf32>
    %59 = arith.addf %57, %58 : vector<48x128xf32>
    %cst_31 = arith.constant 0.000000e+00 : f32
    %60 = vector.broadcast %cst_31 : f32 to vector<48x128xf32>
    %61 = arith.cmpf oge, %59, %60 : vector<48x128xf32>
    %cst_32 = arith.constant 0.00999999977 : f32
    %62 = vector.broadcast %cst_32 : f32 to vector<48x128xf32>
    %63 = arith.mulf %62, %59 : vector<48x128xf32>
    %64 = arith.select %61, %59, %63 : vector<48x128xi1>, vector<48x128xf32>
    %cst_33 = arith.constant dense<0.000000e+00> : vector<48x32xf32>
    %65 = tpu.matmul %64, %30, %cst_33 {dimension_numbers = #tpu.dot_dimension_numbers<[1], [0], [0], [1], [0, 0, 1, 1], [], []>} : vector<48x128xf32>, vector<128x32xf32>, vector<48x32xf32> -> vector<48x32xf32>
    %66 = vector.broadcast %23 : vector<1x32xf32> to vector<48x32xf32>
    %67 = arith.addf %65, %66 : vector<48x32xf32>
    %cst_34 = arith.constant dense<0.000000e+00> : vector<48xf32>
    %68 = vector.multi_reduction <add>, %67, %cst_34 [1] : vector<48x32xf32> to vector<48xf32>
    %69 = vector.shape_cast %68 : vector<48xf32> to vector<48x1xf32>
    %cst_35 = arith.constant 3.200000e+01 : f32
    %70 = vector.broadcast %cst_35 : f32 to vector<48x1xf32>
    %71 = arith.divf %69, %70 : vector<48x1xf32>
    %72 = arith.mulf %67, %67 : vector<48x32xf32>
    %cst_36 = arith.constant dense<0.000000e+00> : vector<48xf32>
    %73 = vector.multi_reduction <add>, %72, %cst_36 [1] : vector<48x32xf32> to vector<48xf32>
    %74 = vector.shape_cast %73 : vector<48xf32> to vector<48x1xf32>
    %cst_37 = arith.constant 3.200000e+01 : f32
    %75 = vector.broadcast %cst_37 : f32 to vector<48x1xf32>
    %76 = arith.divf %74, %75 : vector<48x1xf32>
    %77 = arith.mulf %71, %71 : vector<48x1xf32>
    %78 = arith.subf %76, %77 : vector<48x1xf32>
    %79 = vector.broadcast %71 : vector<48x1xf32> to vector<48x32xf32>
    %80 = arith.subf %67, %79 : vector<48x32xf32>
    %cst_38 = arith.constant 9.99999974E-6 : f32
    %81 = vector.broadcast %cst_38 : f32 to vector<48x1xf32>
    %82 = arith.addf %78, %81 : vector<48x1xf32>
    %83 = math.rsqrt %82 : vector<48x1xf32>
    %84 = vector.broadcast %83 : vector<48x1xf32> to vector<48x32xf32>
    %85 = arith.mulf %80, %84 : vector<48x32xf32>
    %86 = vector.broadcast %24 : vector<1x32xf32> to vector<48x32xf32>
    %87 = arith.mulf %85, %86 : vector<48x32xf32>
    %88 = vector.broadcast %25 : vector<1x32xf32> to vector<48x32xf32>
    %89 = arith.addf %87, %88 : vector<48x32xf32>
    %cst_39 = arith.constant 0.000000e+00 : f32
    %90 = vector.broadcast %cst_39 : f32 to vector<48x32xf32>
    %91 = arith.cmpf oge, %89, %90 : vector<48x32xf32>
    %cst_40 = arith.constant 0.00999999977 : f32
    %92 = vector.broadcast %cst_40 : f32 to vector<48x32xf32>
    %93 = arith.mulf %92, %89 : vector<48x32xf32>
    %94 = arith.select %91, %89, %93 : vector<48x32xi1>, vector<48x32xf32>
    %cst_41 = arith.constant dense<0.000000e+00> : vector<16x32xf32>
    %95 = tpu.matmul %13, %94, %cst_41 {dimension_numbers = #tpu.dot_dimension_numbers<[1], [0], [0], [1], [0, 0, 1, 1], [], []>} : vector<16x48xf32>, vector<48x32xf32>, vector<16x32xf32> -> vector<16x32xf32>
    %96 = arith.addf %37, %95 : vector<16x32xf32>
    %cst_42 = arith.constant dense<0.000000e+00> : vector<16x128xf32>
    %97 = tpu.matmul %96, %29, %cst_42 {dimension_numbers = #tpu.dot_dimension_numbers<[1], [0], [0], [1], [0, 0, 1, 1], [], []>} : vector<16x32xf32>, vector<32x128xf32>, vector<16x128xf32> -> vector<16x128xf32>
    %cst_43 = arith.constant dense<0.000000e+00> : vector<48x128xf32>
    %98 = tpu.matmul %8, %97, %cst_43 {dimension_numbers = #tpu.dot_dimension_numbers<[1], [0], [0], [1], [0, 0, 1, 1], [], []>} : vector<48x16xf32>, vector<16x128xf32>, vector<48x128xf32> -> vector<48x128xf32>
    %99 = arith.addf %98, %36 : vector<48x128xf32>
    %cst_44 = arith.constant dense<0.000000e+00> : vector<48xf32>
    %100 = vector.multi_reduction <add>, %99, %cst_44 [1] : vector<48x128xf32> to vector<48xf32>
    %101 = vector.shape_cast %100 : vector<48xf32> to vector<48x1xf32>
    %cst_45 = arith.constant 1.280000e+02 : f32
    %102 = vector.broadcast %cst_45 : f32 to vector<48x1xf32>
    %103 = arith.divf %101, %102 : vector<48x1xf32>
    %104 = arith.mulf %99, %99 : vector<48x128xf32>
    %cst_46 = arith.constant dense<0.000000e+00> : vector<48xf32>
    %105 = vector.multi_reduction <add>, %104, %cst_46 [1] : vector<48x128xf32> to vector<48xf32>
    %106 = vector.shape_cast %105 : vector<48xf32> to vector<48x1xf32>
    %cst_47 = arith.constant 1.280000e+02 : f32
    %107 = vector.broadcast %cst_47 : f32 to vector<48x1xf32>
    %108 = arith.divf %106, %107 : vector<48x1xf32>
    %109 = arith.mulf %103, %103 : vector<48x1xf32>
    %110 = arith.subf %108, %109 : vector<48x1xf32>
    %111 = vector.broadcast %103 : vector<48x1xf32> to vector<48x128xf32>
    %112 = arith.subf %99, %111 : vector<48x128xf32>
    %cst_48 = arith.constant 9.99999974E-6 : f32
    %113 = vector.broadcast %cst_48 : f32 to vector<48x1xf32>
    %114 = arith.addf %110, %113 : vector<48x1xf32>
    %115 = math.rsqrt %114 : vector<48x1xf32>
    %116 = vector.broadcast %115 : vector<48x1xf32> to vector<48x128xf32>
    %117 = arith.mulf %112, %116 : vector<48x128xf32>
    %118 = vector.broadcast %21 : vector<1x128xf32> to vector<48x128xf32>
    %119 = arith.mulf %117, %118 : vector<48x128xf32>
    %120 = vector.broadcast %22 : vector<1x128xf32> to vector<48x128xf32>
    %121 = arith.addf %119, %120 : vector<48x128xf32>
    %cst_49 = arith.constant 0.000000e+00 : f32
    %122 = vector.broadcast %cst_49 : f32 to vector<48x128xf32>
    %123 = arith.cmpf oge, %121, %122 : vector<48x128xf32>
    %cst_50 = arith.constant 0.00999999977 : f32
    %124 = vector.broadcast %cst_50 : f32 to vector<48x128xf32>
    %125 = arith.mulf %124, %121 : vector<48x128xf32>
    %126 = arith.select %123, %121, %125 : vector<48x128xi1>, vector<48x128xf32>
    %cst_51 = arith.constant dense<0.000000e+00> : vector<48x32xf32>
    %127 = tpu.matmul %126, %30, %cst_51 {dimension_numbers = #tpu.dot_dimension_numbers<[1], [0], [0], [1], [0, 0, 1, 1], [], []>} : vector<48x128xf32>, vector<128x32xf32>, vector<48x32xf32> -> vector<48x32xf32>
    %128 = vector.broadcast %23 : vector<1x32xf32> to vector<48x32xf32>
    %129 = arith.addf %127, %128 : vector<48x32xf32>
    %cst_52 = arith.constant dense<0.000000e+00> : vector<48xf32>
    %130 = vector.multi_reduction <add>, %129, %cst_52 [1] : vector<48x32xf32> to vector<48xf32>
    %131 = vector.shape_cast %130 : vector<48xf32> to vector<48x1xf32>
    %cst_53 = arith.constant 3.200000e+01 : f32
    %132 = vector.broadcast %cst_53 : f32 to vector<48x1xf32>
    %133 = arith.divf %131, %132 : vector<48x1xf32>
    %134 = arith.mulf %129, %129 : vector<48x32xf32>
    %cst_54 = arith.constant dense<0.000000e+00> : vector<48xf32>
    %135 = vector.multi_reduction <add>, %134, %cst_54 [1] : vector<48x32xf32> to vector<48xf32>
    %136 = vector.shape_cast %135 : vector<48xf32> to vector<48x1xf32>
    %cst_55 = arith.constant 3.200000e+01 : f32
    %137 = vector.broadcast %cst_55 : f32 to vector<48x1xf32>
    %138 = arith.divf %136, %137 : vector<48x1xf32>
    %139 = arith.mulf %133, %133 : vector<48x1xf32>
    %140 = arith.subf %138, %139 : vector<48x1xf32>
    %141 = vector.broadcast %133 : vector<48x1xf32> to vector<48x32xf32>
    %142 = arith.subf %129, %141 : vector<48x32xf32>
    %cst_56 = arith.constant 9.99999974E-6 : f32
    %143 = vector.broadcast %cst_56 : f32 to vector<48x1xf32>
    %144 = arith.addf %140, %143 : vector<48x1xf32>
    %145 = math.rsqrt %144 : vector<48x1xf32>
    %146 = vector.broadcast %145 : vector<48x1xf32> to vector<48x32xf32>
    %147 = arith.mulf %142, %146 : vector<48x32xf32>
    %148 = vector.broadcast %24 : vector<1x32xf32> to vector<48x32xf32>
    %149 = arith.mulf %147, %148 : vector<48x32xf32>
    %150 = vector.broadcast %25 : vector<1x32xf32> to vector<48x32xf32>
    %151 = arith.addf %149, %150 : vector<48x32xf32>
    %cst_57 = arith.constant 0.000000e+00 : f32
    %152 = vector.broadcast %cst_57 : f32 to vector<48x32xf32>
    %153 = arith.cmpf oge, %151, %152 : vector<48x32xf32>
    %cst_58 = arith.constant 0.00999999977 : f32
    %154 = vector.broadcast %cst_58 : f32 to vector<48x32xf32>
    %155 = arith.mulf %154, %151 : vector<48x32xf32>
    %156 = arith.select %153, %151, %155 : vector<48x32xi1>, vector<48x32xf32>
    %cst_59 = arith.constant dense<0.000000e+00> : vector<16x32xf32>
    %157 = tpu.matmul %13, %156, %cst_59 {dimension_numbers = #tpu.dot_dimension_numbers<[1], [0], [0], [1], [0, 0, 1, 1], [], []>} : vector<16x48xf32>, vector<48x32xf32>, vector<16x32xf32> -> vector<16x32xf32>
    %158 = arith.addf %96, %157 : vector<16x32xf32>
    %cst_60 = arith.constant dense<0.000000e+00> : vector<16x128xf32>
    %159 = tpu.matmul %158, %29, %cst_60 {dimension_numbers = #tpu.dot_dimension_numbers<[1], [0], [0], [1], [0, 0, 1, 1], [], []>} : vector<16x32xf32>, vector<32x128xf32>, vector<16x128xf32> -> vector<16x128xf32>
    %cst_61 = arith.constant dense<0.000000e+00> : vector<48x128xf32>
    %160 = tpu.matmul %8, %159, %cst_61 {dimension_numbers = #tpu.dot_dimension_numbers<[1], [0], [0], [1], [0, 0, 1, 1], [], []>} : vector<48x16xf32>, vector<16x128xf32>, vector<48x128xf32> -> vector<48x128xf32>
    %161 = arith.addf %160, %36 : vector<48x128xf32>
    %cst_62 = arith.constant dense<0.000000e+00> : vector<48xf32>
    %162 = vector.multi_reduction <add>, %161, %cst_62 [1] : vector<48x128xf32> to vector<48xf32>
    %163 = vector.shape_cast %162 : vector<48xf32> to vector<48x1xf32>
    %cst_63 = arith.constant 1.280000e+02 : f32
    %164 = vector.broadcast %cst_63 : f32 to vector<48x1xf32>
    %165 = arith.divf %163, %164 : vector<48x1xf32>
    %166 = arith.mulf %161, %161 : vector<48x128xf32>
    %cst_64 = arith.constant dense<0.000000e+00> : vector<48xf32>
    %167 = vector.multi_reduction <add>, %166, %cst_64 [1] : vector<48x128xf32> to vector<48xf32>
    %168 = vector.shape_cast %167 : vector<48xf32> to vector<48x1xf32>
    %cst_65 = arith.constant 1.280000e+02 : f32
    %169 = vector.broadcast %cst_65 : f32 to vector<48x1xf32>
    %170 = arith.divf %168, %169 : vector<48x1xf32>
    %171 = arith.mulf %165, %165 : vector<48x1xf32>
    %172 = arith.subf %170, %171 : vector<48x1xf32>
    %173 = vector.broadcast %165 : vector<48x1xf32> to vector<48x128xf32>
    %174 = arith.subf %161, %173 : vector<48x128xf32>
    %cst_66 = arith.constant 9.99999974E-6 : f32
    %175 = vector.broadcast %cst_66 : f32 to vector<48x1xf32>
    %176 = arith.addf %172, %175 : vector<48x1xf32>
    %177 = math.rsqrt %176 : vector<48x1xf32>
    %178 = vector.broadcast %177 : vector<48x1xf32> to vector<48x128xf32>
    %179 = arith.mulf %174, %178 : vector<48x128xf32>
    %180 = vector.broadcast %21 : vector<1x128xf32> to vector<48x128xf32>
    %181 = arith.mulf %179, %180 : vector<48x128xf32>
    %182 = vector.broadcast %22 : vector<1x128xf32> to vector<48x128xf32>
    %183 = arith.addf %181, %182 : vector<48x128xf32>
    %cst_67 = arith.constant 0.000000e+00 : f32
    %184 = vector.broadcast %cst_67 : f32 to vector<48x128xf32>
    %185 = arith.cmpf oge, %183, %184 : vector<48x128xf32>
    %cst_68 = arith.constant 0.00999999977 : f32
    %186 = vector.broadcast %cst_68 : f32 to vector<48x128xf32>
    %187 = arith.mulf %186, %183 : vector<48x128xf32>
    %188 = arith.select %185, %183, %187 : vector<48x128xi1>, vector<48x128xf32>
    %cst_69 = arith.constant dense<0.000000e+00> : vector<48x32xf32>
    %189 = tpu.matmul %188, %30, %cst_69 {dimension_numbers = #tpu.dot_dimension_numbers<[1], [0], [0], [1], [0, 0, 1, 1], [], []>} : vector<48x128xf32>, vector<128x32xf32>, vector<48x32xf32> -> vector<48x32xf32>
    %190 = vector.broadcast %23 : vector<1x32xf32> to vector<48x32xf32>
    %191 = arith.addf %189, %190 : vector<48x32xf32>
    %cst_70 = arith.constant dense<0.000000e+00> : vector<48xf32>
    %192 = vector.multi_reduction <add>, %191, %cst_70 [1] : vector<48x32xf32> to vector<48xf32>
    %193 = vector.shape_cast %192 : vector<48xf32> to vector<48x1xf32>
    %cst_71 = arith.constant 3.200000e+01 : f32
    %194 = vector.broadcast %cst_71 : f32 to vector<48x1xf32>
    %195 = arith.divf %193, %194 : vector<48x1xf32>
    %196 = arith.mulf %191, %191 : vector<48x32xf32>
    %cst_72 = arith.constant dense<0.000000e+00> : vector<48xf32>
    %197 = vector.multi_reduction <add>, %196, %cst_72 [1] : vector<48x32xf32> to vector<48xf32>
    %198 = vector.shape_cast %197 : vector<48xf32> to vector<48x1xf32>
    %cst_73 = arith.constant 3.200000e+01 : f32
    %199 = vector.broadcast %cst_73 : f32 to vector<48x1xf32>
    %200 = arith.divf %198, %199 : vector<48x1xf32>
    %201 = arith.mulf %195, %195 : vector<48x1xf32>
    %202 = arith.subf %200, %201 : vector<48x1xf32>
    %203 = vector.broadcast %195 : vector<48x1xf32> to vector<48x32xf32>
    %204 = arith.subf %191, %203 : vector<48x32xf32>
    %cst_74 = arith.constant 9.99999974E-6 : f32
    %205 = vector.broadcast %cst_74 : f32 to vector<48x1xf32>
    %206 = arith.addf %202, %205 : vector<48x1xf32>
    %207 = math.rsqrt %206 : vector<48x1xf32>
    %208 = vector.broadcast %207 : vector<48x1xf32> to vector<48x32xf32>
    %209 = arith.mulf %204, %208 : vector<48x32xf32>
    %210 = vector.broadcast %24 : vector<1x32xf32> to vector<48x32xf32>
    %211 = arith.mulf %209, %210 : vector<48x32xf32>
    %212 = vector.broadcast %25 : vector<1x32xf32> to vector<48x32xf32>
    %213 = arith.addf %211, %212 : vector<48x32xf32>
    %cst_75 = arith.constant 0.000000e+00 : f32
    %214 = vector.broadcast %cst_75 : f32 to vector<48x32xf32>
    %215 = arith.cmpf oge, %213, %214 : vector<48x32xf32>
    %cst_76 = arith.constant 0.00999999977 : f32
    %216 = vector.broadcast %cst_76 : f32 to vector<48x32xf32>
    %217 = arith.mulf %216, %213 : vector<48x32xf32>
    %218 = arith.select %215, %213, %217 : vector<48x32xi1>, vector<48x32xf32>
    %cst_77 = arith.constant dense<0.000000e+00> : vector<16x32xf32>
    %219 = tpu.matmul %13, %218, %cst_77 {dimension_numbers = #tpu.dot_dimension_numbers<[1], [0], [0], [1], [0, 0, 1, 1], [], []>} : vector<16x48xf32>, vector<48x32xf32>, vector<16x32xf32> -> vector<16x32xf32>
    %220 = arith.addf %158, %219 : vector<16x32xf32>
    %cst_78 = arith.constant dense<0.000000e+00> : vector<16x128xf32>
    %221 = tpu.matmul %220, %29, %cst_78 {dimension_numbers = #tpu.dot_dimension_numbers<[1], [0], [0], [1], [0, 0, 1, 1], [], []>} : vector<16x32xf32>, vector<32x128xf32>, vector<16x128xf32> -> vector<16x128xf32>
    %cst_79 = arith.constant dense<0.000000e+00> : vector<48x128xf32>
    %222 = tpu.matmul %8, %221, %cst_79 {dimension_numbers = #tpu.dot_dimension_numbers<[1], [0], [0], [1], [0, 0, 1, 1], [], []>} : vector<48x16xf32>, vector<16x128xf32>, vector<48x128xf32> -> vector<48x128xf32>
    %223 = arith.addf %222, %36 : vector<48x128xf32>
    %cst_80 = arith.constant dense<0.000000e+00> : vector<48xf32>
    %224 = vector.multi_reduction <add>, %223, %cst_80 [1] : vector<48x128xf32> to vector<48xf32>
    %225 = vector.shape_cast %224 : vector<48xf32> to vector<48x1xf32>
    %cst_81 = arith.constant 1.280000e+02 : f32
    %226 = vector.broadcast %cst_81 : f32 to vector<48x1xf32>
    %227 = arith.divf %225, %226 : vector<48x1xf32>
    %228 = arith.mulf %223, %223 : vector<48x128xf32>
    %cst_82 = arith.constant dense<0.000000e+00> : vector<48xf32>
    %229 = vector.multi_reduction <add>, %228, %cst_82 [1] : vector<48x128xf32> to vector<48xf32>
    %230 = vector.shape_cast %229 : vector<48xf32> to vector<48x1xf32>
    %cst_83 = arith.constant 1.280000e+02 : f32
    %231 = vector.broadcast %cst_83 : f32 to vector<48x1xf32>
    %232 = arith.divf %230, %231 : vector<48x1xf32>
    %233 = arith.mulf %227, %227 : vector<48x1xf32>
    %234 = arith.subf %232, %233 : vector<48x1xf32>
    %235 = vector.broadcast %227 : vector<48x1xf32> to vector<48x128xf32>
    %236 = arith.subf %223, %235 : vector<48x128xf32>
    %cst_84 = arith.constant 9.99999974E-6 : f32
    %237 = vector.broadcast %cst_84 : f32 to vector<48x1xf32>
    %238 = arith.addf %234, %237 : vector<48x1xf32>
    %239 = math.rsqrt %238 : vector<48x1xf32>
    %240 = vector.broadcast %239 : vector<48x1xf32> to vector<48x128xf32>
    %241 = arith.mulf %236, %240 : vector<48x128xf32>
    %242 = vector.broadcast %21 : vector<1x128xf32> to vector<48x128xf32>
    %243 = arith.mulf %241, %242 : vector<48x128xf32>
    %244 = vector.broadcast %22 : vector<1x128xf32> to vector<48x128xf32>
    %245 = arith.addf %243, %244 : vector<48x128xf32>
    %cst_85 = arith.constant 0.000000e+00 : f32
    %246 = vector.broadcast %cst_85 : f32 to vector<48x128xf32>
    %247 = arith.cmpf oge, %245, %246 : vector<48x128xf32>
    %cst_86 = arith.constant 0.00999999977 : f32
    %248 = vector.broadcast %cst_86 : f32 to vector<48x128xf32>
    %249 = arith.mulf %248, %245 : vector<48x128xf32>
    %250 = arith.select %247, %245, %249 : vector<48x128xi1>, vector<48x128xf32>
    %cst_87 = arith.constant dense<0.000000e+00> : vector<48x32xf32>
    %251 = tpu.matmul %250, %30, %cst_87 {dimension_numbers = #tpu.dot_dimension_numbers<[1], [0], [0], [1], [0, 0, 1, 1], [], []>} : vector<48x128xf32>, vector<128x32xf32>, vector<48x32xf32> -> vector<48x32xf32>
    %252 = vector.broadcast %23 : vector<1x32xf32> to vector<48x32xf32>
    %253 = arith.addf %251, %252 : vector<48x32xf32>
    %cst_88 = arith.constant dense<0.000000e+00> : vector<48xf32>
    %254 = vector.multi_reduction <add>, %253, %cst_88 [1] : vector<48x32xf32> to vector<48xf32>
    %255 = vector.shape_cast %254 : vector<48xf32> to vector<48x1xf32>
    %cst_89 = arith.constant 3.200000e+01 : f32
    %256 = vector.broadcast %cst_89 : f32 to vector<48x1xf32>
    %257 = arith.divf %255, %256 : vector<48x1xf32>
    %258 = arith.mulf %253, %253 : vector<48x32xf32>
    %cst_90 = arith.constant dense<0.000000e+00> : vector<48xf32>
    %259 = vector.multi_reduction <add>, %258, %cst_90 [1] : vector<48x32xf32> to vector<48xf32>
    %260 = vector.shape_cast %259 : vector<48xf32> to vector<48x1xf32>
    %cst_91 = arith.constant 3.200000e+01 : f32
    %261 = vector.broadcast %cst_91 : f32 to vector<48x1xf32>
    %262 = arith.divf %260, %261 : vector<48x1xf32>
    %263 = arith.mulf %257, %257 : vector<48x1xf32>
    %264 = arith.subf %262, %263 : vector<48x1xf32>
    %265 = vector.broadcast %257 : vector<48x1xf32> to vector<48x32xf32>
    %266 = arith.subf %253, %265 : vector<48x32xf32>
    %cst_92 = arith.constant 9.99999974E-6 : f32
    %267 = vector.broadcast %cst_92 : f32 to vector<48x1xf32>
    %268 = arith.addf %264, %267 : vector<48x1xf32>
    %269 = math.rsqrt %268 : vector<48x1xf32>
    %270 = vector.broadcast %269 : vector<48x1xf32> to vector<48x32xf32>
    %271 = arith.mulf %266, %270 : vector<48x32xf32>
    %272 = vector.broadcast %24 : vector<1x32xf32> to vector<48x32xf32>
    %273 = arith.mulf %271, %272 : vector<48x32xf32>
    %274 = vector.broadcast %25 : vector<1x32xf32> to vector<48x32xf32>
    %275 = arith.addf %273, %274 : vector<48x32xf32>
    %cst_93 = arith.constant 0.000000e+00 : f32
    %276 = vector.broadcast %cst_93 : f32 to vector<48x32xf32>
    %277 = arith.cmpf oge, %275, %276 : vector<48x32xf32>
    %cst_94 = arith.constant 0.00999999977 : f32
    %278 = vector.broadcast %cst_94 : f32 to vector<48x32xf32>
    %279 = arith.mulf %278, %275 : vector<48x32xf32>
    %280 = arith.select %277, %275, %279 : vector<48x32xi1>, vector<48x32xf32>
    %cst_95 = arith.constant dense<0.000000e+00> : vector<16x32xf32>
    %281 = tpu.matmul %13, %280, %cst_95 {dimension_numbers = #tpu.dot_dimension_numbers<[1], [0], [0], [1], [0, 0, 1, 1], [], []>} : vector<16x48xf32>, vector<48x32xf32>, vector<16x32xf32> -> vector<16x32xf32>
    %282 = arith.addf %220, %281 : vector<16x32xf32>
    %cst_96 = arith.constant dense<0.000000e+00> : vector<16x128xf32>
    %283 = tpu.matmul %282, %29, %cst_96 {dimension_numbers = #tpu.dot_dimension_numbers<[1], [0], [0], [1], [0, 0, 1, 1], [], []>} : vector<16x32xf32>, vector<32x128xf32>, vector<16x128xf32> -> vector<16x128xf32>
    %cst_97 = arith.constant dense<0.000000e+00> : vector<48x128xf32>
    %284 = tpu.matmul %8, %283, %cst_97 {dimension_numbers = #tpu.dot_dimension_numbers<[1], [0], [0], [1], [0, 0, 1, 1], [], []>} : vector<48x16xf32>, vector<16x128xf32>, vector<48x128xf32> -> vector<48x128xf32>
    %285 = arith.addf %284, %36 : vector<48x128xf32>
    %cst_98 = arith.constant dense<0.000000e+00> : vector<48xf32>
    %286 = vector.multi_reduction <add>, %285, %cst_98 [1] : vector<48x128xf32> to vector<48xf32>
    %287 = vector.shape_cast %286 : vector<48xf32> to vector<48x1xf32>
    %cst_99 = arith.constant 1.280000e+02 : f32
    %288 = vector.broadcast %cst_99 : f32 to vector<48x1xf32>
    %289 = arith.divf %287, %288 : vector<48x1xf32>
    %290 = arith.mulf %285, %285 : vector<48x128xf32>
    %cst_100 = arith.constant dense<0.000000e+00> : vector<48xf32>
    %291 = vector.multi_reduction <add>, %290, %cst_100 [1] : vector<48x128xf32> to vector<48xf32>
    %292 = vector.shape_cast %291 : vector<48xf32> to vector<48x1xf32>
    %cst_101 = arith.constant 1.280000e+02 : f32
    %293 = vector.broadcast %cst_101 : f32 to vector<48x1xf32>
    %294 = arith.divf %292, %293 : vector<48x1xf32>
    %295 = arith.mulf %289, %289 : vector<48x1xf32>
    %296 = arith.subf %294, %295 : vector<48x1xf32>
    %297 = vector.broadcast %289 : vector<48x1xf32> to vector<48x128xf32>
    %298 = arith.subf %285, %297 : vector<48x128xf32>
    %cst_102 = arith.constant 9.99999974E-6 : f32
    %299 = vector.broadcast %cst_102 : f32 to vector<48x1xf32>
    %300 = arith.addf %296, %299 : vector<48x1xf32>
    %301 = math.rsqrt %300 : vector<48x1xf32>
    %302 = vector.broadcast %301 : vector<48x1xf32> to vector<48x128xf32>
    %303 = arith.mulf %298, %302 : vector<48x128xf32>
    %304 = vector.broadcast %21 : vector<1x128xf32> to vector<48x128xf32>
    %305 = arith.mulf %303, %304 : vector<48x128xf32>
    %306 = vector.broadcast %22 : vector<1x128xf32> to vector<48x128xf32>
    %307 = arith.addf %305, %306 : vector<48x128xf32>
    %cst_103 = arith.constant 0.000000e+00 : f32
    %308 = vector.broadcast %cst_103 : f32 to vector<48x128xf32>
    %309 = arith.cmpf oge, %307, %308 : vector<48x128xf32>
    %cst_104 = arith.constant 0.00999999977 : f32
    %310 = vector.broadcast %cst_104 : f32 to vector<48x128xf32>
    %311 = arith.mulf %310, %307 : vector<48x128xf32>
    %312 = arith.select %309, %307, %311 : vector<48x128xi1>, vector<48x128xf32>
    %cst_105 = arith.constant dense<0.000000e+00> : vector<48x32xf32>
    %313 = tpu.matmul %312, %30, %cst_105 {dimension_numbers = #tpu.dot_dimension_numbers<[1], [0], [0], [1], [0, 0, 1, 1], [], []>} : vector<48x128xf32>, vector<128x32xf32>, vector<48x32xf32> -> vector<48x32xf32>
    %314 = vector.broadcast %23 : vector<1x32xf32> to vector<48x32xf32>
    %315 = arith.addf %313, %314 : vector<48x32xf32>
    %cst_106 = arith.constant dense<0.000000e+00> : vector<48xf32>
    %316 = vector.multi_reduction <add>, %315, %cst_106 [1] : vector<48x32xf32> to vector<48xf32>
    %317 = vector.shape_cast %316 : vector<48xf32> to vector<48x1xf32>
    %cst_107 = arith.constant 3.200000e+01 : f32
    %318 = vector.broadcast %cst_107 : f32 to vector<48x1xf32>
    %319 = arith.divf %317, %318 : vector<48x1xf32>
    %320 = arith.mulf %315, %315 : vector<48x32xf32>
    %cst_108 = arith.constant dense<0.000000e+00> : vector<48xf32>
    %321 = vector.multi_reduction <add>, %320, %cst_108 [1] : vector<48x32xf32> to vector<48xf32>
    %322 = vector.shape_cast %321 : vector<48xf32> to vector<48x1xf32>
    %cst_109 = arith.constant 3.200000e+01 : f32
    %323 = vector.broadcast %cst_109 : f32 to vector<48x1xf32>
    %324 = arith.divf %322, %323 : vector<48x1xf32>
    %325 = arith.mulf %319, %319 : vector<48x1xf32>
    %326 = arith.subf %324, %325 : vector<48x1xf32>
    %327 = vector.broadcast %319 : vector<48x1xf32> to vector<48x32xf32>
    %328 = arith.subf %315, %327 : vector<48x32xf32>
    %cst_110 = arith.constant 9.99999974E-6 : f32
    %329 = vector.broadcast %cst_110 : f32 to vector<48x1xf32>
    %330 = arith.addf %326, %329 : vector<48x1xf32>
    %331 = math.rsqrt %330 : vector<48x1xf32>
    %332 = vector.broadcast %331 : vector<48x1xf32> to vector<48x32xf32>
    %333 = arith.mulf %328, %332 : vector<48x32xf32>
    %334 = vector.broadcast %24 : vector<1x32xf32> to vector<48x32xf32>
    %335 = arith.mulf %333, %334 : vector<48x32xf32>
    %336 = vector.broadcast %25 : vector<1x32xf32> to vector<48x32xf32>
    %337 = arith.addf %335, %336 : vector<48x32xf32>
    %cst_111 = arith.constant 0.000000e+00 : f32
    %338 = vector.broadcast %cst_111 : f32 to vector<48x32xf32>
    %339 = arith.cmpf oge, %337, %338 : vector<48x32xf32>
    %cst_112 = arith.constant 0.00999999977 : f32
    %340 = vector.broadcast %cst_112 : f32 to vector<48x32xf32>
    %341 = arith.mulf %340, %337 : vector<48x32xf32>
    %342 = arith.select %339, %337, %341 : vector<48x32xi1>, vector<48x32xf32>
    %cst_113 = arith.constant dense<0.000000e+00> : vector<16x32xf32>
    %343 = tpu.matmul %13, %342, %cst_113 {dimension_numbers = #tpu.dot_dimension_numbers<[1], [0], [0], [1], [0, 0, 1, 1], [], []>} : vector<16x48xf32>, vector<48x32xf32>, vector<16x32xf32> -> vector<16x32xf32>
    %344 = arith.addf %282, %343 : vector<16x32xf32>
    %cst_114 = arith.constant dense<0.000000e+00> : vector<2x32xf32>
    %345 = tpu.matmul %18, %344, %cst_114 {dimension_numbers = #tpu.dot_dimension_numbers<[1], [0], [0], [1], [0, 0, 1, 1], [], []>} : vector<2x16xf32>, vector<16x32xf32>, vector<2x32xf32> -> vector<2x32xf32>
    %c0_115 = arith.constant 0 : index
    %c0_116 = arith.constant 0 : index
    %346 = vector.load %arg7[%c0_115, %c0_116] : memref<32x128xf32, #tpu.memory_space<vmem>>, vector<32x128xf32>
    %cst_117 = arith.constant dense<0.000000e+00> : vector<2x128xf32>
    %347 = tpu.matmul %345, %346, %cst_117 {dimension_numbers = #tpu.dot_dimension_numbers<[1], [0], [0], [1], [0, 0, 1, 1], [], []>} : vector<2x32xf32>, vector<32x128xf32>, vector<2x128xf32> -> vector<2x128xf32>
    %348 = vector.broadcast %26 : vector<1x128xf32> to vector<2x128xf32>
    %349 = arith.addf %347, %348 : vector<2x128xf32>
    %cst_118 = arith.constant dense<0.000000e+00> : vector<2xf32>
    %350 = vector.multi_reduction <add>, %349, %cst_118 [1] : vector<2x128xf32> to vector<2xf32>
    %351 = vector.shape_cast %350 : vector<2xf32> to vector<2x1xf32>
    %cst_119 = arith.constant 1.280000e+02 : f32
    %352 = vector.broadcast %cst_119 : f32 to vector<2x1xf32>
    %353 = arith.divf %351, %352 : vector<2x1xf32>
    %354 = arith.mulf %349, %349 : vector<2x128xf32>
    %cst_120 = arith.constant dense<0.000000e+00> : vector<2xf32>
    %355 = vector.multi_reduction <add>, %354, %cst_120 [1] : vector<2x128xf32> to vector<2xf32>
    %356 = vector.shape_cast %355 : vector<2xf32> to vector<2x1xf32>
    %cst_121 = arith.constant 1.280000e+02 : f32
    %357 = vector.broadcast %cst_121 : f32 to vector<2x1xf32>
    %358 = arith.divf %356, %357 : vector<2x1xf32>
    %359 = arith.mulf %353, %353 : vector<2x1xf32>
    %360 = arith.subf %358, %359 : vector<2x1xf32>
    %361 = vector.broadcast %353 : vector<2x1xf32> to vector<2x128xf32>
    %362 = arith.subf %349, %361 : vector<2x128xf32>
    %cst_122 = arith.constant 9.99999974E-6 : f32
    %363 = vector.broadcast %cst_122 : f32 to vector<2x1xf32>
    %364 = arith.addf %360, %363 : vector<2x1xf32>
    %365 = math.rsqrt %364 : vector<2x1xf32>
    %366 = vector.broadcast %365 : vector<2x1xf32> to vector<2x128xf32>
    %367 = arith.mulf %362, %366 : vector<2x128xf32>
    %368 = vector.broadcast %27 : vector<1x128xf32> to vector<2x128xf32>
    %369 = arith.mulf %367, %368 : vector<2x128xf32>
    %370 = vector.broadcast %28 : vector<1x128xf32> to vector<2x128xf32>
    %371 = arith.addf %369, %370 : vector<2x128xf32>
    %cst_123 = arith.constant 0.000000e+00 : f32
    %372 = vector.broadcast %cst_123 : f32 to vector<2x128xf32>
    %373 = arith.cmpf oge, %371, %372 : vector<2x128xf32>
    %cst_124 = arith.constant 0.00999999977 : f32
    %374 = vector.broadcast %cst_124 : f32 to vector<2x128xf32>
    %375 = arith.mulf %374, %371 : vector<2x128xf32>
    %376 = arith.select %373, %371, %375 : vector<2x128xi1>, vector<2x128xf32>
    %c0_125 = arith.constant 0 : index
    %c0_126 = arith.constant 0 : index
    %377 = vector.load %arg9[%c0_125, %c0_126] : memref<129x2xf32, #tpu.memory_space<vmem>>, vector<128x2xf32>
    %cst_127 = arith.constant dense<0.000000e+00> : vector<2x2xf32>
    %378 = tpu.matmul %376, %377, %cst_127 {dimension_numbers = #tpu.dot_dimension_numbers<[1], [0], [0], [1], [0, 0, 1, 1], [], []>} : vector<2x128xf32>, vector<128x2xf32>, vector<2x2xf32> -> vector<2x2xf32>
    %c128 = arith.constant 128 : index
    %c0_128 = arith.constant 0 : index
    %379 = vector.load %arg9[%c128, %c0_128] : memref<129x2xf32, #tpu.memory_space<vmem>>, vector<1x2xf32>
    %380 = vector.broadcast %379 : vector<1x2xf32> to vector<2x2xf32>
    %381 = arith.addf %378, %380 : vector<2x2xf32>
    %382 = tpu.iota {dimensions = array<i32: 1>} : vector<2x2xi32>
    %c0_i32 = arith.constant 0 : i32
    %383 = vector.broadcast %c0_i32 : i32 to vector<2x2xi32>
    %384 = arith.cmpi eq, %382, %383 : vector<2x2xi32>
    %cst_129 = arith.constant 0.000000e+00 : f32
    %385 = vector.broadcast %cst_129 : f32 to vector<2x2xf32>
    %386 = arith.maximumf %381, %385 : vector<2x2xf32>
    %387 = math.absf %381 : vector<2x2xf32>
    %cst_130 = arith.constant 0.000000e+00 : f32
    %388 = vector.broadcast %cst_130 : f32 to vector<2x2xf32>
    %389 = arith.subf %388, %387 : vector<2x2xf32>
    %390 = math.exp %389 : vector<2x2xf32>
    %cst_131 = arith.constant 1.000000e+00 : f32
    %391 = vector.broadcast %cst_131 : f32 to vector<2x2xf32>
    %392 = arith.addf %391, %390 : vector<2x2xf32>
    %393 = math.log %392 : vector<2x2xf32>
    %394 = arith.addf %386, %393 : vector<2x2xf32>
    %395 = arith.select %384, %381, %394 : vector<2x2xi1>, vector<2x2xf32>
    %c0_132 = arith.constant 0 : index
    %c0_133 = arith.constant 0 : index
    %396 = vector.load %arg10[%c0_132, %c0_133] : memref<2x2xf32, #tpu.memory_space<vmem>>, vector<2x2xf32>
    tpu.vector_store %arg10[%c0_132, %c0_133], %395 {strides = array<i32>} : memref<2x2xf32, #tpu.memory_space<vmem>>, vector<2x2xf32>,
    return
  }
}

</mosaic_0001>

<bundles_post_ra>
// kernel: gnn_forward.1
= control target key start
LH: loop header
LB: loop body
LE: loop exit
PB: predicated region body
PF: predicated region fallthrough
CT: control target
= control target key end

     0   :  { %v4164_v2 = vmov 0   ;;  %s5574_s0 = inlined_call_operand.vmem [shape: s32[48,1], index: 0, kind: input, shape index: {}]   ;;  %s5575_s1 = inlined_call_operand.vmem [shape: s32[2,48], index: 1, kind: input, shape index: {}]   ;;  %s5576_s2 = inlined_call_operand.vmem [shape: f32[48,1], index: 2, kind: input, shape index: {}]   ;;  %s5577_s3 = inlined_call_operand.vmem [shape: f32[32,128], index: 3, kind: input, shape index: {}]   ;;  %s5578_s4 = inlined_call_operand.vmem [shape: f32[4,128], index: 4, kind: input, shape index: {}]   ;;  %s5579_s5 = inlined_call_operand.vmem [shape: f32[128,32], index: 5, kind: input, shape index: {}]   ;;  %s5580_s6 = inlined_call_operand.vmem [shape: f32[3,32], index: 6, kind: input, shape index: {}]   ;;  %s5581_s7 = inlined_call_operand.vmem [shape: f32[32,128], index: 7, kind: input, shape index: {}]   ;;  %s5582_s8 = inlined_call_operand.vmem [shape: f32[3,128], index: 8, kind: input, shape index: {}]   ;;  %s5583_s9 = inlined_call_operand.vmem [shape: f32[129,2], index: 9, kind: input, shape index: {}]   ;;  %s5584_s10 = inlined_call_operand.hbm [shape: f32[2,2], index: 10, kind: output, shape index: {}]  }
   0x1   :  { %v133_v0 = vld [vmem:[%s5576_s2 + $0x10] sm:$0xff]  ;;  %v131_v1 = vld [vmem:[%s5576_s2] sm:$0xff]  ;;  %3968 = vset.pattern.permute.xlu1 %v4164_v2  ;;  %3967 = vset.pattern.permute.xlu0 %v4164_v2 }
   0x2   :  { %149 = vperm.xlu1 %3968, %v133_v0   ;;  %139 = vperm.xlu0 %3967, %v131_v1  }
   0x3   :  { %15 = vsyncpa [#allocation3], 0  ;;  %v134_v3 = vld [vmem:[%s5576_s2 + $0x18] sm:$0xff]  ;;  %v132_v4 = vld [vmem:[%s5576_s2 + $0x8] sm:$0xff]  ;;  %vm403_vm6 = vcmask 261120   ;;  %vm533_vm8 = vcmask 392192  }
   0x4   :  { %v136_v5 = vld [vmem:[%s5576_s2 + $0x28] sm:$0xff]  ;;  %v135_v6 = vld [vmem:[%s5576_s2 + $0x20] sm:$0xff]  ;;  %v4280_v33 = vld [vmem:[%s5579_s5 + $0x78] sm:$0xff] }
   0x5   :  { %v3248_v7 = vld [vmem:[%s5578_s4] ss:$0 sm:$0xff]  ;;  %v3249_v8 = vld [vmem:[%s5578_s4 + $0x1] ss:$0 sm:$0xff]  ;;  %3534 = vmatprep.subr.mxu0 %v4280_v33  ;;  %v4287_v34 = vld [vmem:[%s5579_s5 + $0x70] sm:$0xff] }
   0x6   :  { %154 = vperm.xlu1 %3968, %v134_v3   ;;  %144 = vperm.xlu0 %3967, %v132_v4   ;;  %v4294_v35 = vld [vmem:[%s5579_s5 + $0x68] sm:$0xff]  ;;  %v4301_v36 = vld [vmem:[%s5579_s5 + $0x60] sm:$0xff]  ;;  %v4308_v37 = vld [vmem:[%s5579_s5 + $0x58] sm:$0xff] }
   0x7   :  { %3535 = vmatpush3.msra.mxu0 %v4280_v33  ;;  %v4315_v38 = vld [vmem:[%s5579_s5 + $0x50] sm:$0xff]  ;;  %v4322_v39 = vld [vmem:[%s5579_s5 + $0x48] sm:$0xff]  ;;  %v4329_v40 = vld [vmem:[%s5579_s5 + $0x40] sm:$0xff] }
   0x8   :  { %3536 = vmatprep.subr.mxu0 %v4287_v34  ;;  %v4336_v41 = vld [vmem:[%s5579_s5 + $0x38] sm:$0xff]  ;;  %v4342_v42 = vld [vmem:[%s5579_s5 + $0x30] sm:$0xff]  ;;  %v4348_v43 = vld [vmem:[%s5579_s5 + $0x28] sm:$0xff] }
   0x9   :  { %3537 = vmatpush3.msra.mxu0 %v4287_v34  ;;  %v4355_v44 = vld [vmem:[%s5579_s5 + $0x20] sm:$0xff]  ;;  %v4362_v45 = vld [vmem:[%s5579_s5 + $0x18] sm:$0xff]  ;;  %v4369_v46 = vld [vmem:[%s5579_s5 + $0x10] sm:$0xff] }
   0xa   :  { %164 = vperm.xlu1 %3968, %v136_v5   ;;  %159 = vperm.xlu0 %3967, %v135_v6   ;;  %v4376_v47 = vld [vmem:[%s5579_s5 + $0x8] sm:$0xff]  ;;  %v4383_v48 = vld [vmem:[%s5579_s5] sm:$0xff] }
   0xb   :  { %3538 = vmatprep.subr.mxu0 %v4294_v35 }
   0xc   :  { %3539 = vmatpush3.msra.mxu0 %v4294_v35 }
   0xd   :  { %3540 = vmatprep.subr.mxu0 %v4301_v36 }
   0xe   :  { %3541 = vmatpush3.msra.mxu0 %v4301_v36 }
   0xf   :  { %3542 = vmatprep.subr.mxu0 %v4308_v37 }
  0x10   :  { %3543 = vmatpush3.msra.mxu0 %v4308_v37 }
  0x11   :  { %3544 = vmatprep.subr.mxu0 %v4315_v38 }
  0x12   :  { %3545 = vmatpush3.msra.mxu0 %v4315_v38 }
  0x13   :  { %3546 = vmatprep.subr.mxu0 %v4322_v39 }
  0x14   :  { %3547 = vmatpush3.msra.mxu0 %v4322_v39 }
  0x15   :  { %3548 = vmatprep.subr.mxu0 %v4329_v40 }
  0x16   :  { %3549 = vmatpush3.msra.mxu0 %v4329_v40 }
  0x17   :  { %3550 = vmatprep.subr.mxu0 %v4336_v41 }
  0x18   :  { %3551 = vmatpush3.msra.mxu0 %v4336_v41 }
  0x19   :  { %3552 = vmatprep.subr.mxu0 %v4342_v42 }
  0x1a   :  { %3553 = vmatpush3.msra.mxu0 %v4342_v42 }
  0x1b   :  { %3554 = vmatprep.subr.mxu0 %v4348_v43 }
  0x1c   :  { %3555 = vmatpush3.msra.mxu0 %v4348_v43 }
  0x1d   :  { %3556 = vmatprep.subr.mxu0 %v4355_v44 }
  0x1e   :  { %3557 = vmatpush3.msra.mxu0 %v4355_v44 }
  0x1f   :  { %3558 = vmatprep.subr.mxu0 %v4362_v45 }
  0x20   :  { %3559 = vmatpush3.msra.mxu0 %v4362_v45 }
  0x21   :  { %3560 = vmatprep.subr.mxu0 %v4369_v46 }
  0x22   :  { %3561 = vmatpush3.msra.mxu0 %v4369_v46 }
  0x23   :  { %3562 = vmatprep.subr.mxu0 %v4376_v47 }
  0x24   :  { %3563 = vmatpush3.msra.mxu0 %v4376_v47 }
  0x25   :  { %3564 = vmatprep.subr.mxu0 %v4383_v48 }
  0x26   :  { %3565 = vmatpush3.msra.mxu0 %v4383_v48 }
  0x7d   :  { %v150_v9 = vpop.permute.xlu1 %149  ;;  %v140_v10 = vpop.permute.xlu0 %139 }
  0x7e   :  { %v171_v11 = vmul.f32 %v3248_v7, %v140_v10  ;;  %v173_v17 = vmul.f32 %v3248_v7, %v150_v9 }
  0x80   :  { %v4247_v12 = vadd.f32 %v3249_v8, %v171_v11  ;;  %v4256_v23 = vadd.f32 %v3249_v8, %v173_v17 }
  0x81   :  { %v155_v13 = vpop.permute.xlu1 %154  ;;  %v145_v14 = vpop.permute.xlu0 %144 }
  0x82   :  { %v174_v15 = vmul.f32 %v3248_v7, %v155_v13  ;;  %v172_v16 = vmul.f32 %v3248_v7, %v145_v14  ;;  %187 = vadd.xlane.f32.xlu0 %v4247_v12  ;;  %v206_v27 = vmul.f32 %v4247_v12, %v4247_v12  ;;  %v208_v29 = vmul.f32 %v4256_v23, %v4256_v23 }
  0x84   :  { %v4250_v18 = vadd.f32 %v3249_v8, %v174_v15  ;;  %v4252_v19 = vadd.f32 %v3249_v8, %v172_v16 }
  0x85   :  { %v165_v20 = vpop.permute.xlu1 %164  ;;  %v160_v21 = vpop.permute.xlu0 %159 }
  0x86   :  { %v176_v22 = vmul.f32 %v3248_v7, %v165_v20  ;;  %193 = vadd.xlane.f32.xlu0 %v4250_v18  ;;  %189 = vadd.xlane.f32.xlu1 %v4252_v19  ;;  %v175_v25 = vmul.f32 %v3248_v7, %v160_v21  ;;  %v207_v28 = vmul.f32 %v4252_v19, %v4252_v19 }
  0x87   :  { %v209_v30 = vmul.f32 %v4250_v18, %v4250_v18 }
  0x88   :  { %v4258_v24 = vadd.f32 %v3249_v8, %v176_v22  ;;  %v4262_v26 = vadd.f32 %v3249_v8, %v175_v25 }
  0x8a   :  { %197 = vadd.xlane.f32.xlu0 %v4258_v24  ;;  %191 = vadd.xlane.f32.xlu1 %v4256_v23  ;;  %v210_v31 = vmul.f32 %v4262_v26, %v4262_v26  ;;  %v211_v32 = vmul.f32 %v4258_v24, %v4258_v24 }
  0x8e   :  { %212 = vadd.xlane.f32.xlu0 %v206_v27  ;;  %195 = vadd.xlane.f32.xlu1 %v4262_v26 }
  0x92   :  { %214 = vadd.xlane.f32.xlu0 %v207_v28  ;;  %216 = vadd.xlane.f32.xlu1 %v208_v29 }
  0x96   :  { %218 = vadd.xlane.f32.xlu0 %v209_v30  ;;  %220 = vadd.xlane.f32.xlu1 %v210_v31 }
  0x9a   :  { %222 = vadd.xlane.f32.xlu0 %v211_v32 }
 0x10b   :  { %v188_v49 = vpop.xlane.xlu0 %187 }
 0x10c   :  { %v200_v54 = vmul.f32 0.0078125, %v188_v49 }
 0x10e   :  { %v230_v58 = vmul.f32 %v200_v54, %v200_v54  ;;  %v242_v49 = vsub.f32 %v4247_v12, %v200_v54 }
 0x10f   :  { %v190_v50 = vpop.xlane.xlu1 %189  ;;  %v194_v51 = vpop.xlane.xlu0 %193 }
 0x110   :  { %v201_v55 = vmul.f32 0.0078125, %v190_v50  ;;  %v203_v63 = vmul.f32 0.0078125, %v194_v51  ;;  %v4393_v51 = vld [vmem:[%s5578_s4 + $0x2] ss:$0 sm:$0xff] }
 0x112   :  { %v231_v62 = vmul.f32 %v201_v55, %v201_v55  ;;  %v233_v9 = vmul.f32 %v203_v63, %v203_v63  ;;  %v243_v54 = vsub.f32 %v4252_v19, %v201_v55 }
 0x113   :  { %v192_v52 = vpop.xlane.xlu1 %191  ;;  %v198_v53 = vpop.xlane.xlu0 %197 }
 0x114   :  { %v202_v59 = vmul.f32 0.0078125, %v192_v52  ;;  %v205_v10 = vmul.f32 0.0078125, %v198_v53  ;;  %v4398_v53 = vld [vmem:[%s5578_s4 + $0x3] ss:$0 sm:$0xff] }
 0x116   :  { %v232_v3 = vmul.f32 %v202_v59, %v202_v59  ;;  %v235_v27 = vmul.f32 %v205_v10, %v205_v10 }
 0x117   :  { %v196_v56 = vpop.xlane.xlu1 %195  ;;  %v213_v57 = vpop.xlane.xlu0 %212 }
 0x118   :  { %v224_v60 = vmul.f32 0.0078125, %v213_v57  ;;  %v204_v0 = vmul.f32 0.0078125, %v196_v56  ;;  %v244_v56 = vsub.f32 %v4256_v23, %v202_v59 }
 0x11a   :  { %v236_v61 = vsub.f32 %v224_v60, %v230_v58  ;;  %v234_v11 = vmul.f32 %v204_v0, %v204_v0 }
 0x11b   :  { %v217_v1 = vpop.xlane.xlu1 %216  ;;  %v215_v2 = vpop.xlane.xlu0 %214 }
 0x11c   :  { %v248_v4 = vadd.f32 1e-05, %v236_v61  ;;  %v226_v5 = vmul.f32 0.0078125, %v217_v1  ;;  %v225_v6 = vmul.f32 0.0078125, %v215_v2  ;;  %v246_v2 = vsub.f32 %v4262_v26, %v204_v0 }
 0x11d   :  { %v247_v0 = vsub.f32 %v4258_v24, %v205_v10 }
 0x11e   :  { %3969 = vrsqrt.f32 %v248_v4  ;;  %v238_v7 = vsub.f32 %v226_v5, %v232_v3  ;;  %v237_v8 = vsub.f32 %v225_v6, %v231_v62  ;;  %v245_v6 = vsub.f32 %v4250_v18, %v203_v63 }
 0x11f   :  { %v221_v13 = vpop.xlane.xlu1 %220  ;;  %v219_v14 = vpop.xlane.xlu0 %218 }
 0x120   :  { %v250_v15 = vadd.f32 1e-05, %v238_v7  ;;  %v249_v16 = vadd.f32 1e-05, %v237_v8  ;;  %v228_v17 = vmul.f32 0.0078125, %v221_v13  ;;  %v227_v20 = vmul.f32 0.0078125, %v219_v14 }
 0x122   :  { %3971 = vrsqrt.f32 %v250_v15  ;;  %v240_v21 = vsub.f32 %v228_v17, %v234_v11  ;;  %v239_v22 = vsub.f32 %v227_v20, %v233_v9 }
 0x123   :  { %3973 = vrsqrt.f32 %v249_v16  ;;  %v223_v25 = vpop.xlane.xlu0 %222 }
 0x124   :  { %v252_v28 = vadd.f32 1e-05, %v240_v21  ;;  %v251_v29 = vadd.f32 1e-05, %v239_v22  ;;  %v229_v30 = vmul.f32 0.0078125, %v223_v25 }
 0x126   :  { %3975 = vrsqrt.f32 %v252_v28  ;;  %v241_v31 = vsub.f32 %v229_v30, %v235_v27 }
 0x127   :  { %3977 = vrsqrt.f32 %v251_v29 }
 0x128   :  { %v253_v32 = vadd.f32 1e-05, %v241_v31 }
 0x12a   :  { %3979 = vrsqrt.f32 %v253_v32 }
 0x12b   :  { %v3970_v50 = vpop.eup %3969 }
 0x12c   :  { %v260_v52 = vmul.f32 %v3970_v50, %v242_v49 }
 0x12e   :  { %v270_v57 = vmul.f32 %v4393_v51, %v260_v52 }
 0x12f   :  { %v3972_v58 = vpop.eup %3971 }
 0x130   :  { %v3974_v60 = vpop.eup %3973  ;;  %v280_v61 = vadd.f32 %v4398_v53, %v270_v57  ;;  %v262_v62 = vmul.f32 %v3972_v58, %v244_v56  ;;  %v4420_v57 = vld [vmem:[%s5580_s6] ss:$0 sm:$0xff] }
 0x131   :  { %v261_v1 = vmul.f32 %v3974_v60, %v243_v54 }
 0x132   :  { %vm286_vm0 = vcmp.ge.f32.partialorder %v280_v61, 0.0  ;;  %v292_v3 = vmul.f32 0.01, %v280_v61  ;;  %v272_v4 = vmul.f32 %v4393_v51, %v262_v62 }
 0x133   :  { %v3976_v5 = vpop.eup %3975  ;;  %v271_v59 = vmul.f32 %v4393_v51, %v261_v1 }
 0x134   :  { %v3978_v7 = vpop.eup %3977  ;;  %v298_v8 = vsel %vm286_vm0, %v280_v61, %v292_v3  ;;  %v282_v55 = vadd.f32 %v4398_v53, %v272_v4  ;;  %v264_v9 = vmul.f32 %v3976_v5, %v246_v2 }
 0x135   :  { %3566 = vmatprep.mubr.f32.mxu0 %v298_v8  ;;  %v281_v11 = vadd.f32 %v4398_v53, %v271_v59  ;;  %v263_v13 = vmul.f32 %v3978_v7, %v245_v6 }
 0x136   :  { %vm288_vm1 = vcmp.ge.f32.partialorder %v282_v55, 0.0  ;;  %v294_v14 = vmul.f32 0.01, %v282_v55  ;;  %v274_v15 = vmul.f32 %v4393_v51, %v264_v9 }
 0x137   :  { %v3980_v16 = vpop.eup %3979  ;;  %vm287_vm2 = vcmp.ge.f32.partialorder %v281_v11, 0.0  ;;  %v293_v63 = vmul.f32 0.01, %v281_v11  ;;  %v273_v17 = vmul.f32 %v4393_v51, %v263_v13 }
 0x138   :  { %v300_v20 = vsel %vm288_vm1, %v282_v55, %v294_v14  ;;  %v284_v21 = vadd.f32 %v4398_v53, %v274_v15  ;;  %v265_v22 = vmul.f32 %v3980_v16, %v247_v0  ;;  %vm696_vm1 = vcmask 130048  }
 0x139   :  { %v299_v25 = vsel %vm287_vm2, %v281_v11, %v293_v63  ;;  %v283_v27 = vadd.f32 %v4398_v53, %v273_v17 }
 0x13a   :  { %3567 = vmatmul.mubr.f32.vlgmr.msra.gmra.mxu0 %v299_v25  ;;  %vm290_vm3 = vcmp.ge.f32.partialorder %v284_v21, 0.0  ;;  %v296_v28 = vmul.f32 0.01, %v284_v21  ;;  %v275_v10 = vmul.f32 %v4393_v51, %v265_v22 }
 0x13b   :  { %3569 = vmatprep.mubr.f32.mxu0 %v300_v20  ;;  %vm289_vm4 = vcmp.ge.f32.partialorder %v283_v27, 0.0  ;;  %v295_v29 = vmul.f32 0.01, %v283_v27 }
 0x13c   :  { %v302_v30 = vsel %vm290_vm3, %v284_v21, %v296_v28  ;;  %v285_v31 = vadd.f32 %v4398_v53, %v275_v10  ;;  %v38_v28 = vld [vmem:[%s5574_s0 + $0x8] sm:$0xff]  ;;  %v39_v10 = vld [vmem:[%s5574_s0 + $0x10] sm:$0xff] }
 0x13d   :  { %v301_v32 = vsel %vm289_vm4, %v283_v27, %v295_v29  ;;  %v37_v27 = vld [vmem:[%s5574_s0] sm:$0xff] }
 0x13e   :  { %3570 = vmatmul.mubr.f32.gmra.mxu0 %v301_v32  ;;  %vm291_vm5 = vcmp.ge.f32.partialorder %v285_v31, 0.0  ;;  %v297_v49 = vmul.f32 0.01, %v285_v31  ;;  %v41_v29 = vld [vmem:[%s5574_s0 + $0x20] sm:$0xff]  ;;  %v43_v32 = vlaneseq }
 0x13f   :  { %3572 = vmatprep.mubr.f32.mxu0 %v302_v30  ;;  %v40_v30 = vld [vmem:[%s5574_s0 + $0x18] sm:$0xff] }
 0x140   :  { %v303_v50 = vsel %vm291_vm5, %v285_v31, %v297_v49  ;;  %v42_v31 = vld [vmem:[%s5574_s0 + $0x28] sm:$0xff]  ;;  %v4489_v49 = vshrl.u32 %v43_v32, 7 }
 0x142   :  { %3573 = vmatmul.mubr.f32.gmra.mxu0 %v303_v50  ;;  %5595 = vst [vmem:[#allocation5_spill] sm:$0xff] %v4489_v49  ;;  %v86_v50 = vsub.s32 0, %v4489_v49 }
 0x1fa   :  { %v3568_v52 = vpop.f32.mrf.mxu0 }
 0x1fb   :  { %v4446_v55 = vadd.f32 %v3568_v52, %v4420_v57  ;;  %v36_v52 = vld [vmem:[%s5575_s1] sm:$0x3] }
 0x1fc   :  { %v374_v56 = vpop.f32.mrf.mxu0 }
 0x1fd   :  { %v4454_v0 = vadd.f32 %v4420_v57, %v374_v56  ;;  %v407_v14 = vsel %vm403_vm6, %v4446_v55, 0.0  ;;  %v430_v21 = vmul.f32 %v4446_v55, %v4446_v55  ;;  %v4495_v56 = vrot.slane %v36_v52, %v86_v50 }
 0x1fe   :  { %v3571_v58 = vpop.f32.mrf.mxu0 }
 0x1ff   :  { %v4423_v54 = vadd.f32 %v3571_v58, %v4420_v57  ;;  %v404_v63 = vsel %vm403_vm6, %v4454_v0, 0.0  ;;  %v429_v17 = vmul.f32 %v4454_v0, %v4454_v0  ;;  %v438_v25 = vsel %vm403_vm6, %v430_v21, 0.0 }
 0x200   :  { %v384_v60 = vpop.f32.mrf.mxu0  ;;  %vm88_vm7 = vcmp.eq.s32.totalorder %v4495_v56, %v4489_v49  ;;  %v5585_v58 = vmov 0.0  }
 0x201   :  { %v4426_v61 = vadd.f32 %v4420_v57, %v384_v60  ;;  %v413_v62 = vsel %vm403_vm6, %v4423_v54, 0.0  ;;  %v432_v1 = vmul.f32 %v4423_v54, %v4423_v54  ;;  %v435_v22 = vsel %vm403_vm6, %v429_v17, 0.0 }
 0x202   :  { %414 = vadd.xlane.f32.xlu0 %v413_v62  ;;  %v3574_v2 = vpop.f32.mrf.mxu0  ;;  %v4500_v60 = vsel %vm88_vm7, 1.0, %v5585_v58 }
 0x203   :  { %v4433_v3 = vadd.f32 %v3574_v2, %v4420_v57  ;;  %v444_v4 = vsel %vm403_vm6, %v432_v1, 0.0  ;;  %v410_v59 = vsel %vm403_vm6, %v4426_v61, 0.0  ;;  %v431_v16 = vmul.f32 %v4426_v61, %v4426_v61  ;;  %5596 = vst [vmem:[#allocation6_spill] sm:$0xff] %v4500_v60  ;;  %3587 = vmatprep.mubr.msk.f32.mxu1 %vm533_vm8, %v4500_v60  ;;  %3667 = vmatprep.mubr.msk.f32.mxu0 %vm533_vm8, %v4500_v60 }
 0x204   :  { %445 = vadd.xlane.f32.xlu1 %v444_v4  ;;  %v394_v5 = vpop.f32.mrf.mxu0 }
 0x205   :  { %v4437_v6 = vadd.f32 %v4420_v57, %v394_v5  ;;  %v419_v7 = vsel %vm403_vm6, %v4433_v3, 0.0  ;;  %v434_v8 = vmul.f32 %v4433_v3, %v4433_v3  ;;  %v441_v20 = vsel %vm403_vm6, %v431_v16, 0.0 }
 0x206   :  { %411 = vadd.xlane.f32.xlu0 %v410_v59 }
 0x207   :  { %v416_v9 = vsel %vm403_vm6, %v4437_v6, 0.0  ;;  %v450_v11 = vsel %vm403_vm6, %v434_v8, 0.0  ;;  %v433_v13 = vmul.f32 %v4437_v6, %v4437_v6 }
 0x208   :  { %420 = vadd.xlane.f32.xlu1 %v419_v7 }
 0x209   :  { %v447_v15 = vsel %vm403_vm6, %v433_v13, 0.0 }
 0x20a   :  { %417 = vadd.xlane.f32.xlu0 %v416_v9 }
 0x20c   :  { %451 = vadd.xlane.f32.xlu1 %v450_v11 }
 0x20e   :  { %408 = vadd.xlane.f32.xlu0 %v407_v14 }
 0x210   :  { %448 = vadd.xlane.f32.xlu1 %v447_v15 }
 0x212   :  { %405 = vadd.xlane.f32.xlu0 %v404_v63 }
 0x214   :  { %442 = vadd.xlane.f32.xlu1 %v441_v20 }
 0x216   :  { %436 = vadd.xlane.f32.xlu0 %v435_v22 }
 0x218   :  { %439 = vadd.xlane.f32.xlu1 %v438_v25 }
 0x229   :  { %46 = vperm.xlu1 %3968, %v37_v27  }
 0x22c   :  { %49 = vperm.xlu0 %3967, %v38_v28  }
 0x22d   :  { %52 = vperm.xlu1 %3968, %v39_v10  }
 0x230   :  { %58 = vperm.xlu0 %3967, %v41_v29  }
 0x231   :  { %55 = vperm.xlu1 %3968, %v40_v30  }
 0x235   :  { %61 = vperm.xlu1 %3968, %v42_v31  }
 0x28b   :  { %v415_v62 = vpop.xlane.xlu0 %414 }
 0x28c   :  { %v426_v1 = vmul.f32 0.03125, %v415_v62 }
 0x28d   :  { %v446_v2 = vpop.xlane.xlu1 %445 }
 0x28e   :  { %v462_v4 = vmul.f32 %v426_v1, %v426_v1  ;;  %v456_v5 = vmul.f32 0.03125, %v446_v2 }
 0x28f   :  { %v412_v59 = vpop.xlane.xlu0 %411 }
 0x290   :  { %v468_v7 = vsub.f32 %v456_v5, %v462_v4  ;;  %v425_v22 = vmul.f32 0.03125, %v412_v59 }
 0x291   :  { %v421_v8 = vpop.xlane.xlu1 %420 }
 0x292   :  { %v428_v9 = vmul.f32 0.03125, %v421_v8  ;;  %v480_v11 = vadd.f32 1e-05, %v468_v7  ;;  %v461_v50 = vmul.f32 %v425_v22, %v425_v22 }
 0x293   :  { %v418_v13 = vpop.xlane.xlu0 %417 }
 0x294   :  { %v464_v15 = vmul.f32 %v428_v9, %v428_v9  ;;  %v427_v16 = vmul.f32 0.03125, %v418_v13  ;;  %3981 = vrsqrt.f32 %v480_v11 }
 0x295   :  { %v452_v14 = vpop.xlane.xlu1 %451 }
 0x296   :  { %v458_v63 = vmul.f32 0.03125, %v452_v14  ;;  %v463_v25 = vmul.f32 %v427_v16, %v427_v16 }
 0x297   :  { %v409_v17 = vpop.xlane.xlu0 %408 }
 0x298   :  { %v470_v20 = vsub.f32 %v458_v63, %v464_v15  ;;  %v424_v52 = vmul.f32 0.03125, %v409_v17 }
 0x299   :  { %v449_v21 = vpop.xlane.xlu1 %448 }
 0x29a   :  { %v482_v27 = vadd.f32 1e-05, %v470_v20  ;;  %v457_v28 = vmul.f32 0.03125, %v449_v21  ;;  %v460_v13 = vmul.f32 %v424_v52, %v424_v52 }
 0x29b   :  { %v406_v10 = vpop.xlane.xlu0 %405 }
 0x29c   :  { %3983 = vrsqrt.f32 %v482_v27  ;;  %v469_v29 = vsub.f32 %v457_v28, %v463_v25  ;;  %v423_v30 = vmul.f32 0.03125, %v406_v10  ;;  %v474_v25 = vsub.f32 %v4423_v54, %v426_v1  ;;  %v4511_v10 = vld [vmem:[%s5580_s6 + $0x1] ss:$0 sm:$0xff]  ;;  %v4518_v54 = vld [vmem:[%s5580_s6 + $0x2] ss:$0 sm:$0xff] }
 0x29d   :  { %v443_v31 = vpop.xlane.xlu1 %442  ;;  %v476_v28 = vsub.f32 %v4433_v3, %v428_v9 }
 0x29e   :  { %v481_v62 = vadd.f32 1e-05, %v469_v29  ;;  %v455_v2 = vmul.f32 0.03125, %v443_v31  ;;  %v459_v5 = vmul.f32 %v423_v30, %v423_v30 }
 0x29f   :  { %v437_v4 = vpop.xlane.xlu0 %436 }
 0x2a0   :  { %3985 = vrsqrt.f32 %v481_v62  ;;  %v467_v7 = vsub.f32 %v455_v2, %v461_v50  ;;  %v453_v8 = vmul.f32 0.03125, %v437_v4  ;;  %v475_v62 = vsub.f32 %v4437_v6, %v427_v16 }
 0x2a1   :  { %v440_v11 = vpop.xlane.xlu1 %439  ;;  %v3982_v63 = vpop.eup %3981  ;;  %v471_v16 = vsub.f32 %v4454_v0, %v423_v30 }
 0x2a2   :  { %v479_v59 = vadd.f32 1e-05, %v467_v7  ;;  %v465_v14 = vsub.f32 %v453_v8, %v459_v5  ;;  %v454_v15 = vmul.f32 0.03125, %v440_v11  ;;  %v492_v27 = vmul.f32 %v3982_v63, %v474_v25 }
 0x2a3   :  { %v473_v5 = vsub.f32 %v4426_v61, %v425_v22 }
 0x2a4   :  { %3987 = vrsqrt.f32 %v479_v59  ;;  %v477_v20 = vadd.f32 1e-05, %v465_v14  ;;  %v466_v21 = vsub.f32 %v454_v15, %v460_v13  ;;  %v502_v50 = vmul.f32 %v4511_v10, %v492_v27 }
 0x2a5   :  { %v472_v15 = vsub.f32 %v4446_v55, %v424_v52 }
 0x2a6   :  { %3989 = vrsqrt.f32 %v477_v20  ;;  %v478_v17 = vadd.f32 1e-05, %v466_v21  ;;  %v512_v4 = vadd.f32 %v4518_v54, %v502_v50 }
 0x2a8   :  { %3991 = vrsqrt.f32 %v478_v17  ;;  %vm518_vm10 = vcmp.ge.f32.partialorder %v512_v4, 0.0  ;;  %v524_v63 = vmul.f32 0.01, %v512_v4 }
 0x2a9   :  { %v3984_v29 = vpop.eup %3983 }
 0x2aa   :  { %v494_v31 = vmul.f32 %v3984_v29, %v476_v28  ;;  %v530_v27 = vsel %vm518_vm10, %v512_v4, %v524_v63  ;;  %v83_v29 = vadd.s32 8, %v4489_v49  ;;  %v4542_v4 = vld [vmem:[%s5577_s3 + $0x18] sm:$0xff] }
 0x2ac   :  { %v504_v1 = vmul.f32 %v4511_v10, %v494_v31  ;;  %vm89_vm15 = vcmp.eq.s32.totalorder %v4495_v56, %v83_v29  ;;  %v4558_v56 = vld [vmem:[%s5577_s3 + $0x8] sm:$0xff] }
 0x2ad   :  { %v3986_v3 = vpop.eup %3985 }
 0x2ae   :  { %v514_v9 = vadd.f32 %v4518_v54, %v504_v1  ;;  %v493_v2 = vmul.f32 %v3986_v3, %v475_v62 }
 0x2b0   :  { %vm520_vm9 = vcmp.ge.f32.partialorder %v514_v9, 0.0  ;;  %v526_v7 = vmul.f32 0.01, %v514_v9  ;;  %v503_v8 = vmul.f32 %v4511_v10, %v493_v2  ;;  %v4537_v2 = vsel %vm89_vm15, 1.0, %v5585_v58 }
 0x2b1   :  { %v3988_v6 = vpop.eup %3987 }
 0x2b2   :  { %v532_v11 = vsel %vm520_vm9, %v514_v9, %v526_v7  ;;  %v513_v13 = vadd.f32 %v4518_v54, %v503_v8  ;;  %v491_v59 = vmul.f32 %v3988_v6, %v473_v5  ;;  %v4547_v5 = vld [vmem:[%s5577_s3 + $0x10] sm:$0xff]  ;;  %v4565_v7 = vld [vmem:[%s5577_s3] sm:$0xff]  ;;  %v4570_v8 = vand.u32 127, %v43_v32  ;;  %v47_v6 = vpop.permute.xlu1 %46 }
 0x2b3   :  { %v3990_v14 = vpop.eup %3989  ;;  %3575 = vmatprep.subr.mxu1 %v532_v11 }
 0x2b4   :  { %3576 = vmatpush3.msra.mxu1 %v532_v11  ;;  %vm519_vm11 = vcmp.ge.f32.partialorder %v513_v13, 0.0  ;;  %v525_v61 = vmul.f32 0.01, %v513_v13  ;;  %v501_v22 = vmul.f32 %v4511_v10, %v491_v59  ;;  %v489_v20 = vmul.f32 %v3990_v14, %v471_v16  ;;  %5597 = vst [vmem:[#allocation7_spill] sm:$0xff] %v4570_v8  ;;  %v50_v59 = vpop.permute.xlu0 %49 }
 0x2b5   :  { %v3992_v21 = vpop.eup %3991  ;;  %vm63_vm0 = vcmp.eq.s32.totalorder %v47_v6, %v4570_v8  ;;  %vm64_vm2 = vcmp.eq.s32.totalorder %v50_v59, %v4570_v8 }
 0x2b6   :  { %v531_v25 = vsel %vm519_vm11, %v513_v13, %v525_v61  ;;  %v511_v0 = vadd.f32 %v4518_v54, %v501_v22  ;;  %v490_v30 = vmul.f32 %v3992_v21, %v472_v15  ;;  %v499_v17 = vmul.f32 %v4511_v10, %v489_v20  ;;  %v53_v32 = vpop.permute.xlu1 %52 }
 0x2b7   :  { %3577 = vmatprep.subr.mxu1 %v531_v25  ;;  %v4580_v13 = vsel %vm63_vm0, 1.0, %v5585_v58  ;;  %vm65_vm3 = vcmp.eq.s32.totalorder %v53_v32, %v4570_v8  ;;  %v4589_v22 = vsel %vm64_vm2, 1.0, %v5585_v58 }
 0x2b8   :  { %3578 = vmatpush3.msra.mxu1 %v531_v25  ;;  %vm517_vm12 = vcmp.ge.f32.partialorder %v511_v0, 0.0  ;;  %v523_v55 = vmul.f32 0.01, %v511_v0  ;;  %v500_v52 = vmul.f32 %v4511_v10, %v490_v30  ;;  %v509_v28 = vadd.f32 %v4518_v54, %v499_v17  ;;  %v59_v61 = vpop.permute.xlu0 %58 }
 0x2b9   :  { %3579 = vmatprep.subr.mxu1 %v530_v27  ;;  %v4592_v20 = vsel %vm65_vm3, 1.0, %v5585_v58  ;;  %vm67_vm5 = vcmp.eq.s32.totalorder %v59_v61, %v4570_v8 }
 0x2ba   :  { %3580 = vmatpush3.msra.mxu1 %v530_v27  ;;  %v529_v31 = vsel %vm517_vm12, %v511_v0, %v523_v55  ;;  %v510_v50 = vadd.f32 %v4518_v54, %v500_v52  ;;  %v521_v1 = vmul.f32 0.01, %v509_v28  ;;  %vm515_vm14 = vcmp.ge.f32.partialorder %v509_v28, 0.0  ;;  %v56_v14 = vpop.permute.xlu1 %55 }
 0x2bb   :  { %3581 = vmatprep.subr.mxu1 %v529_v31  ;;  %vm66_vm4 = vcmp.eq.s32.totalorder %v56_v14, %v4570_v8  ;;  %v4608_v0 = vsel %vm67_vm5, 1.0, %v5585_v58 }
 0x2bc   :  { %3582 = vmatpush3.msra.mxu1 %v529_v31  ;;  %vm516_vm13 = vcmp.ge.f32.partialorder %v510_v50, 0.0  ;;  %v522_v62 = vmul.f32 0.01, %v510_v50  ;;  %v527_v9 = vsel %vm515_vm14, %v509_v28, %v521_v1  ;;  %v4604_v25 = vsel %vm66_vm4, 1.0, %v5585_v58 }
 0x2be   :  { %v528_v3 = vsel %vm516_vm13, %v510_v50, %v522_v62  ;;  %v62_v21 = vpop.permute.xlu1 %61 }
 0x2bf   :  { %3583 = vmatprep.subr.mxu1 %v528_v3  ;;  %vm68_vm7 = vcmp.eq.s32.totalorder %v62_v21, %v4570_v8 }
 0x2c0   :  { %3584 = vmatpush3.msra.mxu1 %v528_v3 }
 0x2c1   :  { %3585 = vmatprep.subr.mxu1 %v527_v9 }
 0x2c2   :  { %3586 = vmatpush3.msra.mxu1 %v527_v9 }
 0x2c3   :  { %3588 = vmatmul.mubr.msk.f32.vlgmr.msra.gmra.mxu1 %vm533_vm8, %v4537_v2  ;;  %3590 = vmatprep.subr.mxu1 %v4542_v4 }
 0x2c4   :  { %3591 = vmatpush3.msra.mxu1 %v4542_v4 }
 0x2c5   :  { %3592 = vmatprep.subr.mxu1 %v4547_v5 }
 0x2c6   :  { %3593 = vmatpush3.msra.mxu1 %v4547_v5 }
 0x2c7   :  { %3594 = vmatprep.subr.mxu1 %v4558_v56 }
 0x2c8   :  { %3595 = vmatpush3.msra.mxu1 %v4558_v56 }
 0x2c9   :  { %3596 = vmatprep.subr.mxu1 %v4565_v7 }
 0x2ca   :  { %3597 = vmatpush3.msra.mxu1 %v4565_v7 }
 0x383   :  { %v4572_v16 = vpop.f32.mrf.mxu1 }
 0x385   :  { %v4575_v11 = vpop.f32.mrf.mxu1 }
 0x386   :  { %3598 = vmatprep.mubr.msk.f32.mxu1 %vm403_vm6, %v4575_v11 }
 0x387   :  { %3599 = vmatmul.mubr.msk.f32.vlgmr.msra.gmra.mxu1 %vm403_vm6, %v4572_v16 }
 0x388   :  { %3605 = vmatprep.mubr.msk.f32.mxu1 %vm696_vm1, %v4580_v13 }
 0x447   :  { %v3600_v15 = vpop.f32.mrf.mxu1 }
 0x448   :  { %3601 = vmatprep.subr.mxu1 %v3600_v15 }
 0x449   :  { %v687_v63 = vpop.f32.mrf.mxu1  ;;  %3602 = vmatpush3.msra.mxu1 %v3600_v15 }
 0x44a   :  { %3603 = vmatprep.subr.mxu1 %v687_v63 }
 0x44b   :  { %3604 = vmatpush3.msra.mxu1 %v687_v63 }
 0x44c   :  { %3606 = vmatmul.mubr.msk.f32.vlgmr.msra.gmra.mxu1 %vm696_vm1, %v4589_v22  ;;  %3614 = vmatprep.subr.mxu1 %v4280_v33 }
 0x44d   :  { %3608 = vmatprep.mubr.msk.f32.mxu1 %vm696_vm1, %v4592_v20  ;;  %3615 = vmatpush3.msra.mxu1 %v4280_v33  ;;  %v4619_v33 = vsel %vm68_vm7, 1.0, %v5585_v58 }
 0x44e   :  { %3616 = vmatprep.subr.mxu1 %v4287_v34 }
 0x44f   :  { %3617 = vmatpush3.msra.mxu1 %v4287_v34 }
 0x450   :  { %3609 = vmatmul.mubr.msk.f32.gmra.mxu1 %vm696_vm1, %v4604_v25  ;;  %3618 = vmatprep.subr.mxu1 %v4294_v35 }
 0x451   :  { %3611 = vmatprep.mubr.msk.f32.mxu1 %vm696_vm1, %v4608_v0  ;;  %3619 = vmatpush3.msra.mxu1 %v4294_v35 }
 0x452   :  { %3620 = vmatprep.subr.mxu1 %v4301_v36 }
 0x453   :  { %3621 = vmatpush3.msra.mxu1 %v4301_v36 }
 0x454   :  { %3612 = vmatmul.mubr.msk.f32.gmra.mxu1 %vm696_vm1, %v4619_v33  ;;  %3622 = vmatprep.subr.mxu1 %v4308_v37 }
 0x455   :  { %3623 = vmatpush3.msra.mxu1 %v4308_v37 }
 0x456   :  { %3624 = vmatprep.subr.mxu1 %v4315_v38 }
 0x457   :  { %3625 = vmatpush3.msra.mxu1 %v4315_v38 }
 0x458   :  { %3626 = vmatprep.subr.mxu1 %v4322_v39 }
 0x459   :  { %3627 = vmatpush3.msra.mxu1 %v4322_v39 }
 0x45a   :  { %3628 = vmatprep.subr.mxu1 %v4329_v40 }
 0x45b   :  { %3629 = vmatpush3.msra.mxu1 %v4329_v40 }
 0x45c   :  { %3630 = vmatprep.subr.mxu1 %v4336_v41 }
 0x45d   :  { %3631 = vmatpush3.msra.mxu1 %v4336_v41 }
 0x45e   :  { %3632 = vmatprep.subr.mxu1 %v4342_v42 }
 0x45f   :  { %3633 = vmatpush3.msra.mxu1 %v4342_v42 }
 0x460   :  { %3634 = vmatprep.subr.mxu1 %v4348_v43 }
 0x461   :  { %3635 = vmatpush3.msra.mxu1 %v4348_v43 }
 0x462   :  { %3636 = vmatprep.subr.mxu1 %v4355_v44 }
 0x463   :  { %3637 = vmatpush3.msra.mxu1 %v4355_v44 }
 0x464   :  { %3638 = vmatprep.subr.mxu1 %v4362_v45 }
 0x465   :  { %3639 = vmatpush3.msra.mxu1 %v4362_v45 }
 0x466   :  { %3640 = vmatprep.subr.mxu1 %v4369_v46 }
 0x467   :  { %3641 = vmatpush3.msra.mxu1 %v4369_v46 }
 0x468   :  { %3642 = vmatprep.subr.mxu1 %v4376_v47 }
 0x469   :  { %3643 = vmatpush3.msra.mxu1 %v4376_v47 }
 0x46a   :  { %3644 = vmatprep.subr.mxu1 %v4383_v48 }
 0x46b   :  { %3645 = vmatpush3.msra.mxu1 %v4383_v48 }
 0x50c   :  { %v3607_v34 = vpop.f32.mrf.mxu1 }
 0x50d   :  { %v4649_v35 = vadd.f32 %v3607_v34, %v4252_v19 }
 0x50e   :  { %v781_v36 = vpop.f32.mrf.mxu1 }
 0x50f   :  { %v4652_v37 = vadd.f32 %v781_v36, %v4247_v12  ;;  %812 = vadd.xlane.f32.xlu1 %v4649_v35  ;;  %v829_v41 = vmul.f32 %v4649_v35, %v4649_v35 }
 0x510   :  { %v3610_v38 = vpop.f32.mrf.mxu1 }
 0x511   :  { %810 = vadd.xlane.f32.xlu0 %v4652_v37  ;;  %v828_v44 = vmul.f32 %v4652_v37, %v4652_v37  ;;  %v4667_v46 = vadd.f32 %v3610_v38, %v4250_v18 }
 0x512   :  { %v791_v39 = vpop.f32.mrf.mxu1 }
 0x513   :  { %v4657_v40 = vadd.f32 %v791_v39, %v4256_v23  ;;  %v831_v30 = vmul.f32 %v4667_v46, %v4667_v46 }
 0x514   :  { %v3613_v42 = vpop.f32.mrf.mxu1 }
 0x515   :  { %814 = vadd.xlane.f32.xlu1 %v4657_v40  ;;  %836 = vadd.xlane.f32.xlu0 %v829_v41  ;;  %v830_v43 = vmul.f32 %v4657_v40, %v4657_v40  ;;  %v4679_v17 = vadd.f32 %v3613_v42, %v4258_v24 }
 0x516   :  { %v801_v45 = vpop.f32.mrf.mxu1 }
 0x517   :  { %v4670_v47 = vadd.f32 %v801_v45, %v4262_v26  ;;  %v833_v27 = vmul.f32 %v4679_v17, %v4679_v17 }
 0x519   :  { %838 = vadd.xlane.f32.xlu1 %v830_v43  ;;  %834 = vadd.xlane.f32.xlu0 %v828_v44  ;;  %v832_v48 = vmul.f32 %v4670_v47, %v4670_v47 }
 0x51d   :  { %818 = vadd.xlane.f32.xlu1 %v4670_v47  ;;  %816 = vadd.xlane.f32.xlu0 %v4667_v46 }
 0x521   :  { %842 = vadd.xlane.f32.xlu1 %v832_v48  ;;  %840 = vadd.xlane.f32.xlu0 %v831_v30 }
 0x525   :  { %820 = vadd.xlane.f32.xlu0 %v4679_v17 }
 0x529   :  { %844 = vadd.xlane.f32.xlu0 %v833_v27 }
 0x598   :  { %v813_v55 = vpop.xlane.xlu1 %812 }
 0x599   :  { %v823_v28 = vmul.f32 0.0078125, %v813_v55 }
 0x59a   :  { %v811_v52 = vpop.xlane.xlu0 %810 }
 0x59b   :  { %v822_v29 = vmul.f32 0.0078125, %v811_v52  ;;  %v853_v62 = vmul.f32 %v823_v28, %v823_v28 }
 0x59d   :  { %v852_v6 = vmul.f32 %v822_v29, %v822_v29 }
 0x59e   :  { %v815_v31 = vpop.xlane.xlu1 %814  ;;  %v837_v50 = vpop.xlane.xlu0 %836 }
 0x59f   :  { %v824_v1 = vmul.f32 0.0078125, %v815_v31  ;;  %v847_v3 = vmul.f32 0.0078125, %v837_v50 }
 0x5a1   :  { %v859_v9 = vsub.f32 %v847_v3, %v853_v62  ;;  %v854_v14 = vmul.f32 %v824_v1, %v824_v1 }
 0x5a2   :  { %v839_v32 = vpop.xlane.xlu1 %838  ;;  %v835_v59 = vpop.xlane.xlu0 %834 }
 0x5a3   :  { %v871_v15 = vadd.f32 1e-05, %v859_v9  ;;  %v848_v63 = vmul.f32 0.0078125, %v839_v32  ;;  %v846_v61 = vmul.f32 0.0078125, %v835_v59 }
 0x5a5   :  { %3993 = vrsqrt.f32 %v871_v15  ;;  %v860_v21 = vsub.f32 %v848_v63, %v854_v14  ;;  %v858_v34 = vsub.f32 %v846_v61, %v852_v6  ;;  %v865_v6 = vsub.f32 %v4649_v35, %v823_v28 }
 0x5a6   :  { %v819_v36 = vpop.xlane.xlu1 %818  ;;  %v817_v38 = vpop.xlane.xlu0 %816  ;;  %v866_v61 = vsub.f32 %v4657_v40, %v824_v1 }
 0x5a7   :  { %v872_v39 = vadd.f32 1e-05, %v860_v21  ;;  %v870_v41 = vadd.f32 1e-05, %v858_v34  ;;  %v826_v42 = vmul.f32 0.0078125, %v819_v36  ;;  %v825_v43 = vmul.f32 0.0078125, %v817_v38 }
 0x5a8   :  { %v864_v38 = vsub.f32 %v4652_v37, %v822_v29 }
 0x5a9   :  { %3995 = vrsqrt.f32 %v872_v39  ;;  %v856_v48 = vmul.f32 %v826_v42, %v826_v42  ;;  %v855_v30 = vmul.f32 %v825_v43, %v825_v43  ;;  %v868_v1 = vsub.f32 %v4670_v47, %v826_v42 }
 0x5aa   :  { %3997 = vrsqrt.f32 %v870_v41  ;;  %v843_v44 = vpop.xlane.xlu1 %842  ;;  %v841_v45 = vpop.xlane.xlu0 %840 }
 0x5ab   :  { %v850_v27 = vmul.f32 0.0078125, %v843_v44  ;;  %v849_v55 = vmul.f32 0.0078125, %v841_v45 }
 0x5ad   :  { %v862_v52 = vsub.f32 %v850_v27, %v856_v48  ;;  %v861_v31 = vsub.f32 %v849_v55, %v855_v30  ;;  %v867_v27 = vsub.f32 %v4667_v46, %v825_v43 }
 0x5ae   :  { %v821_v50 = vpop.xlane.xlu0 %820 }
 0x5af   :  { %v874_v62 = vadd.f32 1e-05, %v862_v52  ;;  %v873_v3 = vadd.f32 1e-05, %v861_v31  ;;  %v827_v9 = vmul.f32 0.0078125, %v821_v50 }
 0x5b1   :  { %3999 = vrsqrt.f32 %v874_v62  ;;  %v857_v14 = vmul.f32 %v827_v9, %v827_v9  ;;  %v869_v43 = vsub.f32 %v4679_v17, %v827_v9 }
 0x5b2   :  { %v3994_v32 = vpop.eup %3993  ;;  %4001 = vrsqrt.f32 %v873_v3  ;;  %v845_v59 = vpop.xlane.xlu0 %844 }
 0x5b3   :  { %v851_v15 = vmul.f32 0.0078125, %v845_v59  ;;  %v883_v63 = vmul.f32 %v3994_v32, %v865_v6 }
 0x5b5   :  { %v863_v21 = vsub.f32 %v851_v15, %v857_v14  ;;  %v889_v34 = vmul.f32 %v4393_v51, %v883_v63 }
 0x5b6   :  { %v3996_v36 = vpop.eup %3995 }
 0x5b7   :  { %v3998_v39 = vpop.eup %3997  ;;  %v875_v41 = vadd.f32 1e-05, %v863_v21  ;;  %v884_v44 = vmul.f32 %v3996_v36, %v866_v61  ;;  %v895_v35 = vadd.f32 %v4398_v53, %v889_v34 }
 0x5b8   :  { %v882_v45 = vmul.f32 %v3998_v39, %v864_v38 }
 0x5b9   :  { %4003 = vrsqrt.f32 %v875_v41  ;;  %v890_v28 = vmul.f32 %v4393_v51, %v884_v44  ;;  %v907_v37 = vmul.f32 0.01, %v895_v35  ;;  %vm901_vm10 = vcmp.ge.f32.partialorder %v895_v35, 0.0 }
 0x5ba   :  { %v888_v48 = vmul.f32 %v4393_v51, %v882_v45 }
 0x5bb   :  { %v896_v30 = vadd.f32 %v4398_v53, %v890_v28  ;;  %v913_v6 = vsel %vm901_vm10, %v895_v35, %v907_v37 }
 0x5bc   :  { %v894_v40 = vadd.f32 %v4398_v53, %v888_v48 }
 0x5bd   :  { %v908_v52 = vmul.f32 0.01, %v896_v30  ;;  %vm902_vm11 = vcmp.ge.f32.partialorder %v896_v30, 0.0 }
 0x5be   :  { %v4000_v29 = vpop.eup %3999  ;;  %vm900_vm9 = vcmp.ge.f32.partialorder %v894_v40, 0.0  ;;  %v906_v55 = vmul.f32 0.01, %v894_v40 }
 0x5bf   :  { %v4002_v31 = vpop.eup %4001  ;;  %v886_v50 = vmul.f32 %v4000_v29, %v868_v1  ;;  %v914_v59 = vsel %vm902_vm11, %v896_v30, %v908_v52 }
 0x5c0   :  { %v912_v62 = vsel %vm900_vm9, %v894_v40, %v906_v55  ;;  %v885_v3 = vmul.f32 %v4002_v31, %v867_v27 }
 0x5c1   :  { %3646 = vmatprep.mubr.f32.mxu1 %v912_v62  ;;  %v892_v32 = vmul.f32 %v4393_v51, %v886_v50 }
 0x5c2   :  { %3647 = vmatmul.mubr.f32.vlgmr.msra.gmra.mxu1 %v913_v6  ;;  %v891_v47 = vmul.f32 %v4393_v51, %v885_v3 }
 0x5c3   :  { %3649 = vmatprep.mubr.f32.mxu1 %v914_v59  ;;  %v898_v46 = vadd.f32 %v4398_v53, %v892_v32 }
 0x5c4   :  { %v897_v42 = vadd.f32 %v4398_v53, %v891_v47 }
 0x5c5   :  { %vm904_vm12 = vcmp.ge.f32.partialorder %v898_v46, 0.0  ;;  %v910_v14 = vmul.f32 0.01, %v898_v46 }
 0x5c6   :  { %v4004_v15 = vpop.eup %4003  ;;  %vm903_vm13 = vcmp.ge.f32.partialorder %v897_v42, 0.0  ;;  %v909_v63 = vmul.f32 0.01, %v897_v42 }
 0x5c7   :  { %v916_v61 = vsel %vm904_vm12, %v898_v46, %v910_v14  ;;  %v887_v21 = vmul.f32 %v4004_v15, %v869_v43 }
 0x5c8   :  { %v915_v34 = vsel %vm903_vm13, %v897_v42, %v909_v63 }
 0x5c9   :  { %3650 = vmatmul.mubr.f32.gmra.mxu1 %v915_v34  ;;  %v893_v36 = vmul.f32 %v4393_v51, %v887_v21 }
 0x5ca   :  { %3652 = vmatprep.mubr.f32.mxu1 %v916_v61 }
 0x5cb   :  { %v899_v38 = vadd.f32 %v4398_v53, %v893_v36 }
 0x5cd   :  { %vm905_vm14 = vcmp.ge.f32.partialorder %v899_v38, 0.0  ;;  %v911_v39 = vmul.f32 0.01, %v899_v38 }
 0x5cf   :  { %v917_v41 = vsel %vm905_vm14, %v899_v38, %v911_v39 }
 0x5d0   :  { %3653 = vmatmul.mubr.f32.gmra.mxu1 %v917_v41 }
 0x5d1   :  { %3747 = vmatprep.mubr.msk.f32.mxu1 %vm533_vm8, %v4500_v60 }
 0x682   :  { %v3648_v17 = vpop.f32.mrf.mxu1 }
 0x683   :  { %v4728_v52 = vadd.f32 %v3648_v17, %v4420_v57 }
 0x684   :  { %v984_v9 = vpop.f32.mrf.mxu1 }
 0x685   :  { %v4736_v3 = vadd.f32 %v4420_v57, %v984_v9  ;;  %v1016_v6 = vsel %vm403_vm6, %v4728_v52, 0.0  ;;  %v1038_v42 = vmul.f32 %v4728_v52, %v4728_v52 }
 0x687   :  { %v1013_v47 = vsel %vm403_vm6, %v4736_v3, 0.0  ;;  %v1037_v46 = vmul.f32 %v4736_v3, %v4736_v3  ;;  %v1046_v14 = vsel %vm403_vm6, %v1038_v42, 0.0 }
 0x689   :  { %v3651_v44 = vpop.f32.mrf.mxu1  ;;  %v1043_v43 = vsel %vm403_vm6, %v1037_v46, 0.0 }
 0x68a   :  { %v4705_v45 = vadd.f32 %v3651_v44, %v4420_v57 }
 0x68b   :  { %v994_v35 = vpop.f32.mrf.mxu1 }
 0x68c   :  { %v4708_v28 = vadd.f32 %v4420_v57, %v994_v35  ;;  %v1022_v51 = vsel %vm403_vm6, %v4705_v45, 0.0  ;;  %v1040_v53 = vmul.f32 %v4705_v45, %v4705_v45 }
 0x68d   :  { %1023 = vadd.xlane.f32.xlu0 %v1022_v51 }
 0x68e   :  { %v1052_v48 = vsel %vm403_vm6, %v1040_v53, 0.0  ;;  %v1019_v30 = vsel %vm403_vm6, %v4708_v28, 0.0  ;;  %v1039_v59 = vmul.f32 %v4708_v28, %v4708_v28 }
 0x68f   :  { %1053 = vadd.xlane.f32.xlu1 %v1052_v48 }
 0x690   :  { %v3654_v40 = vpop.f32.mrf.mxu1 }
 0x691   :  { %1020 = vadd.xlane.f32.xlu0 %v1019_v30  ;;  %v4718_v1 = vadd.f32 %v3654_v40, %v4420_v57 }
 0x692   :  { %v1004_v27 = vpop.f32.mrf.mxu1 }
 0x693   :  { %v4721_v37 = vadd.f32 %v4420_v57, %v1004_v27  ;;  %v1028_v29 = vsel %vm403_vm6, %v4718_v1, 0.0  ;;  %v1042_v55 = vmul.f32 %v4718_v1, %v4718_v1  ;;  %v1049_v57 = vsel %vm403_vm6, %v1039_v59, 0.0 }
 0x694   :  { %1029 = vadd.xlane.f32.xlu1 %v1028_v29 }
 0x695   :  { %v1025_v31 = vsel %vm403_vm6, %v4721_v37, 0.0  ;;  %v1058_v50 = vsel %vm403_vm6, %v1042_v55, 0.0  ;;  %v1041_v62 = vmul.f32 %v4721_v37, %v4721_v37 }
 0x696   :  { %1026 = vadd.xlane.f32.xlu0 %v1025_v31 }
 0x697   :  { %v1055_v32 = vsel %vm403_vm6, %v1041_v62, 0.0 }
 0x698   :  { %1059 = vadd.xlane.f32.xlu1 %v1058_v50 }
 0x69a   :  { %1017 = vadd.xlane.f32.xlu0 %v1016_v6 }
 0x69c   :  { %1056 = vadd.xlane.f32.xlu1 %v1055_v32 }
 0x69e   :  { %1014 = vadd.xlane.f32.xlu0 %v1013_v47 }
 0x6a0   :  { %1050 = vadd.xlane.f32.xlu1 %v1049_v57 }
 0x6a2   :  { %1044 = vadd.xlane.f32.xlu0 %v1043_v43 }
 0x6a4   :  { %1047 = vadd.xlane.f32.xlu1 %v1046_v14 }
 0x716   :  { %v1024_v15 = vpop.xlane.xlu0 %1023 }
 0x717   :  { %v1034_v63 = vmul.f32 0.03125, %v1024_v15 }
 0x718   :  { %v1054_v61 = vpop.xlane.xlu1 %1053 }
 0x719   :  { %v1070_v21 = vmul.f32 %v1034_v63, %v1034_v63  ;;  %v1064_v34 = vmul.f32 0.03125, %v1054_v61 }
 0x71a   :  { %v1021_v38 = vpop.xlane.xlu0 %1020 }
 0x71b   :  { %v1076_v36 = vsub.f32 %v1064_v34, %v1070_v21  ;;  %v1033_v27 = vmul.f32 0.03125, %v1021_v38 }
 0x71d   :  { %v1030_v39 = vpop.xlane.xlu1 %1029  ;;  %v1088_v17 = vadd.f32 1e-05, %v1076_v36  ;;  %v1069_v59 = vmul.f32 %v1033_v27, %v1033_v27 }
 0x71e   :  { %v1036_v41 = vmul.f32 0.03125, %v1030_v39 }
 0x71f   :  { %v1027_v9 = vpop.xlane.xlu0 %1026  ;;  %4005 = vrsqrt.f32 %v1088_v17 }
 0x720   :  { %v1072_v35 = vmul.f32 %v1036_v41, %v1036_v41  ;;  %v1035_v51 = vmul.f32 0.03125, %v1027_v9 }
 0x721   :  { %v1060_v44 = vpop.xlane.xlu1 %1059 }
 0x722   :  { %v1066_v53 = vmul.f32 0.03125, %v1060_v44  ;;  %v1071_v29 = vmul.f32 %v1035_v51, %v1035_v51  ;;  %v1082_v44 = vsub.f32 %v4705_v45, %v1034_v63  ;;  %v1081_v63 = vsub.f32 %v4708_v28, %v1033_v27 }
 0x723   :  { %v1018_v48 = vpop.xlane.xlu0 %1017 }
 0x724   :  { %v1078_v30 = vsub.f32 %v1066_v53, %v1072_v35  ;;  %v1032_v47 = vmul.f32 0.03125, %v1018_v48  ;;  %v1084_v48 = vsub.f32 %v4718_v1, %v1036_v41 }
 0x725   :  { %v1057_v40 = vpop.xlane.xlu1 %1056 }
 0x726   :  { %v1090_v55 = vadd.f32 1e-05, %v1078_v30  ;;  %v1065_v31 = vmul.f32 0.03125, %v1057_v40  ;;  %v1068_v21 = vmul.f32 %v1032_v47, %v1032_v47 }
 0x727   :  { %v1015_v50 = vpop.xlane.xlu0 %1014 }
 0x728   :  { %4007 = vrsqrt.f32 %v1090_v55  ;;  %v1077_v62 = vsub.f32 %v1065_v31, %v1071_v29  ;;  %v1031_v6 = vmul.f32 0.03125, %v1015_v50  ;;  %v1083_v55 = vsub.f32 %v4721_v37, %v1035_v51 }
 0x729   :  { %v1051_v32 = vpop.xlane.xlu1 %1050 }
 0x72a   :  { %v1089_v46 = vadd.f32 1e-05, %v1077_v62  ;;  %v1063_v57 = vmul.f32 0.03125, %v1051_v32  ;;  %v1067_v43 = vmul.f32 %v1031_v6, %v1031_v6 }
 0x72b   :  { %v1045_v42 = vpop.xlane.xlu0 %1044 }
 0x72c   :  { %4009 = vrsqrt.f32 %v1089_v46  ;;  %v1075_v14 = vsub.f32 %v1063_v57, %v1069_v59  ;;  %v1061_v15 = vmul.f32 0.03125, %v1045_v42  ;;  %v4006_v39 = vpop.eup %4005  ;;  %v1079_v46 = vsub.f32 %v4736_v3, %v1031_v6 }
 0x72d   :  { %v1048_v61 = vpop.xlane.xlu1 %1047  ;;  %v1100_v53 = vmul.f32 %v4006_v39, %v1082_v44 }
 0x72e   :  { %v1087_v34 = vadd.f32 1e-05, %v1075_v14  ;;  %v1073_v36 = vsub.f32 %v1061_v15, %v1067_v43  ;;  %v1062_v38 = vmul.f32 0.03125, %v1048_v61  ;;  %v1080_v43 = vsub.f32 %v4728_v52, %v1032_v47 }
 0x72f   :  { %v1106_v29 = vmul.f32 %v4511_v10, %v1100_v53 }
 0x730   :  { %4011 = vrsqrt.f32 %v1087_v34  ;;  %v1085_v17 = vadd.f32 1e-05, %v1073_v36  ;;  %v1074_v9 = vsub.f32 %v1062_v38, %v1068_v21 }
 0x731   :  { %v1112_v45 = vadd.f32 %v4518_v54, %v1106_v29  ;;  %v4840_v29 = vld [vmem:[%s5579_s5 + $0x50] sm:$0xff] }
 0x732   :  { %4013 = vrsqrt.f32 %v1085_v17  ;;  %v1086_v35 = vadd.f32 1e-05, %v1074_v9 }
 0x733   :  { %vm1118_vm0 = vcmp.ge.f32.partialorder %v1112_v45, 0.0  ;;  %v1124_v14 = vmul.f32 0.01, %v1112_v45 }
 0x734   :  { %4015 = vrsqrt.f32 %v1086_v35 }
 0x735   :  { %v4008_v30 = vpop.eup %4007  ;;  %v1130_v36 = vsel %vm1118_vm0, %v1112_v45, %v1124_v14  ;;  %v4882_v45 = vld [vmem:[%s5579_s5 + $0x20] sm:$0xff] }
 0x736   :  { %v1102_v40 = vmul.f32 %v4008_v30, %v1084_v48 }
 0x738   :  { %v1108_v31 = vmul.f32 %v4511_v10, %v1102_v40  ;;  %v4833_v40 = vld [vmem:[%s5579_s5 + $0x58] sm:$0xff] }
 0x739   :  { %v4010_v50 = vpop.eup %4009 }
 0x73a   :  { %v1114_v62 = vadd.f32 %v4518_v54, %v1108_v31  ;;  %v1101_v32 = vmul.f32 %v4010_v50, %v1083_v55  ;;  %v4847_v55 = vld [vmem:[%s5579_s5 + $0x48] sm:$0xff]  ;;  %v4854_v31 = vld [vmem:[%s5579_s5 + $0x40] sm:$0xff]  ;;  %v4861_v50 = vld [vmem:[%s5579_s5 + $0x38] sm:$0xff] }
 0x73c   :  { %vm1120_vm15 = vcmp.ge.f32.partialorder %v1114_v62, 0.0  ;;  %v1126_v59 = vmul.f32 0.01, %v1114_v62  ;;  %v1107_v1 = vmul.f32 %v4511_v10, %v1101_v32  ;;  %v4875_v32 = vld [vmem:[%s5579_s5 + $0x28] sm:$0xff] }
 0x73d   :  { %v4012_v41 = vpop.eup %4011 }
 0x73e   :  { %v1132_v57 = vsel %vm1120_vm15, %v1114_v62, %v1126_v59  ;;  %v1113_v37 = vadd.f32 %v4518_v54, %v1107_v1  ;;  %v1099_v51 = vmul.f32 %v4012_v41, %v1081_v63  ;;  %v4868_v62 = vld [vmem:[%s5579_s5 + $0x30] sm:$0xff]  ;;  %v4889_v63 = vld [vmem:[%s5579_s5 + $0x18] sm:$0xff]  ;;  %v4903_v1 = vld [vmem:[%s5579_s5 + $0x8] sm:$0xff] }
 0x73f   :  { %v4014_v42 = vpop.eup %4013  ;;  %3655 = vmatprep.subr.mxu0 %v1132_v57  ;;  %v4896_v59 = vld [vmem:[%s5579_s5 + $0x10] sm:$0xff]  ;;  %v4910_v41 = vld [vmem:[%s5579_s5] sm:$0xff] }
 0x740   :  { %3656 = vmatpush3.msra.mxu0 %v1132_v57  ;;  %vm1119_vm2 = vcmp.ge.f32.partialorder %v1113_v37, 0.0  ;;  %v1125_v28 = vmul.f32 0.01, %v1113_v37  ;;  %v1105_v27 = vmul.f32 %v4511_v10, %v1099_v51  ;;  %v1097_v15 = vmul.f32 %v4014_v42, %v1079_v46 }
 0x741   :  { %v4016_v61 = vpop.eup %4015 }
 0x742   :  { %v1131_v21 = vsel %vm1119_vm2, %v1113_v37, %v1125_v28  ;;  %v1111_v3 = vadd.f32 %v4518_v54, %v1105_v27  ;;  %v1098_v6 = vmul.f32 %v4016_v61, %v1080_v43  ;;  %v1103_v34 = vmul.f32 %v4511_v10, %v1097_v15 }
 0x743   :  { %3657 = vmatprep.subr.mxu0 %v1131_v21 }
 0x744   :  { %3658 = vmatpush3.msra.mxu0 %v1131_v21  ;;  %vm1117_vm3 = vcmp.ge.f32.partialorder %v1111_v3, 0.0  ;;  %v1123_v52 = vmul.f32 0.01, %v1111_v3  ;;  %v1104_v47 = vmul.f32 %v4511_v10, %v1098_v6  ;;  %v1109_v38 = vadd.f32 %v4518_v54, %v1103_v34 }
 0x745   :  { %3659 = vmatprep.subr.mxu0 %v1130_v36 }
 0x746   :  { %3660 = vmatpush3.msra.mxu0 %v1130_v36  ;;  %v1129_v39 = vsel %vm1117_vm3, %v1111_v3, %v1123_v52  ;;  %v1110_v17 = vadd.f32 %v4518_v54, %v1104_v47  ;;  %v1121_v44 = vmul.f32 0.01, %v1109_v38  ;;  %vm1115_vm5 = vcmp.ge.f32.partialorder %v1109_v38, 0.0 }
 0x747   :  { %3661 = vmatprep.subr.mxu0 %v1129_v39 }
 0x748   :  { %3662 = vmatpush3.msra.mxu0 %v1129_v39  ;;  %vm1116_vm4 = vcmp.ge.f32.partialorder %v1110_v17, 0.0  ;;  %v1122_v9 = vmul.f32 0.01, %v1110_v17  ;;  %v1127_v53 = vsel %vm1115_vm5, %v1109_v38, %v1121_v44 }
 0x74a   :  { %v1128_v35 = vsel %vm1116_vm4, %v1110_v17, %v1122_v9 }
 0x74b   :  { %3663 = vmatprep.subr.mxu0 %v1128_v35 }
 0x74c   :  { %3664 = vmatpush3.msra.mxu0 %v1128_v35 }
 0x74d   :  { %3665 = vmatprep.subr.mxu0 %v1127_v53 }
 0x74e   :  { %3666 = vmatpush3.msra.mxu0 %v1127_v53 }
 0x74f   :  { %3668 = vmatmul.mubr.msk.f32.vlgmr.msra.gmra.mxu0 %vm533_vm8, %v4537_v2  ;;  %3670 = vmatprep.subr.mxu0 %v4542_v4 }
 0x750   :  { %3671 = vmatpush3.msra.mxu0 %v4542_v4 }
 0x751   :  { %3672 = vmatprep.subr.mxu0 %v4547_v5 }
 0x752   :  { %3673 = vmatpush3.msra.mxu0 %v4547_v5 }
 0x753   :  { %3674 = vmatprep.subr.mxu0 %v4558_v56 }
 0x754   :  { %3675 = vmatpush3.msra.mxu0 %v4558_v56  ;;  %v4797_v56 = vld [vmem:[%s5579_s5 + $0x78] sm:$0xff] }
 0x755   :  { %3676 = vmatprep.subr.mxu0 %v4565_v7 }
 0x756   :  { %3677 = vmatpush3.msra.mxu0 %v4565_v7  ;;  %v4806_v7 = vld [vmem:[%s5579_s5 + $0x70] sm:$0xff] }
 0x80f   :  { %v3669_v10 = vpop.f32.mrf.mxu0 }
 0x810   :  { %v4784_v30 = vadd.f32 %v3669_v10, %v4572_v16  ;;  %v4815_v16 = vld [vmem:[%s5579_s5 + $0x68] sm:$0xff] }
 0x811   :  { %v1199_v54 = vpop.f32.mrf.mxu0 }
 0x812   :  { %v4781_v48 = vadd.f32 %v1199_v54, %v4575_v11  ;;  %v4824_v11 = vld [vmem:[%s5579_s5 + $0x60] sm:$0xff] }
 0x814   :  { %3678 = vmatprep.mubr.msk.f32.mxu0 %vm403_vm6, %v4781_v48 }
 0x815   :  { %3679 = vmatmul.mubr.msk.f32.vlgmr.msra.gmra.mxu0 %vm403_vm6, %v4784_v30 }
 0x816   :  { %3685 = vmatprep.mubr.msk.f32.mxu0 %vm696_vm1, %v4580_v13 }
 0x8d5   :  { %v3680_v4 = vpop.f32.mrf.mxu0 }
 0x8d6   :  { %3681 = vmatprep.subr.mxu0 %v3680_v4 }
 0x8d7   :  { %v1282_v5 = vpop.f32.mrf.mxu0  ;;  %3682 = vmatpush3.msra.mxu0 %v3680_v4 }
 0x8d8   :  { %3683 = vmatprep.subr.mxu0 %v1282_v5 }
 0x8d9   :  { %3684 = vmatpush3.msra.mxu0 %v1282_v5 }
 0x8da   :  { %3686 = vmatmul.mubr.msk.f32.vlgmr.msra.gmra.mxu0 %vm696_vm1, %v4589_v22  ;;  %3694 = vmatprep.subr.mxu0 %v4797_v56 }
 0x8db   :  { %3688 = vmatprep.mubr.msk.f32.mxu0 %vm696_vm1, %v4592_v20  ;;  %3695 = vmatpush3.msra.mxu0 %v4797_v56 }
 0x8dc   :  { %3696 = vmatprep.subr.mxu0 %v4806_v7 }
 0x8dd   :  { %3697 = vmatpush3.msra.mxu0 %v4806_v7 }
 0x8de   :  { %3689 = vmatmul.mubr.msk.f32.gmra.mxu0 %vm696_vm1, %v4604_v25  ;;  %3698 = vmatprep.subr.mxu0 %v4815_v16 }
 0x8df   :  { %3691 = vmatprep.mubr.msk.f32.mxu0 %vm696_vm1, %v4608_v0  ;;  %3699 = vmatpush3.msra.mxu0 %v4815_v16 }
 0x8e0   :  { %3700 = vmatprep.subr.mxu0 %v4824_v11 }
 0x8e1   :  { %3701 = vmatpush3.msra.mxu0 %v4824_v11 }
 0x8e2   :  { %3692 = vmatmul.mubr.msk.f32.gmra.mxu0 %vm696_vm1, %v4619_v33  ;;  %3702 = vmatprep.subr.mxu0 %v4833_v40 }
 0x8e3   :  { %3703 = vmatpush3.msra.mxu0 %v4833_v40 }
 0x8e4   :  { %3704 = vmatprep.subr.mxu0 %v4840_v29 }
 0x8e5   :  { %3705 = vmatpush3.msra.mxu0 %v4840_v29 }
 0x8e6   :  { %3706 = vmatprep.subr.mxu0 %v4847_v55 }
 0x8e7   :  { %3707 = vmatpush3.msra.mxu0 %v4847_v55 }
 0x8e8   :  { %3708 = vmatprep.subr.mxu0 %v4854_v31 }
 0x8e9   :  { %3709 = vmatpush3.msra.mxu0 %v4854_v31 }
 0x8ea   :  { %3710 = vmatprep.subr.mxu0 %v4861_v50 }
 0x8eb   :  { %3711 = vmatpush3.msra.mxu0 %v4861_v50 }
 0x8ec   :  { %3712 = vmatprep.subr.mxu0 %v4868_v62 }
 0x8ed   :  { %3713 = vmatpush3.msra.mxu0 %v4868_v62 }
 0x8ee   :  { %3714 = vmatprep.subr.mxu0 %v4875_v32 }
 0x8ef   :  { %3715 = vmatpush3.msra.mxu0 %v4875_v32 }
 0x8f0   :  { %3716 = vmatprep.subr.mxu0 %v4882_v45 }
 0x8f1   :  { %3717 = vmatpush3.msra.mxu0 %v4882_v45 }
 0x8f2   :  { %3718 = vmatprep.subr.mxu0 %v4889_v63 }
 0x8f3   :  { %3719 = vmatpush3.msra.mxu0 %v4889_v63 }
 0x8f4   :  { %3720 = vmatprep.subr.mxu0 %v4896_v59 }
 0x8f5   :  { %3721 = vmatpush3.msra.mxu0 %v4896_v59 }
 0x8f6   :  { %3722 = vmatprep.subr.mxu0 %v4903_v1 }
 0x8f7   :  { %3723 = vmatpush3.msra.mxu0 %v4903_v1 }
 0x8f8   :  { %3724 = vmatprep.subr.mxu0 %v4910_v41 }
 0x8f9   :  { %3725 = vmatpush3.msra.mxu0 %v4910_v41 }
 0x99a   :  { %v3687_v46 = vpop.f32.mrf.mxu0 }
 0x99b   :  { %v4915_v57 = vadd.f32 %v3687_v46, %v4252_v19 }
 0x99c   :  { %v1357_v37 = vpop.f32.mrf.mxu0 }
 0x99d   :  { %v4918_v51 = vadd.f32 %v1357_v37, %v4247_v12  ;;  %1388 = vadd.xlane.f32.xlu0 %v4915_v57  ;;  %v1405_v43 = vmul.f32 %v4915_v57, %v4915_v57 }
 0x99e   :  { %v3690_v42 = vpop.f32.mrf.mxu0 }
 0x99f   :  { %1386 = vadd.xlane.f32.xlu1 %v4918_v51  ;;  %v1404_v14 = vmul.f32 %v4918_v51, %v4918_v51  ;;  %v4927_v27 = vadd.f32 %v3690_v42, %v4250_v18 }
 0x9a0   :  { %v1367_v28 = vpop.f32.mrf.mxu0 }
 0x9a1   :  { %1412 = vadd.xlane.f32.xlu0 %v1405_v43  ;;  %v4930_v15 = vadd.f32 %v1367_v28, %v4256_v23  ;;  %v1407_v21 = vmul.f32 %v4927_v27, %v4927_v27 }
 0x9a2   :  { %v3693_v61 = vpop.f32.mrf.mxu0 }
 0x9a3   :  { %1410 = vadd.xlane.f32.xlu1 %v1404_v14  ;;  %v1406_v3 = vmul.f32 %v4930_v15, %v4930_v15  ;;  %v4939_v34 = vadd.f32 %v3693_v61, %v4258_v24 }
 0x9a4   :  { %v1377_v6 = vpop.f32.mrf.mxu0 }
 0x9a5   :  { %1392 = vadd.xlane.f32.xlu0 %v4927_v27  ;;  %v4942_v36 = vadd.f32 %v1377_v6, %v4262_v26  ;;  %v1409_v52 = vmul.f32 %v4939_v34, %v4939_v34 }
 0x9a7   :  { %1390 = vadd.xlane.f32.xlu1 %v4930_v15  ;;  %v1408_v47 = vmul.f32 %v4942_v36, %v4942_v36 }
 0x9a9   :  { %1416 = vadd.xlane.f32.xlu0 %v1407_v21 }
 0x9ab   :  { %1414 = vadd.xlane.f32.xlu1 %v1406_v3 }
 0x9ad   :  { %1396 = vadd.xlane.f32.xlu0 %v4939_v34 }
 0x9af   :  { %1394 = vadd.xlane.f32.xlu1 %v4942_v36 }
 0x9b1   :  { %1420 = vadd.xlane.f32.xlu0 %v1409_v52 }
 0x9b3   :  { %1418 = vadd.xlane.f32.xlu1 %v1408_v47 }
 0xa26   :  { %v1389_v38 = vpop.xlane.xlu0 %1388 }
 0xa27   :  { %v1399_v39 = vmul.f32 0.0078125, %v1389_v38 }
 0xa28   :  { %v1387_v17 = vpop.xlane.xlu1 %1386 }
 0xa29   :  { %v1398_v9 = vmul.f32 0.0078125, %v1387_v17  ;;  %v1429_v35 = vmul.f32 %v1399_v39, %v1399_v39 }
 0xa2a   :  { %v1413_v44 = vpop.xlane.xlu0 %1412 }
 0xa2b   :  { %v1423_v53 = vmul.f32 0.0078125, %v1413_v44  ;;  %v1428_v54 = vmul.f32 %v1398_v9, %v1398_v9 }
 0xa2c   :  { %v1411_v10 = vpop.xlane.xlu1 %1410 }
 0xa2d   :  { %v1435_v4 = vsub.f32 %v1423_v53, %v1429_v35  ;;  %v1422_v5 = vmul.f32 0.0078125, %v1411_v10 }
 0xa2e   :  { %v1393_v46 = vpop.xlane.xlu0 %1392 }
 0xa2f   :  { %v1447_v37 = vadd.f32 1e-05, %v1435_v4  ;;  %v1434_v42 = vsub.f32 %v1422_v5, %v1428_v54  ;;  %v1401_v43 = vmul.f32 0.0078125, %v1393_v46 }
 0xa30   :  { %v1391_v14 = vpop.xlane.xlu1 %1390 }
 0xa31   :  { %4017 = vrsqrt.f32 %v1447_v37  ;;  %v1446_v28 = vadd.f32 1e-05, %v1434_v42  ;;  %v1400_v61 = vmul.f32 0.0078125, %v1391_v14  ;;  %v1431_v3 = vmul.f32 %v1401_v43, %v1401_v43 }
 0xa32   :  { %v1417_v21 = vpop.xlane.xlu0 %1416  ;;  %v1441_v14 = vsub.f32 %v4915_v57, %v1399_v39 }
 0xa33   :  { %4019 = vrsqrt.f32 %v1446_v28  ;;  %v1425_v6 = vmul.f32 0.0078125, %v1417_v21  ;;  %v1430_v47 = vmul.f32 %v1400_v61, %v1400_v61 }
 0xa34   :  { %v1415_v52 = vpop.xlane.xlu1 %1414 }
 0xa35   :  { %v1437_v38 = vsub.f32 %v1425_v6, %v1431_v3  ;;  %v1424_v17 = vmul.f32 0.0078125, %v1415_v52  ;;  %v1440_v6 = vsub.f32 %v4918_v51, %v1398_v9  ;;  %v4962_v51 = vld [vmem:[%s5578_s4 + $0x3] ss:$0 sm:$0xff]  ;;  %v1443_v9 = vsub.f32 %v4927_v27, %v1401_v43 }
 0xa36   :  { %v1397_v44 = vpop.xlane.xlu0 %1396  ;;  %5598 = vst [vmem:[#allocation8_spill] sm:$0xff] %v4962_v51 }
 0xa37   :  { %v1449_v58 = vadd.f32 1e-05, %v1437_v38  ;;  %v1436_v35 = vsub.f32 %v1424_v17, %v1430_v47  ;;  %v1403_v53 = vmul.f32 0.0078125, %v1397_v44 }
 0xa38   :  { %v1395_v10 = vpop.xlane.xlu1 %1394 }
 0xa39   :  { %4021 = vrsqrt.f32 %v1449_v58  ;;  %v1448_v54 = vadd.f32 1e-05, %v1436_v35  ;;  %v1402_v4 = vmul.f32 0.0078125, %v1395_v10  ;;  %v1433_v46 = vmul.f32 %v1403_v53, %v1403_v53  ;;  %v4955_v35 = vld [vmem:[%s5578_s4 + $0x2] ss:$0 sm:$0xff] }
 0xa3a   :  { %v1421_v5 = vpop.xlane.xlu0 %1420 }
 0xa3b   :  { %4023 = vrsqrt.f32 %v1448_v54  ;;  %v1427_v37 = vmul.f32 0.0078125, %v1421_v5  ;;  %v1432_v28 = vmul.f32 %v1402_v4, %v1402_v4  ;;  %v1442_v5 = vsub.f32 %v4930_v15, %v1400_v61 }
 0xa3c   :  { %v1419_v42 = vpop.xlane.xlu1 %1418 }
 0xa3d   :  { %v1439_v21 = vsub.f32 %v1427_v37, %v1433_v46  ;;  %v1426_v8 = vmul.f32 0.0078125, %v1419_v42 }
 0xa3e   :  { %v4018_v3 = vpop.eup %4017 }
 0xa3f   :  { %v1451_v52 = vadd.f32 1e-05, %v1439_v21  ;;  %v1438_v47 = vsub.f32 %v1426_v8, %v1432_v28  ;;  %v1459_v38 = vmul.f32 %v4018_v3, %v1441_v14 }
 0xa40   :  { %v4020_v17 = vpop.eup %4019 }
 0xa41   :  { %4025 = vrsqrt.f32 %v1451_v52  ;;  %v1450_v58 = vadd.f32 1e-05, %v1438_v47  ;;  %v1458_v44 = vmul.f32 %v4020_v17, %v1440_v6  ;;  %v1465_v57 = vmul.f32 %v4955_v35, %v1459_v38 }
 0xa42   :  { %v1445_v52 = vsub.f32 %v4939_v34, %v1403_v53  ;;  %v1444_v47 = vsub.f32 %v4942_v36, %v1402_v4 }
 0xa43   :  { %4027 = vrsqrt.f32 %v1450_v58  ;;  %v1464_v39 = vmul.f32 %v4955_v35, %v1458_v44  ;;  %v1471_v8 = vadd.f32 %v4962_v51, %v1465_v57 }
 0xa45   :  { %v1470_v10 = vadd.f32 %v4962_v51, %v1464_v39  ;;  %v1483_v46 = vmul.f32 0.01, %v1471_v8  ;;  %vm1477_vm9 = vcmp.ge.f32.partialorder %v1471_v8, 0.0 }
 0xa46   :  { %v4022_v54 = vpop.eup %4021 }
 0xa47   :  { %vm1476_vm7 = vcmp.ge.f32.partialorder %v1470_v10, 0.0  ;;  %v1482_v37 = vmul.f32 0.01, %v1470_v10  ;;  %v1461_v42 = vmul.f32 %v4022_v54, %v1443_v9  ;;  %v1489_v6 = vsel %vm1477_vm9, %v1471_v8, %v1483_v46 }
 0xa48   :  { %v4024_v14 = vpop.eup %4023 }
 0xa49   :  { %v1488_v28 = vsel %vm1476_vm7, %v1470_v10, %v1482_v37  ;;  %v1460_v21 = vmul.f32 %v4024_v14, %v1442_v5  ;;  %v1467_v3 = vmul.f32 %v4955_v35, %v1461_v42  ;;  %v4983_v14 = vld [vmem:[%s5580_s6] ss:$0 sm:$0xff] }
 0xa4a   :  { %3726 = vmatprep.mubr.f32.mxu0 %v1488_v28  ;;  %5599 = vst [vmem:[#allocation9_spill] sm:$0xff] %v4983_v14 }
 0xa4b   :  { %3727 = vmatmul.mubr.f32.vlgmr.msra.gmra.mxu0 %v1489_v6  ;;  %v1466_v27 = vmul.f32 %v4955_v35, %v1460_v21  ;;  %v1473_v43 = vadd.f32 %v4962_v51, %v1467_v3 }
 0xa4d   :  { %v1472_v15 = vadd.f32 %v4962_v51, %v1466_v27  ;;  %v1485_v38 = vmul.f32 0.01, %v1473_v43  ;;  %vm1479_vm11 = vcmp.ge.f32.partialorder %v1473_v43, 0.0 }
 0xa4e   :  { %v4026_v61 = vpop.eup %4025 }
 0xa4f   :  { %vm1478_vm10 = vcmp.ge.f32.partialorder %v1472_v15, 0.0  ;;  %v1484_v17 = vmul.f32 0.01, %v1472_v15  ;;  %v1463_v58 = vmul.f32 %v4026_v61, %v1445_v52  ;;  %v1491_v9 = vsel %vm1479_vm11, %v1473_v43, %v1485_v38 }
 0xa50   :  { %v4028_v44 = vpop.eup %4027 }
 0xa51   :  { %v1490_v57 = vsel %vm1478_vm10, %v1472_v15, %v1484_v17  ;;  %v1462_v39 = vmul.f32 %v4028_v44, %v1444_v47  ;;  %v1469_v8 = vmul.f32 %v4955_v35, %v1463_v58 }
 0xa52   :  { %3729 = vmatprep.mubr.f32.mxu0 %v1490_v57 }
 0xa53   :  { %3730 = vmatmul.mubr.f32.gmra.mxu0 %v1491_v9  ;;  %v1468_v34 = vmul.f32 %v4955_v35, %v1462_v39  ;;  %v1475_v53 = vadd.f32 %v4962_v51, %v1469_v8 }
 0xa55   :  { %v1474_v10 = vadd.f32 %v4962_v51, %v1468_v34  ;;  %v1487_v36 = vmul.f32 0.01, %v1475_v53  ;;  %vm1481_vm13 = vcmp.ge.f32.partialorder %v1475_v53, 0.0 }
 0xa57   :  { %vm1480_vm12 = vcmp.ge.f32.partialorder %v1474_v10, 0.0  ;;  %v1486_v4 = vmul.f32 0.01, %v1474_v10  ;;  %v1493_v5 = vsel %vm1481_vm13, %v1475_v53, %v1487_v36 }
 0xa59   :  { %v1492_v54 = vsel %vm1480_vm12, %v1474_v10, %v1486_v4 }
 0xa5a   :  { %3732 = vmatprep.mubr.f32.mxu0 %v1492_v54 }
 0xa5b   :  { %3733 = vmatmul.mubr.f32.gmra.mxu0 %v1493_v5 }
 0xa5c   :  { %3827 = vmatprep.mubr.msk.f32.mxu0 %vm533_vm8, %v4500_v60 }
 0xb0b   :  { %v3728_v46 = vpop.f32.mrf.mxu0 }
 0xb0c   :  { %v5009_v44 = vadd.f32 %v4983_v14, %v3728_v46 }
 0xb0d   :  { %v1560_v37 = vpop.f32.mrf.mxu0 }
 0xb0e   :  { %v5017_v9 = vadd.f32 %v4983_v14, %v1560_v37  ;;  %v1592_v34 = vsel %vm403_vm6, %v5009_v44, 0.0  ;;  %v1614_v5 = vmul.f32 %v5009_v44, %v5009_v44 }
 0xb10   :  { %v1589_v36 = vsel %vm403_vm6, %v5017_v9, 0.0  ;;  %v1613_v4 = vmul.f32 %v5017_v9, %v5017_v9  ;;  %v1622_v37 = vsel %vm403_vm6, %v1614_v5, 0.0 }
 0xb12   :  { %v1619_v46 = vsel %vm403_vm6, %v1613_v4, 0.0 }
 0xb13   :  { %v3731_v42 = vpop.f32.mrf.mxu0 }
 0xb14   :  { %v4986_v28 = vadd.f32 %v4983_v14, %v3731_v42 }
 0xb15   :  { %v1570_v21 = vpop.f32.mrf.mxu0 }
 0xb16   :  { %v4989_v3 = vadd.f32 %v4983_v14, %v1570_v21  ;;  %v1598_v6 = vsel %vm403_vm6, %v4986_v28, 0.0  ;;  %v1616_v27 = vmul.f32 %v4986_v28, %v4986_v28 }
 0xb17   :  { %1599 = vadd.xlane.f32.xlu0 %v1598_v6 }
 0xb18   :  { %v1628_v43 = vsel %vm403_vm6, %v1616_v27, 0.0  ;;  %v1595_v52 = vsel %vm403_vm6, %v4989_v3, 0.0  ;;  %v1615_v10 = vmul.f32 %v4989_v3, %v4989_v3 }
 0xb19   :  { %1629 = vadd.xlane.f32.xlu1 %v1628_v43 }
 0xb1a   :  { %v1625_v54 = vsel %vm403_vm6, %v1615_v10, 0.0 }
 0xb1b   :  { %1596 = vadd.xlane.f32.xlu0 %v1595_v52  ;;  %v3734_v15 = vpop.f32.mrf.mxu0 }
 0xb1c   :  { %v4999_v61 = vadd.f32 %v4983_v14, %v3734_v15 }
 0xb1d   :  { %v1580_v47 = vpop.f32.mrf.mxu0 }
 0xb1e   :  { %v5002_v38 = vadd.f32 %v4983_v14, %v1580_v47  ;;  %v1604_v17 = vsel %vm403_vm6, %v4999_v61, 0.0  ;;  %v1618_v58 = vmul.f32 %v4999_v61, %v4999_v61 }
 0xb1f   :  { %1605 = vadd.xlane.f32.xlu1 %v1604_v17 }
 0xb20   :  { %v1601_v57 = vsel %vm403_vm6, %v5002_v38, 0.0  ;;  %v1634_v39 = vsel %vm403_vm6, %v1618_v58, 0.0  ;;  %v1617_v8 = vmul.f32 %v5002_v38, %v5002_v38 }
 0xb21   :  { %1602 = vadd.xlane.f32.xlu0 %v1601_v57 }
 0xb22   :  { %v1631_v53 = vsel %vm403_vm6, %v1617_v8, 0.0 }
 0xb23   :  { %1635 = vadd.xlane.f32.xlu1 %v1634_v39 }
 0xb25   :  { %1593 = vadd.xlane.f32.xlu0 %v1592_v34 }
 0xb27   :  { %1632 = vadd.xlane.f32.xlu1 %v1631_v53 }
 0xb29   :  { %1590 = vadd.xlane.f32.xlu0 %v1589_v36 }
 0xb2b   :  { %1626 = vadd.xlane.f32.xlu1 %v1625_v54 }
 0xb2d   :  { %1620 = vadd.xlane.f32.xlu0 %v1619_v46 }
 0xb2f   :  { %1623 = vadd.xlane.f32.xlu1 %v1622_v37 }
 0xba0   :  { %v1600_v42 = vpop.xlane.xlu0 %1599 }
 0xba1   :  { %v1610_v21 = vmul.f32 0.03125, %v1600_v42 }
 0xba2   :  { %v1630_v6 = vpop.xlane.xlu1 %1629 }
 0xba3   :  { %v1646_v27 = vmul.f32 %v1610_v21, %v1610_v21  ;;  %v1640_v43 = vmul.f32 0.03125, %v1630_v6 }
 0xba4   :  { %v1597_v15 = vpop.xlane.xlu0 %1596 }
 0xba5   :  { %v1652_v52 = vsub.f32 %v1640_v43, %v1646_v27  ;;  %v1609_v54 = vmul.f32 0.03125, %v1597_v15 }
 0xba7   :  { %v1664_v58 = vadd.f32 1e-05, %v1652_v52 }
 0xba8   :  { %v1606_v47 = vpop.xlane.xlu1 %1605 }
 0xba9   :  { %v1612_v17 = vmul.f32 0.03125, %v1606_v47  ;;  %4029 = vrsqrt.f32 %v1664_v58  ;;  %v1645_v47 = vmul.f32 %v1609_v54, %v1609_v54 }
 0xbaa   :  { %v1603_v57 = vpop.xlane.xlu0 %1602 }
 0xbab   :  { %v1648_v8 = vmul.f32 %v1612_v17, %v1612_v17  ;;  %v1611_v34 = vmul.f32 0.03125, %v1603_v57 }
 0xbac   :  { %v1636_v39 = vpop.xlane.xlu1 %1635 }
 0xbad   :  { %v1642_v53 = vmul.f32 0.03125, %v1636_v39  ;;  %v1647_v5 = vmul.f32 %v1611_v34, %v1611_v34 }
 0xbae   :  { %v1594_v10 = vpop.xlane.xlu0 %1593 }
 0xbaf   :  { %v1654_v36 = vsub.f32 %v1642_v53, %v1648_v8  ;;  %v1608_v52 = vmul.f32 0.03125, %v1594_v10 }
 0xbb0   :  { %v1633_v4 = vpop.xlane.xlu1 %1632 }
 0xbb1   :  { %v1666_v46 = vadd.f32 1e-05, %v1654_v36  ;;  %v1641_v37 = vmul.f32 0.03125, %v1633_v4  ;;  %v1644_v53 = vmul.f32 %v1608_v52, %v1608_v52 }
 0xbb2   :  { %v1591_v42 = vpop.xlane.xlu0 %1590 }
 0xbb3   :  { %4031 = vrsqrt.f32 %v1666_v46  ;;  %v1653_v6 = vsub.f32 %v1641_v37, %v1647_v5  ;;  %v1607_v27 = vmul.f32 0.03125, %v1591_v42  ;;  %v1658_v37 = vsub.f32 %v4986_v28, %v1610_v21  ;;  %v5046_v21 = vld [vmem:[%s5580_s6 + $0x2] ss:$0 sm:$0xff] }
 0xbb4   :  { %v1627_v43 = vpop.xlane.xlu1 %1626 }
 0xbb5   :  { %v1665_v49 = vadd.f32 1e-05, %v1653_v6  ;;  %v1639_v14 = vmul.f32 0.03125, %v1627_v43  ;;  %v1643_v57 = vmul.f32 %v1607_v27, %v1607_v27  ;;  %v1660_v6 = vsub.f32 %v4999_v61, %v1612_v17 }
 0xbb6   :  { %v1621_v60 = vpop.xlane.xlu0 %1620  ;;  %v4030_v4 = vpop.eup %4029 }
 0xbb7   :  { %4033 = vrsqrt.f32 %v1665_v49  ;;  %v1651_v58 = vsub.f32 %v1639_v14, %v1645_v47  ;;  %v1637_v39 = vmul.f32 0.03125, %v1621_v60  ;;  %v1676_v42 = vmul.f32 %v4030_v4, %v1658_v37  ;;  %v5038_v60 = vld [vmem:[%s5580_s6 + $0x1] ss:$0 sm:$0xff] }
 0xbb8   :  { %v1624_v8 = vpop.xlane.xlu1 %1623 }
 0xbb9   :  { %v1663_v15 = vadd.f32 1e-05, %v1651_v58  ;;  %v1649_v51 = vsub.f32 %v1637_v39, %v1643_v57  ;;  %v1638_v36 = vmul.f32 0.03125, %v1624_v8  ;;  %v1682_v43 = vmul.f32 %v5038_v60, %v1676_v42 }
 0xbba   :  { %v1657_v58 = vsub.f32 %v4989_v3, %v1609_v54 }
 0xbbb   :  { %4035 = vrsqrt.f32 %v1663_v15  ;;  %v1661_v46 = vadd.f32 1e-05, %v1649_v51  ;;  %v1650_v5 = vsub.f32 %v1638_v36, %v1644_v53  ;;  %v1659_v51 = vsub.f32 %v5002_v38, %v1611_v34 }
 0xbbc   :  { %v1688_v57 = vadd.f32 %v5046_v21, %v1682_v43  ;;  %v1655_v34 = vsub.f32 %v5017_v9, %v1607_v27 }
 0xbbd   :  { %4037 = vrsqrt.f32 %v1661_v46  ;;  %v1662_v10 = vadd.f32 1e-05, %v1650_v5  ;;  %v1656_v46 = vsub.f32 %v5009_v44, %v1608_v52 }
 0xbbe   :  { %vm1694_vm15 = vcmp.ge.f32.partialorder %v1688_v57, 0.0  ;;  %v1700_v5 = vmul.f32 0.01, %v1688_v57 }
 0xbbf   :  { %4039 = vrsqrt.f32 %v1662_v10 }
 0xbc0   :  { %v4032_v49 = vpop.eup %4031 }
 0xbc1   :  { %v1678_v14 = vmul.f32 %v4032_v49, %v1660_v6  ;;  %v1706_v49 = vsel %vm1694_vm15, %v1688_v57, %v1700_v5  ;;  %v5066_v57 = vld [vmem:[%s5577_s3 + $0x18] sm:$0xff] }
 0xbc3   :  { %v1684_v47 = vmul.f32 %v5038_v60, %v1678_v14 }
 0xbc4   :  { %v4034_v28 = vpop.eup %4033 }
 0xbc5   :  { %v1690_v61 = vadd.f32 %v5046_v21, %v1684_v47  ;;  %v1677_v17 = vmul.f32 %v4034_v28, %v1659_v51 }
 0xbc7   :  { %vm1696_vm14 = vcmp.ge.f32.partialorder %v1690_v61, 0.0  ;;  %v1702_v39 = vmul.f32 0.01, %v1690_v61  ;;  %v1683_v8 = vmul.f32 %v5038_v60, %v1677_v17 }
 0xbc8   :  { %v4036_v38 = vpop.eup %4035 }
 0xbc9   :  { %v1708_v53 = vsel %vm1696_vm14, %v1690_v61, %v1702_v39  ;;  %v1689_v15 = vadd.f32 %v5046_v21, %v1683_v8  ;;  %v1675_v36 = vmul.f32 %v4036_v38, %v1657_v58  ;;  %v5073_v58 = vld [vmem:[%s5577_s3 + $0x10] sm:$0xff]  ;;  %v5080_v39 = vld [vmem:[%s5577_s3 + $0x8] sm:$0xff]  ;;  %v5087_v8 = vld [vmem:[%s5577_s3] sm:$0xff] }
 0xbca   :  { %v4038_v4 = vpop.eup %4037  ;;  %3735 = vmatprep.subr.mxu1 %v1708_v53 }
 0xbcb   :  { %3736 = vmatpush3.msra.mxu1 %v1708_v53  ;;  %vm1695_vm0 = vcmp.ge.f32.partialorder %v1689_v15, 0.0  ;;  %v1701_v3 = vmul.f32 0.01, %v1689_v15  ;;  %v1681_v54 = vmul.f32 %v5038_v60, %v1675_v36  ;;  %v1673_v37 = vmul.f32 %v4038_v4, %v1655_v34 }
 0xbcc   :  { %v4040_v10 = vpop.eup %4039 }
 0xbcd   :  { %v1707_v42 = vsel %vm1695_vm0, %v1689_v15, %v1701_v3  ;;  %v1687_v9 = vadd.f32 %v5046_v21, %v1681_v54  ;;  %v1674_v27 = vmul.f32 %v4040_v10, %v1656_v46  ;;  %v1679_v6 = vmul.f32 %v5038_v60, %v1673_v37 }
 0xbce   :  { %3737 = vmatprep.subr.mxu1 %v1707_v42 }
 0xbcf   :  { %3738 = vmatpush3.msra.mxu1 %v1707_v42  ;;  %vm1693_vm2 = vcmp.ge.f32.partialorder %v1687_v9, 0.0  ;;  %v1699_v44 = vmul.f32 0.01, %v1687_v9  ;;  %v1680_v52 = vmul.f32 %v5038_v60, %v1674_v27  ;;  %v1685_v14 = vadd.f32 %v5046_v21, %v1679_v6 }
 0xbd0   :  { %3739 = vmatprep.subr.mxu1 %v1706_v49 }
 0xbd1   :  { %3740 = vmatpush3.msra.mxu1 %v1706_v49  ;;  %v1705_v43 = vsel %vm1693_vm2, %v1687_v9, %v1699_v44  ;;  %v1686_v51 = vadd.f32 %v5046_v21, %v1680_v52  ;;  %v1697_v28 = vmul.f32 0.01, %v1685_v14  ;;  %vm1691_vm4 = vcmp.ge.f32.partialorder %v1685_v14, 0.0 }
 0xbd2   :  { %3741 = vmatprep.subr.mxu1 %v1705_v43 }
 0xbd3   :  { %3742 = vmatpush3.msra.mxu1 %v1705_v43  ;;  %vm1692_vm3 = vcmp.ge.f32.partialorder %v1686_v51, 0.0  ;;  %v1698_v47 = vmul.f32 0.01, %v1686_v51  ;;  %v1703_v17 = vsel %vm1691_vm4, %v1685_v14, %v1697_v28 }
 0xbd5   :  { %v1704_v61 = vsel %vm1692_vm3, %v1686_v51, %v1698_v47 }
 0xbd6   :  { %3743 = vmatprep.subr.mxu1 %v1704_v61 }
 0xbd7   :  { %3744 = vmatpush3.msra.mxu1 %v1704_v61 }
 0xbd8   :  { %3745 = vmatprep.subr.mxu1 %v1703_v17 }
 0xbd9   :  { %3746 = vmatpush3.msra.mxu1 %v1703_v17 }
 0xbda   :  { %3748 = vmatmul.mubr.msk.f32.vlgmr.msra.gmra.mxu1 %vm533_vm8, %v4537_v2  ;;  %3750 = vmatprep.subr.mxu1 %v5066_v57 }
 0xbdb   :  { %3751 = vmatpush3.msra.mxu1 %v5066_v57 }
 0xbdc   :  { %3752 = vmatprep.subr.mxu1 %v5073_v58 }
 0xbdd   :  { %3753 = vmatpush3.msra.mxu1 %v5073_v58 }
 0xbde   :  { %3754 = vmatprep.subr.mxu1 %v5080_v39 }
 0xbdf   :  { %3755 = vmatpush3.msra.mxu1 %v5080_v39 }
 0xbe0   :  { %3756 = vmatprep.subr.mxu1 %v5087_v8 }
 0xbe1   :  { %3757 = vmatpush3.msra.mxu1 %v5087_v8 }
 0xc9a   :  { %v3749_v38 = vpop.f32.mrf.mxu1 }
 0xc9b   :  { %v5095_v15 = vadd.f32 %v3749_v38, %v4784_v30 }
 0xc9c   :  { %v1775_v34 = vpop.f32.mrf.mxu1 }
 0xc9d   :  { %v5092_v53 = vadd.f32 %v1775_v34, %v4781_v48 }
 0xc9f   :  { %3758 = vmatprep.mubr.msk.f32.mxu1 %vm403_vm6, %v5092_v53 }
 0xca0   :  { %3759 = vmatmul.mubr.msk.f32.vlgmr.msra.gmra.mxu1 %vm403_vm6, %v5095_v15 }
 0xca1   :  { %3765 = vmatprep.mubr.msk.f32.mxu1 %vm696_vm1, %v4580_v13 }
 0xd60   :  { %v3760_v36 = vpop.f32.mrf.mxu1 }
 0xd61   :  { %3761 = vmatprep.subr.mxu1 %v3760_v36 }
 0xd62   :  { %v1858_v4 = vpop.f32.mrf.mxu1  ;;  %3762 = vmatpush3.msra.mxu1 %v3760_v36 }
 0xd63   :  { %3763 = vmatprep.subr.mxu1 %v1858_v4 }
 0xd64   :  { %3764 = vmatpush3.msra.mxu1 %v1858_v4 }
 0xd65   :  { %3766 = vmatmul.mubr.msk.f32.vlgmr.msra.gmra.mxu1 %vm696_vm1, %v4589_v22  ;;  %3774 = vmatprep.subr.mxu1 %v4797_v56 }
 0xd66   :  { %3768 = vmatprep.mubr.msk.f32.mxu1 %vm696_vm1, %v4592_v20  ;;  %3775 = vmatpush3.msra.mxu1 %v4797_v56 }
 0xd67   :  { %3776 = vmatprep.subr.mxu1 %v4806_v7 }
 0xd68   :  { %3777 = vmatpush3.msra.mxu1 %v4806_v7 }
 0xd69   :  { %3769 = vmatmul.mubr.msk.f32.gmra.mxu1 %vm696_vm1, %v4604_v25  ;;  %3778 = vmatprep.subr.mxu1 %v4815_v16 }
 0xd6a   :  { %3771 = vmatprep.mubr.msk.f32.mxu1 %vm696_vm1, %v4608_v0  ;;  %3779 = vmatpush3.msra.mxu1 %v4815_v16 }
 0xd6b   :  { %3780 = vmatprep.subr.mxu1 %v4824_v11 }
 0xd6c   :  { %3781 = vmatpush3.msra.mxu1 %v4824_v11 }
 0xd6d   :  { %3772 = vmatmul.mubr.msk.f32.gmra.mxu1 %vm696_vm1, %v4619_v33  ;;  %3782 = vmatprep.subr.mxu1 %v4833_v40 }
 0xd6e   :  { %3783 = vmatpush3.msra.mxu1 %v4833_v40 }
 0xd6f   :  { %3784 = vmatprep.subr.mxu1 %v4840_v29 }
 0xd70   :  { %3785 = vmatpush3.msra.mxu1 %v4840_v29 }
 0xd71   :  { %3786 = vmatprep.subr.mxu1 %v4847_v55 }
 0xd72   :  { %3787 = vmatpush3.msra.mxu1 %v4847_v55 }
 0xd73   :  { %3788 = vmatprep.subr.mxu1 %v4854_v31 }
 0xd74   :  { %3789 = vmatpush3.msra.mxu1 %v4854_v31 }
 0xd75   :  { %3790 = vmatprep.subr.mxu1 %v4861_v50 }
 0xd76   :  { %3791 = vmatpush3.msra.mxu1 %v4861_v50 }
 0xd77   :  { %3792 = vmatprep.subr.mxu1 %v4868_v62 }
 0xd78   :  { %3793 = vmatpush3.msra.mxu1 %v4868_v62 }
 0xd79   :  { %3794 = vmatprep.subr.mxu1 %v4875_v32 }
 0xd7a   :  { %3795 = vmatpush3.msra.mxu1 %v4875_v32 }
 0xd7b   :  { %3796 = vmatprep.subr.mxu1 %v4882_v45 }
 0xd7c   :  { %3797 = vmatpush3.msra.mxu1 %v4882_v45 }
 0xd7d   :  { %3798 = vmatprep.subr.mxu1 %v4889_v63 }
 0xd7e   :  { %3799 = vmatpush3.msra.mxu1 %v4889_v63 }
 0xd7f   :  { %3800 = vmatprep.subr.mxu1 %v4896_v59 }
 0xd80   :  { %3801 = vmatpush3.msra.mxu1 %v4896_v59 }
 0xd81   :  { %3802 = vmatprep.subr.mxu1 %v4903_v1 }
 0xd82   :  { %3803 = vmatpush3.msra.mxu1 %v4903_v1 }
 0xd83   :  { %3804 = vmatprep.subr.mxu1 %v4910_v41 }
 0xd84   :  { %3805 = vmatpush3.msra.mxu1 %v4910_v41 }
 0xe25   :  { %v3767_v48 = vpop.f32.mrf.mxu1 }
 0xe26   :  { %v5146_v30 = vadd.f32 %v3767_v48, %v4252_v19 }
 0xe27   :  { %v1933_v56 = vpop.f32.mrf.mxu1 }
 0xe28   :  { %v5149_v7 = vadd.f32 %v1933_v56, %v4247_v12  ;;  %1964 = vadd.xlane.f32.xlu0 %v5146_v30  ;;  %v1981_v11 = vmul.f32 %v5146_v30, %v5146_v30 }
 0xe29   :  { %v3770_v16 = vpop.f32.mrf.mxu1 }
 0xe2a   :  { %1962 = vadd.xlane.f32.xlu1 %v5149_v7  ;;  %v1980_v40 = vmul.f32 %v5149_v7, %v5149_v7  ;;  %v5158_v55 = vadd.f32 %v3770_v16, %v4250_v18 }
 0xe2b   :  { %v1943_v29 = vpop.f32.mrf.mxu1 }
 0xe2c   :  { %1988 = vadd.xlane.f32.xlu0 %v1981_v11  ;;  %v5161_v31 = vadd.f32 %v1943_v29, %v4256_v23  ;;  %v1983_v62 = vmul.f32 %v5158_v55, %v5158_v55 }
 0xe2d   :  { %v3773_v50 = vpop.f32.mrf.mxu1 }
 0xe2e   :  { %1986 = vadd.xlane.f32.xlu1 %v1980_v40  ;;  %v1982_v32 = vmul.f32 %v5161_v31, %v5161_v31  ;;  %v5170_v63 = vadd.f32 %v3773_v50, %v4258_v24 }
 0xe2f   :  { %v1953_v45 = vpop.f32.mrf.mxu1 }
 0xe30   :  { %1968 = vadd.xlane.f32.xlu0 %v5158_v55  ;;  %v5173_v59 = vadd.f32 %v1953_v45, %v4262_v26  ;;  %v1985_v1 = vmul.f32 %v5170_v63, %v5170_v63 }
 0xe32   :  { %1966 = vadd.xlane.f32.xlu1 %v5161_v31  ;;  %v1984_v41 = vmul.f32 %v5173_v59, %v5173_v59 }
 0xe34   :  { %1992 = vadd.xlane.f32.xlu0 %v1983_v62 }
 0xe36   :  { %1990 = vadd.xlane.f32.xlu1 %v1982_v32 }
 0xe38   :  { %1972 = vadd.xlane.f32.xlu0 %v5170_v63 }
 0xe3a   :  { %1970 = vadd.xlane.f32.xlu1 %v5173_v59 }
 0xe3c   :  { %1996 = vadd.xlane.f32.xlu0 %v1985_v1 }
 0xe3e   :  { %1994 = vadd.xlane.f32.xlu1 %v1984_v41 }
 0xeb1   :  { %v1965_v46 = vpop.xlane.xlu0 %1964 }
 0xeb2   :  { %v1975_v5 = vmul.f32 0.0078125, %v1965_v46 }
 0xeb3   :  { %v1963_v3 = vpop.xlane.xlu1 %1962 }
 0xeb4   :  { %v1974_v54 = vmul.f32 0.0078125, %v1963_v3  ;;  %v2005_v10 = vmul.f32 %v1975_v5, %v1975_v5  ;;  %v2017_v46 = vsub.f32 %v5146_v30, %v1975_v5 }
 0xeb5   :  { %v1989_v37 = vpop.xlane.xlu0 %1988 }
 0xeb6   :  { %v1999_v42 = vmul.f32 0.0078125, %v1989_v37  ;;  %v2004_v27 = vmul.f32 %v1974_v54, %v1974_v54 }
 0xeb7   :  { %v1987_v9 = vpop.xlane.xlu1 %1986 }
 0xeb8   :  { %v2011_v6 = vsub.f32 %v1999_v42, %v2005_v10  ;;  %v1998_v49 = vmul.f32 0.0078125, %v1987_v9  ;;  %v2016_v9 = vsub.f32 %v5149_v7, %v1974_v54 }
 0xeb9   :  { %v1969_v44 = vpop.xlane.xlu0 %1968 }
 0xeba   :  { %v2023_v52 = vadd.f32 1e-05, %v2011_v6  ;;  %v2010_v14 = vsub.f32 %v1998_v49, %v2004_v27  ;;  %v1977_v43 = vmul.f32 0.0078125, %v1969_v44 }
 0xebb   :  { %v1967_v51 = vpop.xlane.xlu1 %1966 }
 0xebc   :  { %4041 = vrsqrt.f32 %v2023_v52  ;;  %v2022_v47 = vadd.f32 1e-05, %v2010_v14  ;;  %v1976_v28 = vmul.f32 0.0078125, %v1967_v51  ;;  %v2007_v17 = vmul.f32 %v1977_v43, %v1977_v43 }
 0xebd   :  { %v1993_v61 = vpop.xlane.xlu0 %1992  ;;  %v2019_v5 = vsub.f32 %v5158_v55, %v1977_v43 }
 0xebe   :  { %4043 = vrsqrt.f32 %v2022_v47  ;;  %v2001_v38 = vmul.f32 0.0078125, %v1993_v61  ;;  %v2006_v36 = vmul.f32 %v1976_v28, %v1976_v28  ;;  %v5600_v61 = vld [vmem:[#allocation8_spill] sm:$0xff]  ;;  %v2018_v7 = vsub.f32 %v5161_v31, %v1976_v28 }
 0xebf   :  { %v1991_v34 = vpop.xlane.xlu1 %1990 }
 0xec0   :  { %v2013_v4 = vsub.f32 %v2001_v38, %v2007_v17  ;;  %v2000_v48 = vmul.f32 0.0078125, %v1991_v34 }
 0xec1   :  { %v1973_v56 = vpop.xlane.xlu0 %1972 }
 0xec2   :  { %v2025_v16 = vadd.f32 1e-05, %v2013_v4  ;;  %v2012_v11 = vsub.f32 %v2000_v48, %v2006_v36  ;;  %v1979_v40 = vmul.f32 0.0078125, %v1973_v56 }
 0xec3   :  { %v1971_v29 = vpop.xlane.xlu1 %1970 }
 0xec4   :  { %4045 = vrsqrt.f32 %v2025_v16  ;;  %v2024_v50 = vadd.f32 1e-05, %v2012_v11  ;;  %v1978_v62 = vmul.f32 0.0078125, %v1971_v29  ;;  %v2009_v45 = vmul.f32 %v1979_v40, %v1979_v40 }
 0xec5   :  { %v1997_v32 = vpop.xlane.xlu0 %1996  ;;  %v2021_v29 = vsub.f32 %v5170_v63, %v1979_v40 }
 0xec6   :  { %4047 = vrsqrt.f32 %v2024_v50  ;;  %v2003_v1 = vmul.f32 0.0078125, %v1997_v32  ;;  %v2008_v3 = vmul.f32 %v1978_v62, %v1978_v62  ;;  %v2020_v50 = vsub.f32 %v5173_v59, %v1978_v62 }
 0xec7   :  { %v1995_v41 = vpop.xlane.xlu1 %1994 }
 0xec8   :  { %v2015_v37 = vsub.f32 %v2003_v1, %v2009_v45  ;;  %v2002_v10 = vmul.f32 0.0078125, %v1995_v41 }
 0xec9   :  { %v4042_v42 = vpop.eup %4041 }
 0xeca   :  { %v2027_v27 = vadd.f32 1e-05, %v2015_v37  ;;  %v2014_v6 = vsub.f32 %v2002_v10, %v2008_v3  ;;  %v2035_v49 = vmul.f32 %v4042_v42, %v2017_v46 }
 0xecb   :  { %v4044_v44 = vpop.eup %4043 }
 0xecc   :  { %4049 = vrsqrt.f32 %v2027_v27  ;;  %v2026_v52 = vadd.f32 1e-05, %v2014_v6  ;;  %v2034_v14 = vmul.f32 %v4044_v44, %v2016_v9  ;;  %v2041_v51 = vmul.f32 %v4955_v35, %v2035_v49  ;;  %v5601_v6 = vld [vmem:[#allocation6_spill] sm:$0xff] }
 0xece   :  { %4051 = vrsqrt.f32 %v2026_v52  ;;  %v2040_v47 = vmul.f32 %v4955_v35, %v2034_v14  ;;  %v2047_v30 = vadd.f32 %v5600_v61, %v2041_v51  ;;  %v5602_v14 = vld [vmem:[#allocation9_spill] sm:$0xff] }
 0xed0   :  { %v2046_v17 = vadd.f32 %v5600_v61, %v2040_v47  ;;  %v2059_v54 = vmul.f32 0.01, %v2047_v30  ;;  %vm2053_vm7 = vcmp.ge.f32.partialorder %v2047_v30, 0.0 }
 0xed1   :  { %v4046_v38 = vpop.eup %4045 }
 0xed2   :  { %vm2052_vm5 = vcmp.ge.f32.partialorder %v2046_v17, 0.0  ;;  %v2058_v34 = vmul.f32 0.01, %v2046_v17  ;;  %v2037_v36 = vmul.f32 %v4046_v38, %v2019_v5  ;;  %v2065_v11 = vsel %vm2053_vm7, %v2047_v30, %v2059_v54 }
 0xed3   :  { %v4048_v4 = vpop.eup %4047 }
 0xed4   :  { %v2064_v48 = vsel %vm2052_vm5, %v2046_v17, %v2058_v34  ;;  %v2036_v56 = vmul.f32 %v4048_v4, %v2018_v7  ;;  %v2043_v16 = vmul.f32 %v4955_v35, %v2037_v36 }
 0xed5   :  { %3806 = vmatprep.mubr.f32.mxu1 %v2064_v48 }
 0xed6   :  { %3807 = vmatmul.mubr.f32.vlgmr.msra.gmra.mxu1 %v2065_v11  ;;  %v2042_v55 = vmul.f32 %v4955_v35, %v2036_v56  ;;  %v2049_v43 = vadd.f32 %v5600_v61, %v2043_v16 }
 0xed8   :  { %v2048_v31 = vadd.f32 %v5600_v61, %v2042_v55  ;;  %v2061_v32 = vmul.f32 0.01, %v2049_v43  ;;  %vm2055_vm10 = vcmp.ge.f32.partialorder %v2049_v43, 0.0 }
 0xed9   :  { %v4050_v28 = vpop.eup %4049 }
 0xeda   :  { %vm2054_vm9 = vcmp.ge.f32.partialorder %v2048_v31, 0.0  ;;  %v2060_v45 = vmul.f32 0.01, %v2048_v31  ;;  %v2039_v1 = vmul.f32 %v4050_v28, %v2021_v29  ;;  %v2067_v10 = vsel %vm2055_vm10, %v2049_v43, %v2061_v32 }
 0xedb   :  { %v4052_v41 = vpop.eup %4051 }
 0xedc   :  { %v2066_v46 = vsel %vm2054_vm9, %v2048_v31, %v2060_v45  ;;  %v2038_v3 = vmul.f32 %v4052_v41, %v2020_v50  ;;  %v2045_v37 = vmul.f32 %v4955_v35, %v2039_v1 }
 0xedd   :  { %3809 = vmatprep.mubr.f32.mxu1 %v2066_v46 }
 0xede   :  { %3810 = vmatmul.mubr.f32.gmra.mxu1 %v2067_v10  ;;  %v2044_v63 = vmul.f32 %v4955_v35, %v2038_v3  ;;  %v2051_v40 = vadd.f32 %v5600_v61, %v2045_v37 }
 0xee0   :  { %v2050_v42 = vadd.f32 %v5600_v61, %v2044_v63  ;;  %v2063_v59 = vmul.f32 0.01, %v2051_v40  ;;  %vm2057_vm12 = vcmp.ge.f32.partialorder %v2051_v40, 0.0 }
 0xee2   :  { %vm2056_vm11 = vcmp.ge.f32.partialorder %v2050_v42, 0.0  ;;  %v2062_v62 = vmul.f32 0.01, %v2050_v42  ;;  %v2069_v27 = vsel %vm2057_vm12, %v2051_v40, %v2063_v59 }
 0xee4   :  { %v2068_v9 = vsel %vm2056_vm11, %v2050_v42, %v2062_v62 }
 0xee5   :  { %3812 = vmatprep.mubr.f32.mxu1 %v2068_v9 }
 0xee6   :  { %3813 = vmatmul.mubr.f32.gmra.mxu1 %v2069_v27 }
 0xee7   :  { %3907 = vmatprep.mubr.msk.f32.mxu1 %vm533_vm8, %v5601_v6 }
 0xf96   :  { %v3808_v49 = vpop.f32.mrf.mxu1 }
 0xf97   :  { %v5225_v48 = vadd.f32 %v5602_v14, %v3808_v49 }
 0xf98   :  { %v2136_v44 = vpop.f32.mrf.mxu1 }
 0xf99   :  { %v5233_v55 = vadd.f32 %v5602_v14, %v2136_v44  ;;  %v2168_v43 = vsel %vm403_vm6, %v5225_v48, 0.0  ;;  %v2190_v45 = vmul.f32 %v5225_v48, %v5225_v48 }
 0xf9b   :  { %v2165_v28 = vsel %vm403_vm6, %v5233_v55, 0.0  ;;  %v2189_v50 = vmul.f32 %v5233_v55, %v5233_v55  ;;  %v2198_v41 = vsel %vm403_vm6, %v2190_v45, 0.0 }
 0xf9d   :  { %v2195_v1 = vsel %vm403_vm6, %v2189_v50, 0.0 }
 0xf9e   :  { %v3811_v52 = vpop.f32.mrf.mxu1 }
 0xf9f   :  { %v5202_v35 = vadd.f32 %v5602_v14, %v3811_v52 }
 0xfa0   :  { %v2146_v51 = vpop.f32.mrf.mxu1 }
 0xfa1   :  { %v5205_v47 = vadd.f32 %v5602_v14, %v2146_v51  ;;  %v2174_v61 = vsel %vm403_vm6, %v5202_v35, 0.0  ;;  %v2192_v30 = vmul.f32 %v5202_v35, %v5202_v35 }
 0xfa2   :  { %2175 = vadd.xlane.f32.xlu0 %v2174_v61 }
 0xfa3   :  { %v2204_v5 = vsel %vm403_vm6, %v2192_v30, 0.0  ;;  %v2171_v17 = vsel %vm403_vm6, %v5205_v47, 0.0  ;;  %v2191_v31 = vmul.f32 %v5205_v47, %v5205_v47 }
 0xfa4   :  { %2205 = vadd.xlane.f32.xlu1 %v2204_v5 }
 0xfa5   :  { %v2201_v32 = vsel %vm403_vm6, %v2191_v31, 0.0 }
 0xfa6   :  { %2172 = vadd.xlane.f32.xlu0 %v2171_v17  ;;  %v3814_v38 = vpop.f32.mrf.mxu1 }
 0xfa7   :  { %v5215_v7 = vadd.f32 %v5602_v14, %v3814_v38 }
 0xfa8   :  { %v2156_v54 = vpop.f32.mrf.mxu1 }
 0xfa9   :  { %v5218_v34 = vadd.f32 %v5602_v14, %v2156_v54  ;;  %v2180_v36 = vsel %vm403_vm6, %v5215_v7, 0.0  ;;  %v2194_v4 = vmul.f32 %v5215_v7, %v5215_v7 }
 0xfaa   :  { %2181 = vadd.xlane.f32.xlu1 %v2180_v36 }
 0xfab   :  { %v2177_v56 = vsel %vm403_vm6, %v5218_v34, 0.0  ;;  %v2210_v16 = vsel %vm403_vm6, %v2194_v4, 0.0  ;;  %v2193_v11 = vmul.f32 %v5218_v34, %v5218_v34 }
 0xfac   :  { %2178 = vadd.xlane.f32.xlu0 %v2177_v56 }
 0xfad   :  { %v2207_v29 = vsel %vm403_vm6, %v2193_v11, 0.0 }
 0xfae   :  { %2211 = vadd.xlane.f32.xlu1 %v2210_v16 }
 0xfb0   :  { %2169 = vadd.xlane.f32.xlu0 %v2168_v43 }
 0xfb2   :  { %2208 = vadd.xlane.f32.xlu1 %v2207_v29 }
 0xfb4   :  { %2166 = vadd.xlane.f32.xlu0 %v2165_v28 }
 0xfb6   :  { %2202 = vadd.xlane.f32.xlu1 %v2201_v32 }
 0xfb8   :  { %2196 = vadd.xlane.f32.xlu0 %v2195_v1 }
 0xfba   :  { %2199 = vadd.xlane.f32.xlu1 %v2198_v41 }
0x102b   :  { %v2176_v46 = vpop.xlane.xlu0 %2175 }
0x102c   :  { %v2186_v3 = vmul.f32 0.03125, %v2176_v46 }
0x102d   :  { %v2206_v37 = vpop.xlane.xlu1 %2205 }
0x102e   :  { %v2222_v10 = vmul.f32 %v2186_v3, %v2186_v3  ;;  %v2216_v63 = vmul.f32 0.03125, %v2206_v37 }
0x102f   :  { %v2173_v42 = vpop.xlane.xlu0 %2172 }
0x1030   :  { %v2228_v40 = vsub.f32 %v2216_v63, %v2222_v10  ;;  %v2185_v30 = vmul.f32 0.03125, %v2173_v42  ;;  %v2234_v42 = vsub.f32 %v5202_v35, %v2186_v3 }
0x1032   :  { %v2240_v9 = vadd.f32 1e-05, %v2228_v40  ;;  %v2221_v16 = vmul.f32 %v2185_v30, %v2185_v30  ;;  %v2233_v3 = vsub.f32 %v5205_v47, %v2185_v30 }
0x1033   :  { %v2182_v59 = vpop.xlane.xlu1 %2181 }
0x1034   :  { %v2188_v62 = vmul.f32 0.03125, %v2182_v59  ;;  %4053 = vrsqrt.f32 %v2240_v9 }
0x1035   :  { %v2179_v27 = vpop.xlane.xlu0 %2178 }
0x1036   :  { %v2224_v49 = vmul.f32 %v2188_v62, %v2188_v62  ;;  %v2187_v44 = vmul.f32 0.03125, %v2179_v27  ;;  %v2236_v27 = vsub.f32 %v5215_v7, %v2188_v62 }
0x1037   :  { %v2212_v6 = vpop.xlane.xlu1 %2211 }
0x1038   :  { %v2218_v52 = vmul.f32 0.03125, %v2212_v6  ;;  %v2223_v5 = vmul.f32 %v2187_v44, %v2187_v44 }
0x1039   :  { %v2170_v14 = vpop.xlane.xlu0 %2169 }
0x103a   :  { %v2230_v51 = vsub.f32 %v2218_v52, %v2224_v49  ;;  %v2184_v11 = vmul.f32 0.03125, %v2170_v14  ;;  %v2235_v14 = vsub.f32 %v5218_v34, %v2187_v44 }
0x103b   :  { %v2209_v61 = vpop.xlane.xlu1 %2208 }
0x103c   :  { %v2242_v17 = vadd.f32 1e-05, %v2230_v51  ;;  %v2217_v38 = vmul.f32 0.03125, %v2209_v61  ;;  %v2220_v1 = vmul.f32 %v2184_v11, %v2184_v11 }
0x103d   :  { %v2167_v54 = vpop.xlane.xlu0 %2166 }
0x103e   :  { %4055 = vrsqrt.f32 %v2242_v17  ;;  %v2229_v36 = vsub.f32 %v2217_v38, %v2223_v5  ;;  %v2183_v4 = vmul.f32 0.03125, %v2167_v54 }
0x103f   :  { %v2203_v56 = vpop.xlane.xlu1 %2202 }
0x1040   :  { %v2241_v43 = vadd.f32 1e-05, %v2229_v36  ;;  %v2215_v29 = vmul.f32 0.03125, %v2203_v56  ;;  %v2219_v28 = vmul.f32 %v2183_v4, %v2183_v4  ;;  %v2231_v54 = vsub.f32 %v5233_v55, %v2183_v4 }
0x1041   :  { %v2197_v31 = vpop.xlane.xlu0 %2196  ;;  %v4054_v10 = vpop.eup %4053 }
0x1042   :  { %4057 = vrsqrt.f32 %v2241_v43  ;;  %v2227_v50 = vsub.f32 %v2215_v29, %v2221_v16  ;;  %v2213_v32 = vmul.f32 0.03125, %v2197_v31  ;;  %v2252_v9 = vmul.f32 %v4054_v10, %v2234_v42 }
0x1043   :  { %v2200_v45 = vpop.xlane.xlu1 %2199  ;;  %v2232_v16 = vsub.f32 %v5225_v48, %v2184_v11 }
0x1044   :  { %v2239_v41 = vadd.f32 1e-05, %v2227_v50  ;;  %v2225_v46 = vsub.f32 %v2213_v32, %v2219_v28  ;;  %v2214_v37 = vmul.f32 0.03125, %v2200_v45  ;;  %v2258_v52 = vmul.f32 %v5038_v60, %v2252_v9  ;;  %v4131_v9 = vld [vmem:[%s5579_s5 + $0x20] sm:$0xff] }
0x1046   :  { %4059 = vrsqrt.f32 %v2239_v41  ;;  %v2237_v63 = vadd.f32 1e-05, %v2225_v46  ;;  %v2226_v40 = vsub.f32 %v2214_v37, %v2220_v1  ;;  %v2264_v35 = vadd.f32 %v5046_v21, %v2258_v52  ;;  %v4135_v52 = vld [vmem:[%s5579_s5] sm:$0xff] }
0x1048   :  { %4061 = vrsqrt.f32 %v2237_v63  ;;  %v2238_v59 = vadd.f32 1e-05, %v2226_v40  ;;  %vm2270_vm14 = vcmp.ge.f32.partialorder %v2264_v35, 0.0  ;;  %v2276_v43 = vmul.f32 0.01, %v2264_v35 }
0x104a   :  { %4063 = vrsqrt.f32 %v2238_v59  ;;  %v2282_v32 = vsel %vm2270_vm14, %v2264_v35, %v2276_v43  ;;  %v4130_v59 = vld [vmem:[%s5579_s5 + $0x28] sm:$0xff] }
0x104b   :  { %v4056_v6 = vpop.eup %4055 }
0x104c   :  { %v2254_v49 = vmul.f32 %v4056_v6, %v2236_v27  ;;  %v4132_v27 = vld [vmem:[%s5579_s5 + $0x18] sm:$0xff]  ;;  %v4133_v6 = vld [vmem:[%s5579_s5 + $0x10] sm:$0xff] }
0x104e   :  { %v2260_v51 = vmul.f32 %v5038_v60, %v2254_v49  ;;  %v4134_v49 = vld [vmem:[%s5579_s5 + $0x8] sm:$0xff] }
0x104f   :  { %v4058_v61 = vpop.eup %4057 }
0x1050   :  { %v2266_v5 = vadd.f32 %v5046_v21, %v2260_v51  ;;  %v2253_v17 = vmul.f32 %v4058_v61, %v2235_v14  ;;  %v5603_v14 = vmov 0.0  }
0x1052   :  { %vm2272_vm13 = vcmp.ge.f32.partialorder %v2266_v5, 0.0  ;;  %v2278_v38 = vmul.f32 0.01, %v2266_v5  ;;  %v2259_v7 = vmul.f32 %v5038_v60, %v2253_v17 }
0x1053   :  { %v4060_v62 = vpop.eup %4059 }
0x1054   :  { %v2284_v36 = vsel %vm2272_vm13, %v2266_v5, %v2278_v38  ;;  %v2265_v34 = vadd.f32 %v5046_v21, %v2259_v7  ;;  %v2251_v44 = vmul.f32 %v4060_v62, %v2233_v3 }
0x1055   :  { %v4062_v56 = vpop.eup %4061  ;;  %3815 = vmatprep.subr.mxu0 %v2284_v36 }
0x1056   :  { %3816 = vmatpush3.msra.mxu0 %v2284_v36  ;;  %vm2271_vm15 = vcmp.ge.f32.partialorder %v2265_v34, 0.0  ;;  %v2277_v47 = vmul.f32 0.01, %v2265_v34  ;;  %v2257_v30 = vmul.f32 %v5038_v60, %v2251_v44  ;;  %v2249_v29 = vmul.f32 %v4062_v56, %v2231_v54 }
0x1057   :  { %v4064_v31 = vpop.eup %4063 }
0x1058   :  { %v2283_v28 = vsel %vm2271_vm15, %v2265_v34, %v2277_v47  ;;  %v2263_v55 = vadd.f32 %v5046_v21, %v2257_v30  ;;  %v2250_v4 = vmul.f32 %v4064_v31, %v2232_v16  ;;  %v2255_v50 = vmul.f32 %v5038_v60, %v2249_v29 }
0x1059   :  { %3817 = vmatprep.subr.mxu0 %v2283_v28 }
0x105a   :  { %3818 = vmatpush3.msra.mxu0 %v2283_v28  ;;  %vm2269_vm0 = vcmp.ge.f32.partialorder %v2263_v55, 0.0  ;;  %v2275_v48 = vmul.f32 0.01, %v2263_v55  ;;  %v2256_v11 = vmul.f32 %v5038_v60, %v2250_v4  ;;  %v2261_v45 = vadd.f32 %v5046_v21, %v2255_v50 }
0x105b   :  { %3819 = vmatprep.subr.mxu0 %v2282_v32 }
0x105c   :  { %3820 = vmatpush3.msra.mxu0 %v2282_v32  ;;  %v2281_v1 = vsel %vm2269_vm0, %v2263_v55, %v2275_v48  ;;  %v2262_v41 = vadd.f32 %v5046_v21, %v2256_v11  ;;  %v2273_v37 = vmul.f32 0.01, %v2261_v45  ;;  %vm2267_vm3 = vcmp.ge.f32.partialorder %v2261_v45, 0.0 }
0x105d   :  { %3821 = vmatprep.subr.mxu0 %v2281_v1 }
0x105e   :  { %3822 = vmatpush3.msra.mxu0 %v2281_v1  ;;  %vm2268_vm2 = vcmp.ge.f32.partialorder %v2262_v41, 0.0  ;;  %v2274_v46 = vmul.f32 0.01, %v2262_v41  ;;  %v2279_v63 = vsel %vm2267_vm3, %v2261_v45, %v2273_v37  ;;  %vm4166_vm3 = vmmov 0  }
0x1060   :  { %v2280_v10 = vsel %vm2268_vm2, %v2262_v41, %v2274_v46 }
0x1061   :  { %3823 = vmatprep.subr.mxu0 %v2280_v10 }
0x1062   :  { %3824 = vmatpush3.msra.mxu0 %v2280_v10 }
0x1063   :  { %3825 = vmatprep.subr.mxu0 %v2279_v63 }
0x1064   :  { %3826 = vmatpush3.msra.mxu0 %v2279_v63 }
0x1065   :  { %3828 = vmatmul.mubr.msk.f32.vlgmr.msra.gmra.mxu0 %vm533_vm8, %v4537_v2  ;;  %3830 = vmatprep.subr.mxu0 %v5066_v57 }
0x1066   :  { %3831 = vmatpush3.msra.mxu0 %v5066_v57 }
0x1067   :  { %3832 = vmatprep.subr.mxu0 %v5073_v58 }
0x1068   :  { %3833 = vmatpush3.msra.mxu0 %v5073_v58 }
0x1069   :  { %3834 = vmatprep.subr.mxu0 %v5080_v39 }
0x106a   :  { %3835 = vmatpush3.msra.mxu0 %v5080_v39  ;;  %v4120_v39 = vld [vmem:[%s5579_s5 + $0x78] sm:$0xff] }
0x106b   :  { %3836 = vmatprep.subr.mxu0 %v5087_v8 }
0x106c   :  { %3837 = vmatpush3.msra.mxu0 %v5087_v8  ;;  %v4126_v8 = vld [vmem:[%s5579_s5 + $0x48] sm:$0xff] }
0x1125   :  { %v3829_v60 = vpop.f32.mrf.mxu0 }
0x1126   :  { %v5281_v42 = vadd.f32 %v3829_v60, %v5095_v15  ;;  %v4129_v15 = vld [vmem:[%s5579_s5 + $0x30] sm:$0xff] }
0x1127   :  { %v2351_v21 = vpop.f32.mrf.mxu0 }
0x1128   :  { %v5278_v40 = vadd.f32 %v2351_v21, %v5092_v53  ;;  %v4128_v53 = vld [vmem:[%s5579_s5 + $0x38] sm:$0xff] }
0x112a   :  { %3838 = vmatprep.mubr.msk.f32.mxu0 %vm403_vm6, %v5278_v40 }
0x112b   :  { %3839 = vmatmul.mubr.msk.f32.vlgmr.msra.gmra.mxu0 %vm403_vm6, %v5281_v42 }
0x112c   :  { %3845 = vmatprep.mubr.msk.f32.mxu0 %vm696_vm1, %v4580_v13  ;;  %v4121_v13 = vld [vmem:[%s5579_s5 + $0x70] sm:$0xff] }
0x11eb   :  { %v3840_v57 = vpop.f32.mrf.mxu0 }
0x11ec   :  { %3841 = vmatprep.subr.mxu0 %v3840_v57 }
0x11ed   :  { %v2434_v58 = vpop.f32.mrf.mxu0  ;;  %3842 = vmatpush3.msra.mxu0 %v3840_v57 }
0x11ee   :  { %3843 = vmatprep.subr.mxu0 %v2434_v58 }
0x11ef   :  { %3844 = vmatpush3.msra.mxu0 %v2434_v58 }
0x11f0   :  { %3846 = vmatmul.mubr.msk.f32.vlgmr.msra.gmra.mxu0 %vm696_vm1, %v4589_v22  ;;  %3854 = vmatprep.subr.mxu0 %v4120_v39  ;;  %v4122_v22 = vld [vmem:[%s5579_s5 + $0x68] sm:$0xff] }
0x11f1   :  { %3848 = vmatprep.mubr.msk.f32.mxu0 %vm696_vm1, %v4592_v20  ;;  %3855 = vmatpush3.msra.mxu0 %v4120_v39  ;;  %v4123_v20 = vld [vmem:[%s5579_s5 + $0x60] sm:$0xff] }
0x11f2   :  { %3856 = vmatprep.subr.mxu0 %v4121_v13 }
0x11f3   :  { %3857 = vmatpush3.msra.mxu0 %v4121_v13 }
0x11f4   :  { %3849 = vmatmul.mubr.msk.f32.gmra.mxu0 %vm696_vm1, %v4604_v25  ;;  %3858 = vmatprep.subr.mxu0 %v4122_v22  ;;  %v4124_v25 = vld [vmem:[%s5579_s5 + $0x58] sm:$0xff] }
0x11f5   :  { %3851 = vmatprep.mubr.msk.f32.mxu0 %vm696_vm1, %v4608_v0  ;;  %3859 = vmatpush3.msra.mxu0 %v4122_v22  ;;  %v4125_v0 = vld [vmem:[%s5579_s5 + $0x50] sm:$0xff] }
0x11f6   :  { %3860 = vmatprep.subr.mxu0 %v4123_v20 }
0x11f7   :  { %3861 = vmatpush3.msra.mxu0 %v4123_v20 }
0x11f8   :  { %3852 = vmatmul.mubr.msk.f32.gmra.mxu0 %vm696_vm1, %v4619_v33  ;;  %3862 = vmatprep.subr.mxu0 %v4124_v25  ;;  %v4127_v33 = vld [vmem:[%s5579_s5 + $0x40] sm:$0xff] }
0x11f9   :  { %3863 = vmatpush3.msra.mxu0 %v4124_v25 }
0x11fa   :  { %3864 = vmatprep.subr.mxu0 %v4125_v0 }
0x11fb   :  { %3865 = vmatpush3.msra.mxu0 %v4125_v0 }
0x11fc   :  { %3866 = vmatprep.subr.mxu0 %v4126_v8 }
0x11fd   :  { %3867 = vmatpush3.msra.mxu0 %v4126_v8 }
0x11fe   :  { %3868 = vmatprep.subr.mxu0 %v4127_v33 }
0x11ff   :  { %3869 = vmatpush3.msra.mxu0 %v4127_v33 }
0x1200   :  { %3870 = vmatprep.subr.mxu0 %v4128_v53 }
0x1201   :  { %3871 = vmatpush3.msra.mxu0 %v4128_v53 }
0x1202   :  { %3872 = vmatprep.subr.mxu0 %v4129_v15 }
0x1203   :  { %3873 = vmatpush3.msra.mxu0 %v4129_v15 }
0x1204   :  { %3874 = vmatprep.subr.mxu0 %v4130_v59 }
0x1205   :  { %3875 = vmatpush3.msra.mxu0 %v4130_v59 }
0x1206   :  { %3876 = vmatprep.subr.mxu0 %v4131_v9 }
0x1207   :  { %3877 = vmatpush3.msra.mxu0 %v4131_v9 }
0x1208   :  { %3878 = vmatprep.subr.mxu0 %v4132_v27 }
0x1209   :  { %3879 = vmatpush3.msra.mxu0 %v4132_v27 }
0x120a   :  { %3880 = vmatprep.subr.mxu0 %v4133_v6 }
0x120b   :  { %3881 = vmatpush3.msra.mxu0 %v4133_v6 }
0x120c   :  { %3882 = vmatprep.subr.mxu0 %v4134_v49 }
0x120d   :  { %3883 = vmatpush3.msra.mxu0 %v4134_v49 }
0x120e   :  { %3884 = vmatprep.subr.mxu0 %v4135_v52 }
0x120f   :  { %3885 = vmatpush3.msra.mxu0 %v4135_v52 }
0x1210   :  { %3917 = vmatprep.subr.mxu0 %v5603_v14 }
0x12b0   :  { %v3847_v51 = vpop.f32.mrf.mxu0 }
0x12b1   :  { %v5349_v61 = vadd.f32 %v3847_v51, %v4252_v19 }
0x12b2   :  { %v2509_v5 = vpop.f32.mrf.mxu0 }
0x12b3   :  { %v5352_v17 = vadd.f32 %v2509_v5, %v4247_v12  ;;  %2540 = vadd.xlane.f32.xlu0 %v5349_v61  ;;  %v2557_v3 = vmul.f32 %v5349_v61, %v5349_v61 }
0x12b4   :  { %v3850_v35 = vpop.f32.mrf.mxu0 }
0x12b5   :  { %2538 = vadd.xlane.f32.xlu1 %v5352_v17  ;;  %v2556_v38 = vmul.f32 %v5352_v17, %v5352_v17  ;;  %v5361_v19 = vadd.f32 %v3850_v35, %v4250_v18 }
0x12b6   :  { %v2519_v7 = vpop.f32.mrf.mxu0 }
0x12b7   :  { %2564 = vadd.xlane.f32.xlu0 %v2557_v3  ;;  %v5364_v12 = vadd.f32 %v2519_v7, %v4256_v23  ;;  %v2559_v54 = vmul.f32 %v5361_v19, %v5361_v19 }
0x12b8   :  { %v3853_v62 = vpop.f32.mrf.mxu0 }
0x12b9   :  { %2562 = vadd.xlane.f32.xlu1 %v2556_v38  ;;  %v2558_v36 = vmul.f32 %v5364_v12, %v5364_v12  ;;  %v5373_v18 = vadd.f32 %v3853_v62, %v4258_v24  ;;  %v4136_v62 = vld [vmem:[%s5578_s4 + $0x2] ss:$0 sm:$0xff] }
0x12ba   :  { %v2529_v34 = vpop.f32.mrf.mxu0 }
0x12bb   :  { %2544 = vadd.xlane.f32.xlu0 %v5361_v19  ;;  %v5376_v23 = vadd.f32 %v2529_v34, %v4262_v26  ;;  %v2561_v44 = vmul.f32 %v5373_v18, %v5373_v18 }
0x12bd   :  { %2542 = vadd.xlane.f32.xlu1 %v5364_v12  ;;  %v2560_v56 = vmul.f32 %v5376_v23, %v5376_v23 }
0x12bf   :  { %2568 = vadd.xlane.f32.xlu0 %v2559_v54 }
0x12c1   :  { %2566 = vadd.xlane.f32.xlu1 %v2558_v36  ;;  %v4137_v36 = vld [vmem:[%s5578_s4 + $0x3] ss:$0 sm:$0xff] }
0x12c3   :  { %2548 = vadd.xlane.f32.xlu0 %v5373_v18 }
0x12c5   :  { %2546 = vadd.xlane.f32.xlu1 %v5376_v23 }
0x12c7   :  { %2572 = vadd.xlane.f32.xlu0 %v2561_v44 }
0x12c9   :  { %2570 = vadd.xlane.f32.xlu1 %v2560_v56 }
0x133c   :  { %v2541_v16 = vpop.xlane.xlu0 %2540 }
0x133d   :  { %v2551_v43 = vmul.f32 0.0078125, %v2541_v16 }
0x133e   :  { %v2539_v24 = vpop.xlane.xlu1 %2538 }
0x133f   :  { %v2550_v47 = vmul.f32 0.0078125, %v2539_v24  ;;  %v2581_v29 = vmul.f32 %v2551_v43, %v2551_v43  ;;  %v2593_v59 = vsub.f32 %v5349_v61, %v2551_v43 }
0x1340   :  { %v2565_v30 = vpop.xlane.xlu0 %2564 }
0x1341   :  { %v2575_v26 = vmul.f32 0.0078125, %v2565_v30  ;;  %v2580_v28 = vmul.f32 %v2550_v47, %v2550_v47  ;;  %v2592_v52 = vsub.f32 %v5352_v17, %v2550_v47 }
0x1342   :  { %v2563_v31 = vpop.xlane.xlu1 %2562 }
0x1343   :  { %v2587_v55 = vsub.f32 %v2575_v26, %v2581_v29  ;;  %v2574_v4 = vmul.f32 0.0078125, %v2563_v31 }
0x1344   :  { %v2545_v50 = vpop.xlane.xlu0 %2544 }
0x1345   :  { %v2599_v32 = vadd.f32 1e-05, %v2587_v55  ;;  %v2586_v48 = vsub.f32 %v2574_v4, %v2580_v28  ;;  %v2553_v11 = vmul.f32 0.0078125, %v2545_v50 }
0x1346   :  { %v2543_v45 = vpop.xlane.xlu1 %2542 }
0x1347   :  { %4065 = vrsqrt.f32 %v2599_v32  ;;  %v2598_v1 = vadd.f32 1e-05, %v2586_v48  ;;  %v2552_v41 = vmul.f32 0.0078125, %v2543_v45  ;;  %v2583_v37 = vmul.f32 %v2553_v11, %v2553_v11 }
0x1348   :  { %v2569_v46 = vpop.xlane.xlu0 %2568  ;;  %v2595_v17 = vsub.f32 %v5361_v19, %v2553_v11 }
0x1349   :  { %4067 = vrsqrt.f32 %v2598_v1  ;;  %v2577_v10 = vmul.f32 0.0078125, %v2569_v46  ;;  %v2582_v60 = vmul.f32 %v2552_v41, %v2552_v41  ;;  %v2594_v16 = vsub.f32 %v5364_v12, %v2552_v41 }
0x134a   :  { %v2567_v63 = vpop.xlane.xlu1 %2566 }
0x134b   :  { %v2589_v21 = vsub.f32 %v2577_v10, %v2583_v37  ;;  %v2576_v57 = vmul.f32 0.0078125, %v2567_v63 }
0x134c   :  { %v2549_v58 = vpop.xlane.xlu0 %2548 }
0x134d   :  { %v2601_v39 = vadd.f32 1e-05, %v2589_v21  ;;  %v2588_v13 = vsub.f32 %v2576_v57, %v2582_v60  ;;  %v2555_v22 = vmul.f32 0.0078125, %v2549_v58 }
0x134e   :  { %v2547_v20 = vpop.xlane.xlu1 %2546 }
0x134f   :  { %4069 = vrsqrt.f32 %v2601_v39  ;;  %v2600_v25 = vadd.f32 1e-05, %v2588_v13  ;;  %v2554_v0 = vmul.f32 0.0078125, %v2547_v20  ;;  %v2585_v33 = vmul.f32 %v2555_v22, %v2555_v22  ;;  %v4138_v20 = vld [vmem:[%s5580_s6] ss:$0 sm:$0xff] }
0x1350   :  { %v2573_v8 = vpop.xlane.xlu0 %2572  ;;  %v2597_v19 = vsub.f32 %v5373_v18, %v2555_v22 }
0x1351   :  { %4071 = vrsqrt.f32 %v2600_v25  ;;  %v2579_v53 = vmul.f32 0.0078125, %v2573_v8  ;;  %v2584_v9 = vmul.f32 %v2554_v0, %v2554_v0  ;;  %v2596_v12 = vsub.f32 %v5376_v23, %v2554_v0 }
0x1352   :  { %v2571_v15 = vpop.xlane.xlu1 %2570 }
0x1353   :  { %v2591_v27 = vsub.f32 %v2579_v53, %v2585_v33  ;;  %v2578_v6 = vmul.f32 0.0078125, %v2571_v15 }
0x1354   :  { %v4066_v49 = vpop.eup %4065 }
0x1355   :  { %v2603_v51 = vadd.f32 1e-05, %v2591_v27  ;;  %v2590_v5 = vsub.f32 %v2578_v6, %v2584_v9  ;;  %v2611_v35 = vmul.f32 %v4066_v49, %v2593_v59 }
0x1356   :  { %v4068_v3 = vpop.eup %4067 }
0x1357   :  { %4073 = vrsqrt.f32 %v2603_v51  ;;  %v2602_v38 = vadd.f32 1e-05, %v2590_v5  ;;  %v2610_v7 = vmul.f32 %v4068_v3, %v2592_v52  ;;  %v2617_v54 = vmul.f32 %v4136_v62, %v2611_v35 }
0x1359   :  { %4075 = vrsqrt.f32 %v2602_v38  ;;  %v2616_v61 = vmul.f32 %v4136_v62, %v2610_v7  ;;  %v2623_v34 = vadd.f32 %v4137_v36, %v2617_v54 }
0x135b   :  { %v2622_v44 = vadd.f32 %v4137_v36, %v2616_v61  ;;  %v2635_v43 = vmul.f32 0.01, %v2623_v34  ;;  %vm2629_vm5 = vcmp.ge.f32.partialorder %v2623_v34, 0.0 }
0x135c   :  { %v4070_v56 = vpop.eup %4069 }
0x135d   :  { %vm2628_vm4 = vcmp.ge.f32.partialorder %v2622_v44, 0.0  ;;  %v2634_v24 = vmul.f32 0.01, %v2622_v44  ;;  %v2613_v47 = vmul.f32 %v4070_v56, %v2595_v17  ;;  %v2641_v28 = vsel %vm2629_vm5, %v2623_v34, %v2635_v43 }
0x135e   :  { %v4072_v30 = vpop.eup %4071  ;;  %vm3223_vm5 = vcmask 9216  }
0x135f   :  { %v2640_v29 = vsel %vm2628_vm4, %v2622_v44, %v2634_v24  ;;  %v2612_v26 = vmul.f32 %v4072_v30, %v2594_v16  ;;  %v2619_v31 = vmul.f32 %v4136_v62, %v2613_v47  ;;  %vm3092_vm4 = vcmask 1041408  }
0x1360   :  { %3886 = vmatprep.mubr.f32.mxu0 %v2640_v29 }
0x1361   :  { %3887 = vmatmul.mubr.f32.vlgmr.msra.gmra.mxu0 %v2641_v28  ;;  %v2618_v55 = vmul.f32 %v4136_v62, %v2612_v26  ;;  %v2625_v4 = vadd.f32 %v4137_v36, %v2619_v31 }
0x1363   :  { %v2624_v50 = vadd.f32 %v4137_v36, %v2618_v55  ;;  %v2637_v48 = vmul.f32 0.01, %v2625_v4  ;;  %vm2631_vm9 = vcmp.ge.f32.partialorder %v2625_v4, 0.0 }
0x1364   :  { %v4074_v32 = vpop.eup %4073 }
0x1365   :  { %vm2630_vm7 = vcmp.ge.f32.partialorder %v2624_v50, 0.0  ;;  %v2636_v11 = vmul.f32 0.01, %v2624_v50  ;;  %v2615_v45 = vmul.f32 %v4074_v32, %v2597_v19  ;;  %v2643_v10 = vsel %vm2631_vm9, %v2625_v4, %v2637_v48 }
0x1366   :  { %v4076_v1 = vpop.eup %4075 }
0x1367   :  { %v2642_v41 = vsel %vm2630_vm7, %v2624_v50, %v2636_v11  ;;  %v2614_v46 = vmul.f32 %v4076_v1, %v2596_v12  ;;  %v2621_v37 = vmul.f32 %v4136_v62, %v2615_v45 }
0x1368   :  { %3889 = vmatprep.mubr.f32.mxu0 %v2642_v41 }
0x1369   :  { %3890 = vmatmul.mubr.f32.gmra.mxu0 %v2643_v10  ;;  %v2620_v63 = vmul.f32 %v4136_v62, %v2614_v46  ;;  %v2627_v60 = vadd.f32 %v4137_v36, %v2621_v37 }
0x136b   :  { %v2626_v21 = vadd.f32 %v4137_v36, %v2620_v63  ;;  %v2639_v18 = vmul.f32 0.01, %v2627_v60  ;;  %vm2633_vm11 = vcmp.ge.f32.partialorder %v2627_v60, 0.0 }
0x136d   :  { %vm2632_vm10 = vcmp.ge.f32.partialorder %v2626_v21, 0.0  ;;  %v2638_v57 = vmul.f32 0.01, %v2626_v21  ;;  %v2645_v58 = vsel %vm2633_vm11, %v2627_v60, %v2639_v18 }
0x136f   :  { %v2644_v23 = vsel %vm2632_vm10, %v2626_v21, %v2638_v57 }
0x1370   :  { %3892 = vmatprep.mubr.f32.mxu0 %v2644_v23 }
0x1371   :  { %3893 = vmatmul.mubr.f32.gmra.mxu0 %v2645_v58 }
0x1372   :  { %3925 = vmatprep.mubr.msk.f32.mxu0 %vm4166_vm3, %v5603_v14 }
0x1421   :  { %v3888_v39 = vpop.f32.mrf.mxu0 }
0x1422   :  { %v5418_v5 = vadd.f32 %v4138_v20, %v3888_v39 }
0x1423   :  { %v2712_v13 = vpop.f32.mrf.mxu0 }
0x1424   :  { %v5425_v7 = vadd.f32 %v4138_v20, %v2712_v13  ;;  %v2744_v62 = vsel %vm403_vm6, %v5418_v5, 0.0  ;;  %v2766_v44 = vmul.f32 %v5418_v5, %v5418_v5 }
0x1426   :  { %v2741_v36 = vsel %vm403_vm6, %v5425_v7, 0.0  ;;  %v2765_v34 = vmul.f32 %v5425_v7, %v5425_v7  ;;  %v2774_v16 = vsel %vm403_vm6, %v2766_v44, 0.0 }
0x1428   :  { %v2771_v56 = vsel %vm403_vm6, %v2765_v34, 0.0 }
0x1429   :  { %v3891_v22 = vpop.f32.mrf.mxu0 }
0x142a   :  { %v5399_v25 = vadd.f32 %v4138_v20, %v3891_v22 }
0x142b   :  { %v2722_v0 = vpop.f32.mrf.mxu0 }
0x142c   :  { %v5401_v8 = vadd.f32 %v4138_v20, %v2722_v0  ;;  %v2750_v33 = vsel %vm403_vm6, %v5399_v25, 0.0  ;;  %v2768_v53 = vmul.f32 %v5399_v25, %v5399_v25 }
0x142d   :  { %2751 = vadd.xlane.f32.xlu0 %v2750_v33 }
0x142e   :  { %v2780_v15 = vsel %vm403_vm6, %v2768_v53, 0.0  ;;  %v2747_v59 = vsel %vm403_vm6, %v5401_v8, 0.0  ;;  %v2767_v61 = vmul.f32 %v5401_v8, %v5401_v8 }
0x142f   :  { %2781 = vadd.xlane.f32.xlu1 %v2780_v15 }
0x1430   :  { %v2777_v17 = vsel %vm403_vm6, %v2767_v61, 0.0 }
0x1431   :  { %2748 = vadd.xlane.f32.xlu0 %v2747_v59  ;;  %v3894_v9 = vpop.f32.mrf.mxu0 }
0x1432   :  { %v5410_v27 = vadd.f32 %v4138_v20, %v3894_v9 }
0x1433   :  { %v2732_v6 = vpop.f32.mrf.mxu0 }
0x1434   :  { %v5412_v49 = vadd.f32 %v4138_v20, %v2732_v6  ;;  %v2756_v52 = vsel %vm403_vm6, %v5410_v27, 0.0  ;;  %v2770_v51 = vmul.f32 %v5410_v27, %v5410_v27 }
0x1435   :  { %2757 = vadd.xlane.f32.xlu1 %v2756_v52 }
0x1436   :  { %v2753_v35 = vsel %vm403_vm6, %v5412_v49, 0.0  ;;  %v2786_v3 = vsel %vm403_vm6, %v2770_v51, 0.0  ;;  %v2769_v38 = vmul.f32 %v5412_v49, %v5412_v49 }
0x1437   :  { %2754 = vadd.xlane.f32.xlu0 %v2753_v35 }
0x1438   :  { %v2783_v54 = vsel %vm403_vm6, %v2769_v38, 0.0 }
0x1439   :  { %2787 = vadd.xlane.f32.xlu1 %v2786_v3 }
0x143b   :  { %2745 = vadd.xlane.f32.xlu0 %v2744_v62 }
0x143d   :  { %2784 = vadd.xlane.f32.xlu1 %v2783_v54 }
0x143f   :  { %2742 = vadd.xlane.f32.xlu0 %v2741_v36  ;;  %v4139_v36 = vld [vmem:[%s5580_s6 + $0x1] ss:$0 sm:$0xff] }
0x1441   :  { %2778 = vadd.xlane.f32.xlu1 %v2777_v17 }
0x1443   :  { %2772 = vadd.xlane.f32.xlu0 %v2771_v56 }
0x1445   :  { %2775 = vadd.xlane.f32.xlu1 %v2774_v16 }
0x14b6   :  { %v2752_v43 = vpop.xlane.xlu0 %2751 }
0x14b7   :  { %v2762_v24 = vmul.f32 0.03125, %v2752_v43 }
0x14b8   :  { %v2782_v47 = vpop.xlane.xlu1 %2781 }
0x14b9   :  { %v2798_v30 = vmul.f32 %v2762_v24, %v2762_v24  ;;  %v2792_v29 = vmul.f32 0.03125, %v2782_v47  ;;  %v2810_v35 = vsub.f32 %v5399_v25, %v2762_v24  ;;  %v4140_v25 = vld [vmem:[%s5580_s6 + $0x2] ss:$0 sm:$0xff] }
0x14ba   :  { %v2749_v31 = vpop.xlane.xlu0 %2748 }
0x14bb   :  { %v2804_v26 = vsub.f32 %v2792_v29, %v2798_v30  ;;  %v2761_v41 = vmul.f32 0.03125, %v2749_v31 }
0x14bd   :  { %v2816_v4 = vadd.f32 1e-05, %v2804_v26  ;;  %v2797_v57 = vmul.f32 %v2761_v41, %v2761_v41 }
0x14be   :  { %v2758_v28 = vpop.xlane.xlu1 %2757 }
0x14bf   :  { %v2764_v55 = vmul.f32 0.03125, %v2758_v28  ;;  %4077 = vrsqrt.f32 %v2816_v4 }
0x14c0   :  { %v2755_v19 = vpop.xlane.xlu0 %2754 }
0x14c1   :  { %v2800_v32 = vmul.f32 %v2764_v55, %v2764_v55  ;;  %v2763_v12 = vmul.f32 0.03125, %v2755_v19  ;;  %v2812_v62 = vsub.f32 %v5410_v27, %v2764_v55  ;;  %v2809_v27 = vsub.f32 %v5401_v8, %v2761_v41 }
0x14c2   :  { %v2788_v50 = vpop.xlane.xlu1 %2787 }
0x14c3   :  { %v2794_v48 = vmul.f32 0.03125, %v2788_v50  ;;  %v2799_v46 = vmul.f32 %v2763_v12, %v2763_v12  ;;  %v2811_v17 = vsub.f32 %v5412_v49, %v2763_v12 }
0x14c4   :  { %v2746_v11 = vpop.xlane.xlu0 %2745 }
0x14c5   :  { %v2806_v45 = vsub.f32 %v2794_v48, %v2800_v32  ;;  %v2760_v23 = vmul.f32 0.03125, %v2746_v11 }
0x14c6   :  { %v2785_v1 = vpop.xlane.xlu1 %2784 }
0x14c7   :  { %v2818_v37 = vadd.f32 1e-05, %v2806_v45  ;;  %v2793_v10 = vmul.f32 0.03125, %v2785_v1  ;;  %v2796_v53 = vmul.f32 %v2760_v23, %v2760_v23  ;;  %v2808_v4 = vsub.f32 %v5418_v5, %v2760_v23  ;;  %v3013_v23 = vld [vmem:[%s5581_s7 + $0x10] sm:$0xff] }
0x14c8   :  { %v2743_v63 = vpop.xlane.xlu0 %2742 }
0x14c9   :  { %4079 = vrsqrt.f32 %v2818_v37  ;;  %v2805_v60 = vsub.f32 %v2793_v10, %v2799_v46  ;;  %v2759_v21 = vmul.f32 0.03125, %v2743_v63 }
0x14ca   :  { %v2779_v18 = vpop.xlane.xlu1 %2778 }
0x14cb   :  { %v2817_v58 = vadd.f32 1e-05, %v2805_v60  ;;  %v2791_v39 = vmul.f32 0.03125, %v2779_v18  ;;  %v2795_v22 = vmul.f32 %v2759_v21, %v2759_v21  ;;  %v2807_v26 = vsub.f32 %v5425_v7, %v2759_v21 }
0x14cc   :  { %v2773_v13 = vpop.xlane.xlu0 %2772  ;;  %v4078_v6 = vpop.eup %4077 }
0x14cd   :  { %4081 = vrsqrt.f32 %v2817_v58  ;;  %v2803_v20 = vsub.f32 %v2791_v39, %v2797_v57  ;;  %v2789_v0 = vmul.f32 0.03125, %v2773_v13  ;;  %v2828_v38 = vmul.f32 %v4078_v6, %v2810_v35  ;;  %v3014_v57 = vld [vmem:[%s5581_s7 + $0x18] sm:$0xff]  ;;  %v3011_v58 = vld [vmem:[%s5581_s7] sm:$0xff] }
0x14ce   :  { %v2776_v33 = vpop.xlane.xlu1 %2775  ;;  %3918 = vmatpush3.msra.mxu0 %v3014_v57  ;;  %v5604_v39 = vld [vmem:[#allocation5_spill] sm:$0xff] }
0x14cf   :  { %v2815_v15 = vadd.f32 1e-05, %v2803_v20  ;;  %v2801_v59 = vsub.f32 %v2789_v0, %v2795_v22  ;;  %v2790_v9 = vmul.f32 0.03125, %v2776_v33  ;;  %v2834_v34 = vmul.f32 %v4139_v36, %v2828_v38  ;;  %3919 = vmatprep.subr.mxu0 %v5603_v14  ;;  %v4141_v22 = vld [vmem:[%s5575_s1] sm:$0x3] }
0x14d0   :  { %3920 = vmatpush3.msra.mxu0 %v3013_v23  ;;  %v96_v13 = vsub.s32 1, %v5604_v39 }
0x14d1   :  { %4083 = vrsqrt.f32 %v2815_v15  ;;  %v2813_v52 = vadd.f32 1e-05, %v2801_v59  ;;  %v2802_v51 = vsub.f32 %v2790_v9, %v2796_v53  ;;  %v2840_v24 = vadd.f32 %v4140_v25, %v2834_v34  ;;  %3921 = vmatprep.subr.mxu0 %v5603_v14  ;;  %v3132_v34 = vld [vmem:[%s5583_s9 + $0x58] sm:$0xff] }
0x14d2   :  { %v97_v20 = vrot.slane %v4141_v22, %v96_v13 }
0x14d3   :  { %4085 = vrsqrt.f32 %v2813_v52  ;;  %v2814_v3 = vadd.f32 1e-05, %v2802_v51  ;;  %vm2846_vm13 = vcmp.ge.f32.partialorder %v2840_v24, 0.0  ;;  %v2852_v19 = vmul.f32 0.01, %v2840_v24 }
0x14d5   :  { %4087 = vrsqrt.f32 %v2814_v3  ;;  %v2858_v7 = vsel %vm2846_vm13, %v2840_v24, %v2852_v19  ;;  %v3125_v24 = vld [vmem:[%s5583_s9 + $0x20] sm:$0xff] }
0x14d6   :  { %v4080_v54 = vpop.eup %4079 }
0x14d7   :  { %v2830_v61 = vmul.f32 %v4080_v54, %v2812_v62  ;;  %v3136_v62 = vld [vmem:[%s5583_s9 + $0x78] sm:$0xff]  ;;  %v3135_v54 = vld [vmem:[%s5583_s9 + $0x70] sm:$0xff] }
0x14d9   :  { %v2836_v44 = vmul.f32 %v4139_v36, %v2830_v61  ;;  %v3134_v61 = vld [vmem:[%s5583_s9 + $0x68] sm:$0xff] }
0x14da   :  { %v4082_v56 = vpop.eup %4081 }
0x14db   :  { %v2842_v16 = vadd.f32 %v4140_v25, %v2836_v44  ;;  %v2829_v43 = vmul.f32 %v4082_v56, %v2811_v17  ;;  %v3131_v17 = vld [vmem:[%s5583_s9 + $0x50] sm:$0xff]  ;;  %v3130_v44 = vld [vmem:[%s5583_s9 + $0x48] sm:$0xff]  ;;  %v3129_v56 = vld [vmem:[%s5583_s9 + $0x40] sm:$0xff] }
0x14dd   :  { %vm2848_vm12 = vcmp.ge.f32.partialorder %v2842_v16, 0.0  ;;  %v2854_v47 = vmul.f32 0.01, %v2842_v16  ;;  %v2835_v30 = vmul.f32 %v4139_v36, %v2829_v43  ;;  %v3126_v43 = vld [vmem:[%s5583_s9 + $0x28] sm:$0xff] }
0x14de   :  { %v4084_v29 = vpop.eup %4083 }
0x14df   :  { %v2860_v31 = vsel %vm2848_vm12, %v2842_v16, %v2854_v47  ;;  %v2841_v28 = vadd.f32 %v4140_v25, %v2835_v30  ;;  %v2827_v49 = vmul.f32 %v4084_v29, %v2809_v27  ;;  %v3127_v16 = vld [vmem:[%s5583_s9 + $0x30] sm:$0xff]  ;;  %v3124_v27 = vld [vmem:[%s5583_s9 + $0x18] sm:$0xff]  ;;  %v3122_v30 = vld [vmem:[%s5583_s9 + $0x8] sm:$0xff] }
0x14e0   :  { %v4086_v55 = vpop.eup %4085  ;;  %3895 = vmatprep.subr.mxu1 %v2860_v31  ;;  %v3123_v47 = vld [vmem:[%s5583_s9 + $0x10] sm:$0xff]  ;;  %v3121_v29 = vld [vmem:[%s5583_s9] sm:$0xff] }
0x14e1   :  { %3896 = vmatpush3.msra.mxu1 %v2860_v31  ;;  %vm2847_vm14 = vcmp.ge.f32.partialorder %v2841_v28, 0.0  ;;  %v2853_v50 = vmul.f32 0.01, %v2841_v28  ;;  %v2833_v32 = vmul.f32 %v4139_v36, %v2827_v49  ;;  %v2825_v8 = vmul.f32 %v4086_v55, %v2807_v26 }
0x14e2   :  { %v4088_v12 = vpop.eup %4087 }
0x14e3   :  { %v2859_v48 = vsel %vm2847_vm14, %v2841_v28, %v2853_v50  ;;  %v2839_v11 = vadd.f32 %v4140_v25, %v2833_v32  ;;  %v2826_v45 = vmul.f32 %v4088_v12, %v2808_v4  ;;  %v2831_v1 = vmul.f32 %v4139_v36, %v2825_v8  ;;  %v3300_v8 = vld [vmem:[%s5582_s8 + $0x1] ss:$0 sm:$0xff] }
0x14e4   :  { %3897 = vmatprep.subr.mxu1 %v2859_v48 }
0x14e5   :  { %3898 = vmatpush3.msra.mxu1 %v2859_v48  ;;  %vm2845_vm15 = vcmp.ge.f32.partialorder %v2839_v11, 0.0  ;;  %v2851_v41 = vmul.f32 0.01, %v2839_v11  ;;  %v2832_v46 = vmul.f32 %v4139_v36, %v2826_v45  ;;  %v2837_v5 = vadd.f32 %v4140_v25, %v2831_v1  ;;  %v3133_v36 = vld [vmem:[%s5583_s9 + $0x60] sm:$0xff] }
0x14e6   :  { %3899 = vmatprep.subr.mxu1 %v2858_v7 }
0x14e7   :  { %3900 = vmatpush3.msra.mxu1 %v2858_v7  ;;  %v2857_v37 = vsel %vm2845_vm15, %v2839_v11, %v2851_v41  ;;  %v2838_v10 = vadd.f32 %v4140_v25, %v2832_v46  ;;  %v2849_v60 = vmul.f32 0.01, %v2837_v5  ;;  %vm2843_vm2 = vcmp.ge.f32.partialorder %v2837_v5, 0.0  ;;  %v3128_v25 = vld [vmem:[%s5583_s9 + $0x38] sm:$0xff]  ;;  %v3302_v7 = vld [vmem:[%s5583_s9 + $0x80] ss:$0 sm:$0xff] }
0x14e8   :  { %3901 = vmatprep.subr.mxu1 %v2857_v37 }
0x14e9   :  { %3902 = vmatpush3.msra.mxu1 %v2857_v37  ;;  %vm2844_vm0 = vcmp.ge.f32.partialorder %v2838_v10, 0.0  ;;  %v2850_v63 = vmul.f32 0.01, %v2838_v10  ;;  %v2855_v18 = vsel %vm2843_vm2, %v2837_v5, %v2849_v60 }
0x14eb   :  { %v2856_v21 = vsel %vm2844_vm0, %v2838_v10, %v2850_v63 }
0x14ec   :  { %3903 = vmatprep.subr.mxu1 %v2856_v21 }
0x14ed   :  { %3904 = vmatpush3.msra.mxu1 %v2856_v21 }
0x14ee   :  { %3905 = vmatprep.subr.mxu1 %v2855_v18 }
0x14ef   :  { %3906 = vmatpush3.msra.mxu1 %v2855_v18 }
0x14f0   :  { %3908 = vmatmul.mubr.msk.f32.vlgmr.msra.gmra.mxu1 %vm533_vm8, %v4537_v2  ;;  %3910 = vmatprep.subr.mxu1 %v5603_v14  ;;  %v3012_v2 = vld [vmem:[%s5581_s7 + $0x8] sm:$0xff]  ;;  %vm98_vm8 = vcmp.eq.s32.totalorder %v97_v20, %v5604_v39 }
0x14f1   :  { %3914 = vmatprep.mubr.msk.f32.mxu1 %vm4166_vm3, %v5603_v14  ;;  %3922 = vmatpush3.msra.mxu0 %v3012_v2  ;;  %v3247_v59 = vsel %vm98_vm8, 1.0, %v5603_v14  ;;  %v5605_v2 = vld [vmem:[#allocation7_spill] sm:$0xff] }
0x14f2   :  { %3923 = vmatprep.subr.mxu0 %v5603_v14 }
0x14f3   :  { %3924 = vmatpush3.msra.mxu0 %v3011_v58 }
0x15b0   :  { %v3909_v0 = vpop.f32.mrf.mxu1 }
0x15b1   :  { %v2937_v33 = vadd.f32 %v3909_v0, %v5281_v42 }
0x15b2   :  { %v2927_v53 = vpop.f32.mrf.mxu1 }
0x15b3   :  { %v2936_v15 = vadd.f32 %v2927_v53, %v5278_v40  ;;  %3911 = vmatpush3.msra.mxu1 %v2937_v33  ;;  %v3298_v40 = vld [vmem:[%s5582_s8] ss:$0 sm:$0xff] }
0x15b4   :  { %3912 = vmatprep.subr.mxu1 %v5603_v14 }
0x15b5   :  { %3913 = vmatpush3.msra.mxu1 %v2936_v15 }
0x15b6   :  { %3915 = vmatmul.mubr.msk.f32.vlgmr.msra.gmra.mxu1 %vm696_vm1, %v3247_v59  ;;  %3928 = vmatprep.subr.mxu1 %v5603_v14  ;;  %vm3212_vm1 = vcmp.eq.s32.totalorder %v5605_v2, 0 }
0x15b7   :  { %3960 = vmatprep.mubr.msk.f32.mxu1 %vm4166_vm3, %v5603_v14  ;;  %3929 = vmatpush3.msra.mxu1 %v3136_v62 }
0x15b8   :  { %3930 = vmatprep.subr.mxu1 %v5603_v14 }
0x15b9   :  { %3931 = vmatpush3.msra.mxu1 %v3135_v54 }
0x15ba   :  { %3932 = vmatprep.subr.mxu1 %v5603_v14 }
0x15bb   :  { %3933 = vmatpush3.msra.mxu1 %v3134_v61 }
0x15bc   :  { %3934 = vmatprep.subr.mxu1 %v5603_v14 }
0x15bd   :  { %3935 = vmatpush3.msra.mxu1 %v3133_v36 }
0x15be   :  { %3936 = vmatprep.subr.mxu1 %v5603_v14 }
0x15bf   :  { %3937 = vmatpush3.msra.mxu1 %v3132_v34 }
0x15c0   :  { %3938 = vmatprep.subr.mxu1 %v5603_v14 }
0x15c1   :  { %3939 = vmatpush3.msra.mxu1 %v3131_v17 }
0x15c2   :  { %3940 = vmatprep.subr.mxu1 %v5603_v14 }
0x15c3   :  { %3941 = vmatpush3.msra.mxu1 %v3130_v44 }
0x15c4   :  { %3942 = vmatprep.subr.mxu1 %v5603_v14 }
0x15c5   :  { %3943 = vmatpush3.msra.mxu1 %v3129_v56 }
0x15c6   :  { %3944 = vmatprep.subr.mxu1 %v5603_v14 }
0x15c7   :  { %3945 = vmatpush3.msra.mxu1 %v3128_v25 }
0x15c8   :  { %3946 = vmatprep.subr.mxu1 %v5603_v14 }
0x15c9   :  { %3947 = vmatpush3.msra.mxu1 %v3127_v16 }
0x15ca   :  { %3948 = vmatprep.subr.mxu1 %v5603_v14 }
0x15cb   :  { %3949 = vmatpush3.msra.mxu1 %v3126_v43 }
0x15cc   :  { %3950 = vmatprep.subr.mxu1 %v5603_v14 }
0x15cd   :  { %3951 = vmatpush3.msra.mxu1 %v3125_v24 }
0x15ce   :  { %3952 = vmatprep.subr.mxu1 %v5603_v14 }
0x15cf   :  { %3953 = vmatpush3.msra.mxu1 %v3124_v27 }
0x15d0   :  { %3954 = vmatprep.subr.mxu1 %v5603_v14 }
0x15d1   :  { %3955 = vmatpush3.msra.mxu1 %v3123_v47 }
0x15d2   :  { %3956 = vmatprep.subr.mxu1 %v5603_v14 }
0x15d3   :  { %3957 = vmatpush3.msra.mxu1 %v3122_v30 }
0x15d4   :  { %3958 = vmatprep.subr.mxu1 %v5603_v14  ;;  %v3301_v14 = vld [vmem:[%s5582_s8 + $0x2] ss:$0 sm:$0xff]  ;;  %s4167_s8 = smov [#allocation2]  }
0x15d5   :  { %3959 = vmatpush3.msra.mxu1 %v3121_v29  ;;  %s3231_s4 = sshll.u32 %s4167_s8, 4  ;;  %s3232_s4 = int_to_ptr.vmem [resolvable:$true] %s3231_s4 }
0x15d6   :  { %s4142_s9 = scalar_lea.vmem %s3232_s4, 32  ;;  %p4147_p1 = scmp.lt.s32.totalorder %s3232_s4, %s3232_s4 }
0x15d7   :  { %p4143_p0 = scmp.ne.s32.totalorder %s3232_s4, %s4142_s9  ;;  %p4148_p2 = scmp.lt.s32.totalorder %s4142_s9, %s4142_s9 }
0x15d9   :  { %p4149_p3 = por %p4148_p2, %p4147_p1 }
0x15db   :  { %p4150_p4 = pnand %p4149_p3, %p4143_p0 }
0x1676   :  { %v3007_v9 = vpop.f32.mrf.mxu1 }
0x1677   :  { %3926 = vmatmul.mubr.msk.f32.vlgmr.msra.gmra.mxu0 %vm403_vm6, %v3007_v9 }
0x1678   :  { %v3916_v42 = vpop.f32.mrf.mxu1 }
0x1737   :  { %v3088_v6 = vpop.f32.mrf.mxu0 }
0x1738   :  { %v5492_v52 = vadd.f32 %v3298_v40, %v3088_v6 }
0x1739   :  { %v3927_v51 = vpop.f32.mrf.mxu0 }
0x173a   :  { %v3093_v35 = vsel %vm3092_vm4, %v5492_v52, 0.0  ;;  %v3097_v3 = vmul.f32 %v5492_v52, %v5492_v52 }
0x173b   :  { %3094 = vadd.xlane.f32.xlu1 %v3093_v35 }
0x173c   :  { %v3098_v38 = vsel %vm3092_vm4, %v3097_v3, 0.0 }
0x173d   :  { %3099 = vadd.xlane.f32.xlu0 %v3098_v38 }
0x17c4   :  { %v3095_v26 = vpop.xlane.xlu1 %3094 }
0x17c5   :  { %v3096_v31 = vmul.f32 0.0078125, %v3095_v26 }
0x17c6   :  { %v3100_v28 = vpop.xlane.xlu0 %3099 }
0x17c7   :  { %v3102_v49 = vmul.f32 %v3096_v31, %v3096_v31  ;;  %v3101_v55 = vmul.f32 0.0078125, %v3100_v28  ;;  %v3104_v50 = vsub.f32 %v5492_v52, %v3096_v31 }
0x17c9   :  { %v3103_v4 = vsub.f32 %v3101_v55, %v3102_v49 }
0x17cb   :  { %v3105_v19 = vadd.f32 1e-05, %v3103_v4 }
0x17cd   :  { %4089 = vrsqrt.f32 %v3105_v19 }
0x17da   :  { %v4090_v32 = vpop.eup %4089 }
0x17db   :  { %v3107_v12 = vmul.f32 %v4090_v32, %v3104_v50 }
0x17dd   :  { %v3112_v48 = vmul.f32 %v3300_v8, %v3107_v12 }
0x17df   :  { %v3117_v11 = vadd.f32 %v3301_v14, %v3112_v48 }
0x17e1   :  { %vm3118_vm6 = vcmp.ge.f32.partialorder %v3117_v11, 0.0  ;;  %v3119_v45 = vmul.f32 0.01, %v3117_v11 }
0x17e3   :  { %v3120_v1 = vsel %vm3118_vm6, %v3117_v11, %v3119_v45 }
0x17e4   :  { %3961 = vmatmul.mubr.f32.vlgmr.msra.gmra.mxu1 %v3120_v1 }
0x18a4   :  { %v3208_v41 = vpop.f32.mrf.mxu1 }
0x18a5   :  { %v3209_v46 = vadd.f32 %v3302_v7, %v3208_v41 }
0x18a6   :  { %v3962_v5 = vpop.f32.mrf.mxu1 }
0x18a7   :  { %v3214_v37 = vand.u32 2147483647, %v3209_v46  ;;  %v3213_v57 = vmax.f32 %v3209_v46, 0.0 }
0x18a9   :  { %v3215_v10 = vsub.f32 0.0, %v3214_v37 }
0x18ab   :  { %v3216_v63 = vmul.f32 1.442695, %v3215_v10 }
0x18ad   :  { %4091 = vpow2.f32 %v3216_v63 }
0x18ba   :  { %v4092_v60 = vpop.eup %4091 }
0x18bb   :  { %v3218_v21 = vadd.f32 1.0, %v4092_v60 }
0x18bd   :  { %4093 = vlog2.f32 %v3218_v21 }
0x18ca   :  { %v4094_v18 = vpop.eup %4093 }
0x18cb   :  { %v3220_v23 = vmul.f32 0.6931472, %v4094_v18 }
0x18cd   :  { %v3221_v58 = vadd.f32 %v3220_v23, %v3213_v57 }
0x18cf   :  { %v3222_v39 = vsel %vm3212_vm1, %v3209_v46, %v3221_v58 }
0x18d0   :  { %3224 = vst.msk [vmem:[#allocation2] sm:$0x3] %vm3223_vm5, %v3222_v39 }
0x18d1   :  { %4153 = shalt.err (!%p4150_p4)
}
0x18d2   :  { %3234 = dma.vmem_to_hbm [thread:$0]  %s3232_s4, 32, %s5584_s10, [#allocation3]  }
0x18d3   :  { %4162 = dma.done.wait [#allocation3], 32  }
0x18d4   :  { %4163 = vsyncadd [#allocation3], 4294967264 }
0x18d5   :  { %3238 = vsyncpa [#allocation3], 1 }

</bundles_post_ra>
